<compile_context>
chip_gen: v6e
topology: v6e:2x2x1
jax: 0.10.0
libtpu: 0.0.40
codegen_flags: <defaults>
</compile_context>

<pallas_src>
import numpy as np
import jax
import jax.numpy as jnp
from jax import lax
from jax.experimental import pallas as pl
from jax.experimental.pallas import tpu as pltpu

# ----------------------------- configuration --------------------------------
N = 2          # batch
H = W = 16     # spatial
C_IN = 4       # downconv_in_dim (== upconv_out_dim, per module default)
C_DOWN = 8     # downconv_out_dim
C_UP = 4       # upconv_out_dim
HO, WO = H // 2, W // 2          # down-conv output spatial


def _vmem_spec():
    return pl.BlockSpec(memory_space=pltpu.MemorySpace.VMEM)


# ------------------------------- fused kernel --------------------------------
def unet_block_kernel(x_ref, d_ref, g_ref, bias_ref, o_ref):
    """Entire UnetBlock forward in one kernel.

    x_ref   : (N, C_IN*H*W)            raw input, NCHW-flat (also the skip channels)
    d_ref   : (C_IN*H*W, C_DOWN*HO*WO) folded 4x4/s2 conv (weights + spatial gather)
    g_ref   : (C_DOWN*HO*WO, C_UP*H*W) folded upsample + 3x3 conv + BN-scale matrix
    bias_ref: (1, C_UP*H*W)            folded eval-mode BatchNorm bias (per-channel bcast)
    o_ref   : (N, (C_IN+C_UP)*H*W)     NCHW-flat output (skip || up), lane-dense
    """
    x = x_ref[...]
    a = jnp.where(x > 0, x, 0.2 * x)                                   # LeakyReLU(0.2)
    xd = jnp.dot(a, d_ref[...], preferred_element_type=jnp.float32)    # (N, C_DOWN*HO*WO)

    # submodule: identity pass-through

    xr = jnp.maximum(xd, 0.0)                                          # ReLU
    y = jnp.dot(xr, g_ref[...], preferred_element_type=jnp.float32)    # (N, C_UP*H*W)
    y = y + bias_ref[...]                                              # eval-mode BN bias

    o_ref[:, :C_IN * H * W] = x                                        # skip channels
    o_ref[:, C_IN * H * W:] = y.astype(o_ref.dtype)                    # up channels


# --------------------------------- wrapper ------------------------------------
def unet_block_forward(params, x_nchw, feat_motion, feat_appear):
    n, cin, h, w = x_nchw.shape
    # metadata-only reshape (NCHW is contiguous): no XLA glue, no HBM round trip
    x_flat = x_nchw.reshape(n, cin * h * w)

    out_flat = pl.pallas_call(
        unet_block_kernel,
        out_shape=jax.ShapeDtypeStruct((n, (cin + C_UP) * h * w), jnp.float32),
        in_specs=[_vmem_spec()] * 4,
        out_specs=_vmem_spec(),
    )(x_flat, params["d_mat"], params["g_mat"], params["bn_bias_row"])

    out = out_flat.reshape(n, cin + C_UP, h, w)                        # metadata reshape
    return out, feat_motion, feat_appear


# --------------------------- constant-matrix builders -------------------------
def interp_matrix(s):
    """(2s, s) bilinear upsample matrix, scale=2, align_corners=True."""
    out = jnp.arange(2 * s, dtype=jnp.float32)
    src = out * (s - 1) / (2 * s - 1)
    lo = jnp.clip(jnp.floor(src).astype(jnp.int32), 0, s - 2)
    frac = src - lo.astype(jnp.float32)
    return (jax.nn.one_hot(lo, s, dtype=jnp.float32) * (1.0 - frac)[:, None]
            + jax.nn.one_hot(lo + 1, s, dtype=jnp.float32) * frac[:, None])


def strided_gather(size_in, size_out, k, stride, pad):
    """S[t, h, p] = 1 iff h == stride*p + t - pad  (zero padding handled by bounds)."""
    t = jnp.arange(k).reshape(k, 1, 1)
    h = jnp.arange(size_in).reshape(1, size_in, 1)
    p = jnp.arange(size_out).reshape(1, 1, size_out)
    return (h == stride * p + t - pad).astype(jnp.float32)


def build_params():
    key = jax.random.PRNGKey(0)
    k1, k2, k3, k4, k5, k6 = jax.random.split(key, 6)
    # PyTorch weight shapes (OIHW), deterministically initialized
    w_down_oihw = jax.random.normal(k1, (C_DOWN, C_IN, 4, 4), jnp.float32) * 0.1
    w_up_oihw = jax.random.normal(k2, (C_UP, C_DOWN, 3, 3), jnp.float32) * 0.1
    gamma = jax.random.uniform(k3, (C_UP,), minval=0.5, maxval=1.5)
    beta = jax.random.normal(k4, (C_UP,)) * 0.1
    run_mean = jax.random.normal(k5, (C_UP,)) * 0.1
    run_var = jax.random.uniform(k6, (C_UP,), minval=0.5, maxval=1.5)
    eps = 1e-5
    bn_scale = gamma / jnp.sqrt(run_var + eps)
    bn_bias = beta - run_mean * bn_scale

    # --- D: fully folded 4x4 / stride-2 / pad-1 down conv ---
    # D[(ci,h,w), (cd,p,q)] = sum_{kh,kw} Wd[cd,ci,kh,kw] [h==2p+kh-1][w==2q+kw-1]
    sh = strided_gather(H, HO, 4, 2, 1)                               # (4, H, HO)
    sw = strided_gather(W, WO, 4, 2, 1)                               # (4, W, WO)
    d_mat = jnp.einsum("dckl,khp,lwq->chwdpq", w_down_oihw, sh, sw
                       ).reshape(C_IN * H * W, C_DOWN * HO * WO)      # (1024, 512)

    # --- G: fully folded bilinear x2 (align_corners) + 3x3 pad-1 conv + BN scale ---
    a_h = interp_matrix(HO)                                           # (H, HO)
    a_w = interp_matrix(WO)                                           # (W, WO)
    ch = strided_gather(H, H, 3, 1, 1)                                # (3, i', i)
    cw = strided_gather(W, W, 3, 1, 1)
    bh = jnp.einsum("uxi,xp->upi", ch, a_h)                           # (3, HO, H)
    bw = jnp.einsum("vxj,xq->vqj", cw, a_w)                           # (3, WO, W)
    w_up_scaled = w_up_oihw * bn_scale.reshape(-1, 1, 1, 1)           # fold BN scale
    g_mat = jnp.einsum("ecuv,upi,vqj->cpqeij", w_up_scaled, bh, bw
                       ).reshape(C_DOWN * HO * WO, C_UP * H * W)      # (512, 1024)

    bn_bias_row = jnp.repeat(bn_bias, H * W).reshape(1, C_UP * H * W)

    return {
        "d_mat": d_mat,
        "g_mat": g_mat,
        "bn_bias_row": bn_bias_row,
        # raw params for the pure-JAX reference
        "w_down_oihw": w_down_oihw,
        "w_up_oihw": w_up_oihw,
        "bn_scale": bn_scale,
        "bn_bias": bn_bias,
        "a_h": a_h,
        "a_w": a_w,
    }


# ------------------------------ pure-JAX reference ---------------------------
def ref_forward(params, x_nchw, feat_motion, feat_appear):
    y = jnp.where(x_nchw > 0, x_nchw, 0.2 * x_nchw)
    y = lax.conv_general_dilated(y, params["w_down_oihw"], (2, 2), ((1, 1), (1, 1)),
                                 dimension_numbers=("NCHW", "OIHW", "NCHW"))
    z = jnp.maximum(y, 0.0)
    z = jnp.einsum("ih,nchw->nciw", params["a_h"], z)
    z = jnp.einsum("jw,nciw->ncij", params["a_w"], z)
    u = lax.conv_general_dilated(z, params["w_up_oihw"], (1, 1), ((1, 1), (1, 1)),
                                 dimension_numbers=("NCHW", "OIHW", "NCHW"))
    u = u * params["bn_scale"].reshape(1, -1, 1, 1) + params["bn_bias"].reshape(1, -1, 1, 1)
    return jnp.concatenate([x_nchw, u], axis=1), feat_motion, feat_appear


# ---------------------------------- main -------------------------------------
if __name__ == "__main__":
    params = build_params()

    kx, km, ka = jax.random.split(jax.random.PRNGKey(0), 3)
    x = jax.random.normal(kx, (N, C_IN, H, W), jnp.float32)
    feat_motion = jax.random.normal(km, (N, 32), jnp.float32)
    feat_appear = jax.random.normal(ka, (N, 32), jnp.float32)

    fwd = jax.jit(lambda xx, fm, fa: unet_block_forward(params, xx, fm, fa))
    out, fm_out, fa_out = fwd(x, feat_motion, feat_appear)
    jax.block_until_ready(out)

    ref_out, _, _ = ref_forward(params, x, feat_motion, feat_appear)
    assert out.shape == (N, C_IN + C_UP, H, W), out.shape
    np.testing.assert_allclose(np.asarray(out), np.asarray(ref_out),
                               atol=2e-4, rtol=2e-4)
    print("KERNEL_OK")
</pallas_src>

<mosaic_0001>
module attributes {stable_mosaic.version = 11 : i64} {
  func.func @unet_block_kernel(%arg0: memref<2x1024xf32, #tpu.memory_space<vmem>>, %arg1: memref<1024x512xf32, #tpu.memory_space<vmem>>, %arg2: memref<512x1024xf32, #tpu.memory_space<vmem>>, %arg3: memref<1x1024xf32, #tpu.memory_space<vmem>>, %arg4: memref<2x2048xf32, #tpu.memory_space<vmem>>) attributes {dimension_semantics = [], scalar_prefetch = 0 : i64, scratch_operands = 0 : i64, tpu.core_type = #tpu.core_type<tc>} {
    %c0 = arith.constant 0 : index
    %c0_0 = arith.constant 0 : index
    %0 = vector.load %arg0[%c0, %c0_0] : memref<2x1024xf32, #tpu.memory_space<vmem>>, vector<2x1024xf32>
    %cst = arith.constant 0.000000e+00 : f32
    %1 = vector.broadcast %cst : f32 to vector<2x1024xf32>
    %2 = arith.cmpf ogt, %0, %1 : vector<2x1024xf32>
    %cst_1 = arith.constant 2.000000e-01 : f32
    %3 = vector.broadcast %cst_1 : f32 to vector<2x1024xf32>
    %4 = arith.mulf %3, %0 : vector<2x1024xf32>
    %5 = arith.select %2, %0, %4 : vector<2x1024xi1>, vector<2x1024xf32>
    %c0_2 = arith.constant 0 : index
    %c0_3 = arith.constant 0 : index
    %6 = vector.load %arg1[%c0_2, %c0_3] : memref<1024x512xf32, #tpu.memory_space<vmem>>, vector<1024x512xf32>
    %cst_4 = arith.constant dense<0.000000e+00> : vector<2x512xf32>
    %7 = tpu.matmul %5, %6, %cst_4 {dimension_numbers = #tpu.dot_dimension_numbers<[1], [0], [0], [1], [0, 0, 1, 1], [], []>} : vector<2x1024xf32>, vector<1024x512xf32>, vector<2x512xf32> -> vector<2x512xf32>
    %cst_5 = arith.constant 0.000000e+00 : f32
    %8 = vector.broadcast %cst_5 : f32 to vector<2x512xf32>
    %9 = arith.maximumf %7, %8 : vector<2x512xf32>
    %c0_6 = arith.constant 0 : index
    %c0_7 = arith.constant 0 : index
    %10 = vector.load %arg2[%c0_6, %c0_7] : memref<512x1024xf32, #tpu.memory_space<vmem>>, vector<512x1024xf32>
    %cst_8 = arith.constant dense<0.000000e+00> : vector<2x1024xf32>
    %11 = tpu.matmul %9, %10, %cst_8 {dimension_numbers = #tpu.dot_dimension_numbers<[1], [0], [0], [1], [0, 0, 1, 1], [], []>} : vector<2x512xf32>, vector<512x1024xf32>, vector<2x1024xf32> -> vector<2x1024xf32>
    %c0_9 = arith.constant 0 : index
    %c0_10 = arith.constant 0 : index
    %12 = vector.load %arg3[%c0_9, %c0_10] : memref<1x1024xf32, #tpu.memory_space<vmem>>, vector<1x1024xf32>
    %13 = vector.broadcast %12 : vector<1x1024xf32> to vector<2x1024xf32>
    %14 = arith.addf %11, %13 : vector<2x1024xf32>
    %c0_11 = arith.constant 0 : index
    %c0_12 = arith.constant 0 : index
    %15 = vector.load %arg4[%c0_11, %c0_12] : memref<2x2048xf32, #tpu.memory_space<vmem>>, vector<2x1024xf32>
    tpu.vector_store %arg4[%c0_11, %c0_12], %0 {strides = array<i32>} : memref<2x2048xf32, #tpu.memory_space<vmem>>, vector<2x1024xf32>,
    %c0_13 = arith.constant 0 : index
    %c1024 = arith.constant 1024 : index
    %16 = vector.load %arg4[%c0_13, %c1024] : memref<2x2048xf32, #tpu.memory_space<vmem>>, vector<2x1024xf32>
    tpu.vector_store %arg4[%c0_13, %c1024], %14 {strides = array<i32>} : memref<2x2048xf32, #tpu.memory_space<vmem>>, vector<2x1024xf32>,
    return
  }
}

</mosaic_0001>

<bundles_post_ra>
// kernel: _lambda_.1
= control target key start
LH: loop header
LB: loop body
LE: loop exit
PB: predicated region body
PF: predicated region fallthrough
CT: control target
= control target key end

     0   :  { %9 = vsyncpa [#allocation3], 0  ;;  %s2591_s0 = inlined_call_operand.vmem [shape: f32[2,1024], index: 0, kind: input, shape index: {}]   ;;  %s2592_s1 = inlined_call_operand.hbm [shape: f32[1024,512], index: 1, kind: input, shape index: {}]   ;;  %s2593_s2 = inlined_call_operand.hbm [shape: f32[512,1024], index: 2, kind: input, shape index: {}]   ;;  %s2594_s3 = inlined_call_operand.hbm [shape: f32[1,1024], index: 3, kind: input, shape index: {}]   ;;  %s2595_s4 = inlined_call_operand.vmem [shape: f32[2,2048], index: 4, kind: output, shape index: {}]  }
   0x1   :  { %10 = vsyncpa [#allocation5], 0  ;;  %s2440_s15 = smov [#allocation4]  }
   0x2   :  { %s30_s16 = sshll.u32 %s2440_s15, 4  ;;  %s31_s16 = int_to_ptr.vmem [resolvable:$true] %s30_s16 }
   0x3   :  { %s2384_s17 = scalar_lea.vmem %s31_s16, 65536  ;;  %p2389_p1 = scmp.lt.s32.totalorder %s31_s16, %s31_s16 }
   0x4   :  { %p2385_p0 = scmp.ne.s32.totalorder %s31_s16, %s2384_s17  ;;  %p2390_p2 = scmp.lt.s32.totalorder %s2384_s17, %s2384_s17 }
   0x6   :  { %p2391_p3 = por %p2390_p2, %p2389_p1 }
   0x8   :  { %p2392_p4 = pnand %p2391_p3, %p2385_p0 }
   0xa   :  { %2395 = shalt.err (!%p2392_p4)
}
   0xb   :  { %s2441_s18 = smov 1024   ;;  %s2442_s19 = smov 64  }
   0xc   :  { %36 = dma.hbm_to_vmem [thread:$0]  %s2593_s2, 65536, %s31_s16, [#allocation5], %s2441_s18, %s2441_s18, %s2442_s19  }
   0xd   :  { %s2443_s22 = smov [#allocation2]  }
   0xe   :  { %s18_s23 = sshll.u32 %s2443_s22, 4  ;;  %s19_s23 = int_to_ptr.vmem [resolvable:$true] %s18_s23 }
   0xf   :  { %s2404_s24 = scalar_lea.vmem %s19_s23, 65536  ;;  %p2409_p6 = scmp.lt.s32.totalorder %s19_s23, %s19_s23 }
  0x10   :  { %p2405_p5 = scmp.ne.s32.totalorder %s19_s23, %s2404_s24  ;;  %p2410_p7 = scmp.lt.s32.totalorder %s2404_s24, %s2404_s24 }
  0x12   :  { %p2411_p8 = por %p2410_p7, %p2409_p6 }
  0x14   :  { %p2412_p9 = pnand %p2411_p8, %p2405_p5 }
  0x16   :  { %2415 = shalt.err (!%p2412_p9)
}
  0x17   :  { %s2444_s25 = smov 512   ;;  %s2445_s26 = smov 32  }
  0x18   :  { %24 = dma.hbm_to_vmem [thread:$0]  %s2592_s1, 65536, %s19_s23, [#allocation3], %s2444_s25, %s2444_s25, %s2445_s26  }
  0x19   :  { %s2446_s29 = smov [#allocation6]  }
  0x1a   :  { %s43_s30 = sshll.u32 %s2446_s29, 4  ;;  %s44_s30 = int_to_ptr.vmem [resolvable:$true] %s43_s30 }
  0x1b   :  { %s2424_s2 = scalar_lea.vmem %s44_s30, 128  ;;  %p2429_p11 = scmp.lt.s32.totalorder %s44_s30, %s44_s30 }
  0x1c   :  { %p2425_p10 = scmp.ne.s32.totalorder %s44_s30, %s2424_s2  ;;  %p2430_p12 = scmp.lt.s32.totalorder %s2424_s2, %s2424_s2 }
  0x1e   :  { %p2431_p13 = por %p2430_p12, %p2429_p11 }
  0x20   :  { %p2432_p0 = pnand %p2431_p13, %p2425_p10 }
  0x22   :  { %2435 = shalt.err (!%p2432_p0)
}
  0x23   :  { %46 = dma.hbm_to_vmem [thread:$0]  %s2594_s3, 128, %s44_s30, [#allocation5]  }
  0x24   :  { %2436 = dma.done.wait [#allocation3], 65536  }
  0x25   :  { %2437 = vsyncadd [#allocation3], 4294901760 }
  0x26   :  { %2438 = dma.done.wait [#allocation5], 65664  }
  0x27   :  { %2439 = vsyncadd [#allocation5], 4294901632  ;;  %v125_v0 = vld [vmem:[#allocation2 + $0x1e8] sm:$0xff]  ;;  %v124_v2 = vld [vmem:[#allocation2 + $0x1e0] sm:$0xff] }
  0x28   :  { %v253_v1 = vld [vmem:[#allocation2 + $0x5e8] sm:$0xff]  ;;  %620 = vmatprep.subr.mxu0 %v125_v0  ;;  %v252_v3 = vld [vmem:[#allocation2 + $0x5e0] sm:$0xff] }
  0x29   :  { %691 = vmatprep.subr.mxu1 %v253_v1  ;;  %v121_v4 = vld [vmem:[#allocation2 + $0x1c8] sm:$0xff]  ;;  %621 = vmatpush1.msra.mxu0 %v124_v2  ;;  %v120_v6 = vld [vmem:[#allocation2 + $0x1c0] sm:$0xff] }
  0x2a   :  { %v249_v5 = vld [vmem:[#allocation2 + $0x5c8] sm:$0xff]  ;;  %692 = vmatpush1.msra.mxu1 %v252_v3  ;;  %v248_v7 = vld [vmem:[#allocation2 + $0x5c0] sm:$0xff]  ;;  %622 = vmatprep.subr.mxu0 %v121_v4 }
  0x2b   :  { %v117_v8 = vld [vmem:[#allocation2 + $0x1a8] sm:$0xff]  ;;  %693 = vmatprep.subr.mxu1 %v249_v5  ;;  %v116_v10 = vld [vmem:[#allocation2 + $0x1a0] sm:$0xff]  ;;  %623 = vmatpush1.msra.mxu0 %v120_v6 }
  0x2c   :  { %v245_v9 = vld [vmem:[#allocation2 + $0x5a8] sm:$0xff]  ;;  %v244_v11 = vld [vmem:[#allocation2 + $0x5a0] sm:$0xff]  ;;  %694 = vmatpush1.msra.mxu1 %v248_v7  ;;  %624 = vmatprep.subr.mxu0 %v117_v8 }
  0x2d   :  { %v113_v12 = vld [vmem:[#allocation2 + $0x188] sm:$0xff]  ;;  %695 = vmatprep.subr.mxu1 %v245_v9  ;;  %v112_v14 = vld [vmem:[#allocation2 + $0x180] sm:$0xff]  ;;  %625 = vmatpush1.msra.mxu0 %v116_v10 }
  0x2e   :  { %v241_v13 = vld [vmem:[#allocation2 + $0x588] sm:$0xff]  ;;  %v240_v15 = vld [vmem:[#allocation2 + $0x580] sm:$0xff]  ;;  %696 = vmatpush1.msra.mxu1 %v244_v11  ;;  %626 = vmatprep.subr.mxu0 %v113_v12 }
  0x2f   :  { %v109_v16 = vld [vmem:[#allocation2 + $0x168] sm:$0xff]  ;;  %697 = vmatprep.subr.mxu1 %v241_v13  ;;  %v108_v18 = vld [vmem:[#allocation2 + $0x160] sm:$0xff]  ;;  %627 = vmatpush1.msra.mxu0 %v112_v14 }
  0x30   :  { %v237_v17 = vld [vmem:[#allocation2 + $0x568] sm:$0xff]  ;;  %v236_v19 = vld [vmem:[#allocation2 + $0x560] sm:$0xff]  ;;  %698 = vmatpush1.msra.mxu1 %v240_v15  ;;  %628 = vmatprep.subr.mxu0 %v109_v16 }
  0x31   :  { %v105_v20 = vld [vmem:[#allocation2 + $0x148] sm:$0xff]  ;;  %699 = vmatprep.subr.mxu1 %v237_v17  ;;  %v104_v22 = vld [vmem:[#allocation2 + $0x140] sm:$0xff]  ;;  %629 = vmatpush1.msra.mxu0 %v108_v18 }
  0x32   :  { %v233_v21 = vld [vmem:[#allocation2 + $0x548] sm:$0xff]  ;;  %v232_v23 = vld [vmem:[#allocation2 + $0x540] sm:$0xff]  ;;  %700 = vmatpush1.msra.mxu1 %v236_v19  ;;  %630 = vmatprep.subr.mxu0 %v105_v20 }
  0x33   :  { %v101_v24 = vld [vmem:[#allocation2 + $0x128] sm:$0xff]  ;;  %701 = vmatprep.subr.mxu1 %v233_v21  ;;  %v100_v26 = vld [vmem:[#allocation2 + $0x120] sm:$0xff]  ;;  %631 = vmatpush1.msra.mxu0 %v104_v22 }
  0x34   :  { %v229_v25 = vld [vmem:[#allocation2 + $0x528] sm:$0xff]  ;;  %v228_v27 = vld [vmem:[#allocation2 + $0x520] sm:$0xff]  ;;  %702 = vmatpush1.msra.mxu1 %v232_v23  ;;  %632 = vmatprep.subr.mxu0 %v101_v24 }
  0x35   :  { %v97_v28 = vld [vmem:[#allocation2 + $0x108] sm:$0xff]  ;;  %703 = vmatprep.subr.mxu1 %v229_v25  ;;  %v96_v30 = vld [vmem:[#allocation2 + $0x100] sm:$0xff]  ;;  %633 = vmatpush1.msra.mxu0 %v100_v26 }
  0x36   :  { %v225_v29 = vld [vmem:[#allocation2 + $0x508] sm:$0xff]  ;;  %v224_v31 = vld [vmem:[#allocation2 + $0x500] sm:$0xff]  ;;  %704 = vmatpush1.msra.mxu1 %v228_v27  ;;  %634 = vmatprep.subr.mxu0 %v97_v28 }
  0x37   :  { %v93_v32 = vld [vmem:[#allocation2 + $0xe8] sm:$0xff]  ;;  %705 = vmatprep.subr.mxu1 %v225_v29  ;;  %v92_v34 = vld [vmem:[#allocation2 + $0xe0] sm:$0xff]  ;;  %635 = vmatpush1.msra.mxu0 %v96_v30 }
  0x38   :  { %v221_v33 = vld [vmem:[#allocation2 + $0x4e8] sm:$0xff]  ;;  %v220_v35 = vld [vmem:[#allocation2 + $0x4e0] sm:$0xff]  ;;  %706 = vmatpush1.msra.mxu1 %v224_v31  ;;  %636 = vmatprep.subr.mxu0 %v93_v32  ;;  %v2447_v31 = vmov 1983009808  }
  0x39   :  { %v89_v36 = vld [vmem:[#allocation2 + $0xc8] sm:$0xff]  ;;  %707 = vmatprep.subr.mxu1 %v221_v33  ;;  %v88_v38 = vld [vmem:[#allocation2 + $0xc0] sm:$0xff]  ;;  %637 = vmatpush1.msra.mxu0 %v92_v34  ;;  %v580_v32 = vunpack.c.l.s4 %v2447_v31  ;;  %v582_v33 = vlaneseq }
  0x3a   :  { %v217_v37 = vld [vmem:[#allocation2 + $0x4c8] sm:$0xff]  ;;  %v216_v39 = vld [vmem:[#allocation2 + $0x4c0] sm:$0xff]  ;;  %708 = vmatpush1.msra.mxu1 %v220_v35  ;;  %638 = vmatprep.subr.mxu0 %v89_v36 }
  0x3b   :  { %v85_v40 = vld [vmem:[#allocation2 + $0xa8] sm:$0xff]  ;;  %709 = vmatprep.subr.mxu1 %v217_v37  ;;  %v84_v42 = vld [vmem:[#allocation2 + $0xa0] sm:$0xff]  ;;  %639 = vmatpush1.msra.mxu0 %v88_v38 }
  0x3c   :  { %v213_v41 = vld [vmem:[#allocation2 + $0x4a8] sm:$0xff]  ;;  %v212_v43 = vld [vmem:[#allocation2 + $0x4a0] sm:$0xff]  ;;  %710 = vmatpush1.msra.mxu1 %v216_v39  ;;  %640 = vmatprep.subr.mxu0 %v85_v40 }
  0x3d   :  { %v81_v44 = vld [vmem:[#allocation2 + $0x88] sm:$0xff]  ;;  %711 = vmatprep.subr.mxu1 %v213_v41  ;;  %v80_v46 = vld [vmem:[#allocation2 + $0x80] sm:$0xff]  ;;  %641 = vmatpush1.msra.mxu0 %v84_v42 }
  0x3e   :  { %v209_v45 = vld [vmem:[#allocation2 + $0x488] sm:$0xff]  ;;  %v208_v47 = vld [vmem:[#allocation2 + $0x480] sm:$0xff]  ;;  %712 = vmatpush1.msra.mxu1 %v212_v43  ;;  %642 = vmatprep.subr.mxu0 %v81_v44  ;;  %v581_v43 = vunpack.c.0.s8 %v580_v32  ;;  %v2488_v44 = vshrl.u32 %v582_v33, 7 }
  0x3f   :  { %v77_v48 = vld [vmem:[#allocation2 + $0x68] sm:$0xff]  ;;  %713 = vmatprep.subr.mxu1 %v209_v45  ;;  %v76_v50 = vld [vmem:[#allocation2 + $0x60] sm:$0xff]  ;;  %643 = vmatpush1.msra.mxu0 %v80_v46 }
  0x40   :  { %v205_v49 = vld [vmem:[#allocation2 + $0x468] sm:$0xff]  ;;  %v204_v51 = vld [vmem:[#allocation2 + $0x460] sm:$0xff]  ;;  %714 = vmatpush1.msra.mxu1 %v208_v47  ;;  %644 = vmatprep.subr.mxu0 %v77_v48 }
  0x41   :  { %v73_v52 = vld [vmem:[#allocation2 + $0x48] sm:$0xff]  ;;  %715 = vmatprep.subr.mxu1 %v205_v49  ;;  %v72_v54 = vld [vmem:[#allocation2 + $0x40] sm:$0xff]  ;;  %645 = vmatpush1.msra.mxu0 %v76_v50 }
  0x42   :  { %v201_v53 = vld [vmem:[#allocation2 + $0x448] sm:$0xff]  ;;  %v200_v55 = vld [vmem:[#allocation2 + $0x440] sm:$0xff]  ;;  %716 = vmatpush1.msra.mxu1 %v204_v51  ;;  %646 = vmatprep.subr.mxu0 %v73_v52 }
  0x43   :  { %v69_v56 = vld [vmem:[#allocation2 + $0x28] sm:$0xff]  ;;  %717 = vmatprep.subr.mxu1 %v201_v53  ;;  %v68_v58 = vld [vmem:[#allocation2 + $0x20] sm:$0xff]  ;;  %647 = vmatpush1.msra.mxu0 %v72_v54  ;;  %v2491_v54 = vsub.s32 %v581_v43, %v2488_v44 }
  0x44   :  { %v197_v57 = vld [vmem:[#allocation2 + $0x428] sm:$0xff]  ;;  %v196_v59 = vld [vmem:[#allocation2 + $0x420] sm:$0xff]  ;;  %718 = vmatpush1.msra.mxu1 %v200_v55  ;;  %648 = vmatprep.subr.mxu0 %v69_v56 }
  0x45   :  { %v65_v60 = vld [vmem:[#allocation2 + $0x8] sm:$0xff]  ;;  %719 = vmatprep.subr.mxu1 %v197_v57  ;;  %v64_v62 = vld [vmem:[#allocation2] sm:$0xff]  ;;  %649 = vmatpush1.msra.mxu0 %v68_v58 }
  0x46   :  { %v193_v61 = vld [vmem:[#allocation2 + $0x408] sm:$0xff]  ;;  %v192_v63 = vld [vmem:[#allocation2 + $0x400] sm:$0xff]  ;;  %720 = vmatpush1.msra.mxu1 %v196_v59  ;;  %650 = vmatprep.subr.mxu0 %v65_v60 }
  0x47   :  { %v189_v0 = vld [vmem:[#allocation2 + $0x3e8] sm:$0xff]  ;;  %721 = vmatprep.subr.mxu1 %v193_v61  ;;  %v188_v2 = vld [vmem:[#allocation2 + $0x3e0] sm:$0xff]  ;;  %651 = vmatpush1.msra.mxu0 %v64_v62 }
  0x48   :  { %v317_v1 = vld [vmem:[#allocation2 + $0x7e8] sm:$0xff]  ;;  %v316_v3 = vld [vmem:[#allocation2 + $0x7e0] sm:$0xff]  ;;  %722 = vmatpush1.msra.mxu1 %v192_v63  ;;  %652 = vmatprep.subr.mxu0 %v189_v0 }
  0x49   :  { %v185_v4 = vld [vmem:[#allocation2 + $0x3c8] sm:$0xff]  ;;  %723 = vmatprep.subr.mxu1 %v317_v1  ;;  %v184_v6 = vld [vmem:[#allocation2 + $0x3c0] sm:$0xff]  ;;  %653 = vmatpush2.msra.mxu0 %v188_v2 }
  0x4a   :  { %v313_v5 = vld [vmem:[#allocation2 + $0x7c8] sm:$0xff]  ;;  %v312_v7 = vld [vmem:[#allocation2 + $0x7c0] sm:$0xff]  ;;  %724 = vmatpush2.msra.mxu1 %v316_v3  ;;  %654 = vmatprep.subr.mxu0 %v185_v4 }
  0x4b   :  { %v181_v8 = vld [vmem:[#allocation2 + $0x3a8] sm:$0xff]  ;;  %725 = vmatprep.subr.mxu1 %v313_v5  ;;  %v180_v10 = vld [vmem:[#allocation2 + $0x3a0] sm:$0xff]  ;;  %655 = vmatpush2.msra.mxu0 %v184_v6 }
  0x4c   :  { %v309_v9 = vld [vmem:[#allocation2 + $0x7a8] sm:$0xff]  ;;  %v308_v11 = vld [vmem:[#allocation2 + $0x7a0] sm:$0xff]  ;;  %726 = vmatpush2.msra.mxu1 %v312_v7  ;;  %656 = vmatprep.subr.mxu0 %v181_v8 }
  0x4d   :  { %v177_v12 = vld [vmem:[#allocation2 + $0x388] sm:$0xff]  ;;  %727 = vmatprep.subr.mxu1 %v309_v9  ;;  %v176_v14 = vld [vmem:[#allocation2 + $0x380] sm:$0xff]  ;;  %657 = vmatpush2.msra.mxu0 %v180_v10 }
  0x4e   :  { %v305_v13 = vld [vmem:[#allocation2 + $0x788] sm:$0xff]  ;;  %v304_v15 = vld [vmem:[#allocation2 + $0x780] sm:$0xff]  ;;  %728 = vmatpush2.msra.mxu1 %v308_v11  ;;  %658 = vmatprep.subr.mxu0 %v177_v12 }
  0x4f   :  { %v173_v16 = vld [vmem:[#allocation2 + $0x368] sm:$0xff]  ;;  %729 = vmatprep.subr.mxu1 %v305_v13  ;;  %v172_v18 = vld [vmem:[#allocation2 + $0x360] sm:$0xff]  ;;  %659 = vmatpush2.msra.mxu0 %v176_v14 }
  0x50   :  { %v301_v17 = vld [vmem:[#allocation2 + $0x768] sm:$0xff]  ;;  %v300_v19 = vld [vmem:[#allocation2 + $0x760] sm:$0xff]  ;;  %730 = vmatpush2.msra.mxu1 %v304_v15  ;;  %660 = vmatprep.subr.mxu0 %v173_v16 }
  0x51   :  { %v169_v20 = vld [vmem:[#allocation2 + $0x348] sm:$0xff]  ;;  %731 = vmatprep.subr.mxu1 %v301_v17  ;;  %v168_v22 = vld [vmem:[#allocation2 + $0x340] sm:$0xff]  ;;  %661 = vmatpush2.msra.mxu0 %v172_v18 }
  0x52   :  { %v297_v21 = vld [vmem:[#allocation2 + $0x748] sm:$0xff]  ;;  %v296_v23 = vld [vmem:[#allocation2 + $0x740] sm:$0xff]  ;;  %732 = vmatpush2.msra.mxu1 %v300_v19  ;;  %662 = vmatprep.subr.mxu0 %v169_v20 }
  0x53   :  { %v165_v24 = vld [vmem:[#allocation2 + $0x328] sm:$0xff]  ;;  %v56_v26 = vld [vmem:[%s2591_s0] sm:$0xff]  ;;  %733 = vmatprep.subr.mxu1 %v297_v21  ;;  %663 = vmatpush2.msra.mxu0 %v168_v22 }
  0x54   :  { %v293_v25 = vld [vmem:[#allocation2 + $0x728] sm:$0xff]  ;;  %v164_v27 = vld [vmem:[#allocation2 + $0x320] sm:$0xff]  ;;  %2314 = vst [vmem:[%s2595_s4] sm:$0xff] %v56_v26  ;;  %734 = vmatpush2.msra.mxu1 %v296_v23  ;;  %664 = vmatprep.subr.mxu0 %v165_v24  ;;  %v60_v38 = vmul.f32 0.2, %v56_v26  ;;  %vm58_vm0 = vcmp.gt.f32.partialorder %v56_v26, 0.0 }
  0x55   :  { %v292_v28 = vld [vmem:[#allocation2 + $0x720] sm:$0xff]  ;;  %v161_v29 = vld [vmem:[#allocation2 + $0x308] sm:$0xff]  ;;  %735 = vmatprep.subr.mxu1 %v293_v25  ;;  %665 = vmatpush2.msra.mxu0 %v164_v27 }
  0x56   :  { %v289_v30 = vld [vmem:[#allocation2 + $0x708] sm:$0xff]  ;;  %v160_v34 = vld [vmem:[#allocation2 + $0x300] sm:$0xff]  ;;  %736 = vmatpush2.msra.mxu1 %v292_v28  ;;  %666 = vmatprep.subr.mxu0 %v161_v29  ;;  %v62_v49 = vsel %vm58_vm0, %v56_v26, %v60_v38 }
  0x57   :  { %v288_v35 = vld [vmem:[#allocation2 + $0x700] sm:$0xff]  ;;  %v157_v36 = vld [vmem:[#allocation2 + $0x2e8] sm:$0xff]  ;;  %737 = vmatprep.subr.mxu1 %v289_v30  ;;  %667 = vmatpush2.msra.mxu0 %v160_v34  ;;  %v578_v57 = vcombine.high %v62_v49, %v62_v49  ;;  %v2494_v0 = vrot.slane %v62_v49, %v2491_v54 }
  0x58   :  { %v285_v37 = vld [vmem:[#allocation2 + $0x6e8] sm:$0xff]  ;;  %v156_v39 = vld [vmem:[#allocation2 + $0x2e0] sm:$0xff]  ;;  %738 = vmatpush2.msra.mxu1 %v288_v35  ;;  %668 = vmatprep.subr.mxu0 %v157_v36 }
  0x59   :  { %v284_v40 = vld [vmem:[#allocation2 + $0x6e0] sm:$0xff]  ;;  %v153_v41 = vld [vmem:[#allocation2 + $0x2c8] sm:$0xff]  ;;  %739 = vmatprep.subr.mxu1 %v285_v37  ;;  %669 = vmatpush2.msra.mxu0 %v156_v39  ;;  %v2497_v3 = vrot.slane %v578_v57, %v2491_v54  ;;  %v2501_v10 = vcombine.high %v2494_v0, %v2494_v0 }
  0x5a   :  { %v281_v42 = vld [vmem:[#allocation2 + $0x6c8] sm:$0xff]  ;;  %v152_v45 = vld [vmem:[#allocation2 + $0x2c0] sm:$0xff]  ;;  %740 = vmatpush2.msra.mxu1 %v284_v40  ;;  %670 = vmatprep.subr.mxu0 %v153_v41 }
  0x5b   :  { %v280_v46 = vld [vmem:[#allocation2 + $0x6c0] sm:$0xff]  ;;  %v149_v47 = vld [vmem:[#allocation2 + $0x2a8] sm:$0xff]  ;;  %741 = vmatprep.subr.mxu1 %v281_v42  ;;  %671 = vmatpush2.msra.mxu0 %v152_v45  ;;  %v2505_v12 = vcombine.high %v2497_v3, %v2497_v3 }
  0x5c   :  { %v277_v48 = vld [vmem:[#allocation2 + $0x6a8] sm:$0xff]  ;;  %v148_v50 = vld [vmem:[#allocation2 + $0x2a0] sm:$0xff]  ;;  %742 = vmatpush2.msra.mxu1 %v280_v46  ;;  %672 = vmatprep.subr.mxu0 %v149_v47 }
  0x5d   :  { %v276_v51 = vld [vmem:[#allocation2 + $0x6a0] sm:$0xff]  ;;  %v145_v52 = vld [vmem:[#allocation2 + $0x288] sm:$0xff]  ;;  %743 = vmatprep.subr.mxu1 %v277_v48  ;;  %673 = vmatpush2.msra.mxu0 %v148_v50 }
  0x5e   :  { %v273_v53 = vld [vmem:[#allocation2 + $0x688] sm:$0xff]  ;;  %v144_v55 = vld [vmem:[#allocation2 + $0x280] sm:$0xff]  ;;  %744 = vmatpush2.msra.mxu1 %v276_v51  ;;  %674 = vmatprep.subr.mxu0 %v145_v52 }
  0x5f   :  { %v272_v56 = vld [vmem:[#allocation2 + $0x680] sm:$0xff]  ;;  %v141_v58 = vld [vmem:[#allocation2 + $0x268] sm:$0xff]  ;;  %745 = vmatprep.subr.mxu1 %v273_v53  ;;  %675 = vmatpush2.msra.mxu0 %v144_v55 }
  0x60   :  { %v269_v59 = vld [vmem:[#allocation2 + $0x668] sm:$0xff]  ;;  %v140_v60 = vld [vmem:[#allocation2 + $0x260] sm:$0xff]  ;;  %746 = vmatpush2.msra.mxu1 %v272_v56  ;;  %676 = vmatprep.subr.mxu0 %v141_v58 }
  0x61   :  { %v268_v61 = vld [vmem:[#allocation2 + $0x660] sm:$0xff]  ;;  %v137_v62 = vld [vmem:[#allocation2 + $0x248] sm:$0xff]  ;;  %747 = vmatprep.subr.mxu1 %v269_v59  ;;  %677 = vmatpush2.msra.mxu0 %v140_v60 }
  0x62   :  { %v265_v63 = vld [vmem:[#allocation2 + $0x648] sm:$0xff]  ;;  %v136_v1 = vld [vmem:[#allocation2 + $0x240] sm:$0xff]  ;;  %748 = vmatpush2.msra.mxu1 %v268_v61  ;;  %678 = vmatprep.subr.mxu0 %v137_v62 }
  0x63   :  { %v264_v2 = vld [vmem:[#allocation2 + $0x640] sm:$0xff]  ;;  %v133_v4 = vld [vmem:[#allocation2 + $0x228] sm:$0xff]  ;;  %749 = vmatprep.subr.mxu1 %v265_v63  ;;  %679 = vmatpush2.msra.mxu0 %v136_v1 }
  0x64   :  { %v261_v5 = vld [vmem:[#allocation2 + $0x628] sm:$0xff]  ;;  %v132_v6 = vld [vmem:[#allocation2 + $0x220] sm:$0xff]  ;;  %750 = vmatpush2.msra.mxu1 %v264_v2  ;;  %680 = vmatprep.subr.mxu0 %v133_v4 }
  0x65   :  { %v260_v7 = vld [vmem:[#allocation2 + $0x620] sm:$0xff]  ;;  %v129_v8 = vld [vmem:[#allocation2 + $0x208] sm:$0xff]  ;;  %751 = vmatprep.subr.mxu1 %v261_v5  ;;  %681 = vmatpush2.msra.mxu0 %v132_v6 }
  0x66   :  { %v257_v9 = vld [vmem:[#allocation2 + $0x608] sm:$0xff]  ;;  %v128_v11 = vld [vmem:[#allocation2 + $0x200] sm:$0xff]  ;;  %752 = vmatpush2.msra.mxu1 %v260_v7  ;;  %682 = vmatprep.subr.mxu0 %v129_v8 }
  0x67   :  { %v256_v13 = vld [vmem:[#allocation2 + $0x600] sm:$0xff]  ;;  %753 = vmatprep.subr.mxu1 %v257_v9  ;;  %683 = vmatpush2.msra.mxu0 %v128_v11  ;;  %v381_v14 = vld [vmem:[#allocation2 + $0x9e8] sm:$0xff] }
  0x68   :  { %684 = vmatprep.mubr.f32.mxu0 %v2501_v10  ;;  %v509_v15 = vld [vmem:[#allocation2 + $0xde8] sm:$0xff]  ;;  %754 = vmatpush2.msra.mxu1 %v256_v13  ;;  %v380_v16 = vld [vmem:[#allocation2 + $0x9e0] sm:$0xff] }
  0x69   :  { %755 = vmatprep.mubr.f32.mxu1 %v2505_v12  ;;  %v508_v17 = vld [vmem:[#allocation2 + $0xde0] sm:$0xff]  ;;  %685 = vmatmul.mubr.f32.vlgmr.msra.gmra.mxu0 %v2494_v0  ;;  %v377_v18 = vld [vmem:[#allocation2 + $0x9c8] sm:$0xff] }
  0x6a   :  { %756 = vmatmul.mubr.f32.vlgmr.msra.gmra.mxu1 %v2497_v3  ;;  %v505_v19 = vld [vmem:[#allocation2 + $0xdc8] sm:$0xff]  ;;  %762 = vmatprep.subr.mxu0 %v381_v14  ;;  %v376_v20 = vld [vmem:[#allocation2 + $0x9c0] sm:$0xff] }
  0x6b   :  { %833 = vmatprep.subr.mxu1 %v509_v15  ;;  %v504_v21 = vld [vmem:[#allocation2 + $0xdc0] sm:$0xff]  ;;  %763 = vmatpush1.msra.mxu0 %v380_v16  ;;  %v373_v22 = vld [vmem:[#allocation2 + $0x9a8] sm:$0xff] }
  0x6c   :  { %834 = vmatpush1.msra.mxu1 %v508_v17  ;;  %v501_v23 = vld [vmem:[#allocation2 + $0xda8] sm:$0xff]  ;;  %764 = vmatprep.subr.mxu0 %v377_v18  ;;  %v372_v24 = vld [vmem:[#allocation2 + $0x9a0] sm:$0xff] }
  0x6d   :  { %835 = vmatprep.subr.mxu1 %v505_v19  ;;  %v500_v25 = vld [vmem:[#allocation2 + $0xda0] sm:$0xff]  ;;  %765 = vmatpush1.msra.mxu0 %v376_v20  ;;  %v369_v26 = vld [vmem:[#allocation2 + $0x988] sm:$0xff] }
  0x6e   :  { %836 = vmatpush1.msra.mxu1 %v504_v21  ;;  %v497_v27 = vld [vmem:[#allocation2 + $0xd88] sm:$0xff]  ;;  %766 = vmatprep.subr.mxu0 %v373_v22  ;;  %v368_v28 = vld [vmem:[#allocation2 + $0x980] sm:$0xff] }
  0x6f   :  { %837 = vmatprep.subr.mxu1 %v501_v23  ;;  %v496_v29 = vld [vmem:[#allocation2 + $0xd80] sm:$0xff]  ;;  %767 = vmatpush1.msra.mxu0 %v372_v24  ;;  %v365_v30 = vld [vmem:[#allocation2 + $0x968] sm:$0xff] }
  0x70   :  { %838 = vmatpush1.msra.mxu1 %v500_v25  ;;  %v493_v31 = vld [vmem:[#allocation2 + $0xd68] sm:$0xff]  ;;  %768 = vmatprep.subr.mxu0 %v369_v26  ;;  %v364_v32 = vld [vmem:[#allocation2 + $0x960] sm:$0xff] }
  0x71   :  { %839 = vmatprep.subr.mxu1 %v497_v27  ;;  %v492_v33 = vld [vmem:[#allocation2 + $0xd60] sm:$0xff]  ;;  %769 = vmatpush1.msra.mxu0 %v368_v28  ;;  %v361_v34 = vld [vmem:[#allocation2 + $0x948] sm:$0xff] }
  0x72   :  { %840 = vmatpush1.msra.mxu1 %v496_v29  ;;  %v489_v35 = vld [vmem:[#allocation2 + $0xd48] sm:$0xff]  ;;  %770 = vmatprep.subr.mxu0 %v365_v30  ;;  %v360_v36 = vld [vmem:[#allocation2 + $0x940] sm:$0xff] }
  0x73   :  { %841 = vmatprep.subr.mxu1 %v493_v31  ;;  %v488_v37 = vld [vmem:[#allocation2 + $0xd40] sm:$0xff]  ;;  %771 = vmatpush1.msra.mxu0 %v364_v32  ;;  %v357_v38 = vld [vmem:[#allocation2 + $0x928] sm:$0xff] }
  0x74   :  { %842 = vmatpush1.msra.mxu1 %v492_v33  ;;  %v485_v39 = vld [vmem:[#allocation2 + $0xd28] sm:$0xff]  ;;  %772 = vmatprep.subr.mxu0 %v361_v34  ;;  %v356_v40 = vld [vmem:[#allocation2 + $0x920] sm:$0xff] }
  0x75   :  { %843 = vmatprep.subr.mxu1 %v489_v35  ;;  %v484_v41 = vld [vmem:[#allocation2 + $0xd20] sm:$0xff]  ;;  %773 = vmatpush1.msra.mxu0 %v360_v36  ;;  %v353_v42 = vld [vmem:[#allocation2 + $0x908] sm:$0xff] }
  0x76   :  { %844 = vmatpush1.msra.mxu1 %v488_v37  ;;  %v481_v43 = vld [vmem:[#allocation2 + $0xd08] sm:$0xff]  ;;  %774 = vmatprep.subr.mxu0 %v357_v38  ;;  %v352_v45 = vld [vmem:[#allocation2 + $0x900] sm:$0xff] }
  0x77   :  { %845 = vmatprep.subr.mxu1 %v485_v39  ;;  %v480_v46 = vld [vmem:[#allocation2 + $0xd00] sm:$0xff]  ;;  %775 = vmatpush1.msra.mxu0 %v356_v40  ;;  %v349_v47 = vld [vmem:[#allocation2 + $0x8e8] sm:$0xff] }
  0x78   :  { %846 = vmatpush1.msra.mxu1 %v484_v41  ;;  %v477_v48 = vld [vmem:[#allocation2 + $0xce8] sm:$0xff]  ;;  %776 = vmatprep.subr.mxu0 %v353_v42  ;;  %v348_v49 = vld [vmem:[#allocation2 + $0x8e0] sm:$0xff] }
  0x79   :  { %847 = vmatprep.subr.mxu1 %v481_v43  ;;  %v476_v50 = vld [vmem:[#allocation2 + $0xce0] sm:$0xff]  ;;  %777 = vmatpush1.msra.mxu0 %v352_v45  ;;  %v345_v51 = vld [vmem:[#allocation2 + $0x8c8] sm:$0xff] }
  0x7a   :  { %848 = vmatpush1.msra.mxu1 %v480_v46  ;;  %v473_v52 = vld [vmem:[#allocation2 + $0xcc8] sm:$0xff]  ;;  %778 = vmatprep.subr.mxu0 %v349_v47  ;;  %v344_v53 = vld [vmem:[#allocation2 + $0x8c0] sm:$0xff] }
  0x7b   :  { %849 = vmatprep.subr.mxu1 %v477_v48  ;;  %v472_v55 = vld [vmem:[#allocation2 + $0xcc0] sm:$0xff]  ;;  %779 = vmatpush1.msra.mxu0 %v348_v49  ;;  %v341_v56 = vld [vmem:[#allocation2 + $0x8a8] sm:$0xff] }
  0x7c   :  { %850 = vmatpush1.msra.mxu1 %v476_v50  ;;  %v469_v57 = vld [vmem:[#allocation2 + $0xca8] sm:$0xff]  ;;  %780 = vmatprep.subr.mxu0 %v345_v51  ;;  %v340_v58 = vld [vmem:[#allocation2 + $0x8a0] sm:$0xff] }
  0x7d   :  { %851 = vmatprep.subr.mxu1 %v473_v52  ;;  %v468_v59 = vld [vmem:[#allocation2 + $0xca0] sm:$0xff]  ;;  %v2514_v60 = vld [vmem:[%s2591_s0 + $0x8] sm:$0xff]  ;;  %781 = vmatpush1.msra.mxu0 %v344_v53 }
  0x7e   :  { %852 = vmatpush1.msra.mxu1 %v472_v55  ;;  %v337_v61 = vld [vmem:[#allocation2 + $0x888] sm:$0xff]  ;;  %2315 = vst [vmem:[%s2595_s4 + $0x8] sm:$0xff] %v2514_v60  ;;  %782 = vmatprep.subr.mxu0 %v341_v56  ;;  %v336_v63 = vld [vmem:[#allocation2 + $0x880] sm:$0xff]  ;;  %vm59_vm1 = vcmp.gt.f32.partialorder %v2514_v60, 0.0 }
  0x7f   :  { %v465_v62 = vld [vmem:[#allocation2 + $0xc88] sm:$0xff]  ;;  %853 = vmatprep.subr.mxu1 %v469_v57  ;;  %v464_v1 = vld [vmem:[#allocation2 + $0xc80] sm:$0xff]  ;;  %783 = vmatpush1.msra.mxu0 %v340_v58 }
  0x80   :  { %854 = vmatpush1.msra.mxu1 %v468_v59  ;;  %v333_v2 = vld [vmem:[#allocation2 + $0x868] sm:$0xff]  ;;  %784 = vmatprep.subr.mxu0 %v337_v61  ;;  %v332_v5 = vld [vmem:[#allocation2 + $0x860] sm:$0xff]  ;;  %v61_v59 = vmul.f32 0.2, %v2514_v60 }
  0x81   :  { %v461_v4 = vld [vmem:[#allocation2 + $0xc68] sm:$0xff]  ;;  %855 = vmatprep.subr.mxu1 %v465_v62  ;;  %v460_v6 = vld [vmem:[#allocation2 + $0xc60] sm:$0xff]  ;;  %785 = vmatpush1.msra.mxu0 %v336_v63 }
  0x82   :  { %856 = vmatpush1.msra.mxu1 %v464_v1  ;;  %v329_v7 = vld [vmem:[#allocation2 + $0x848] sm:$0xff]  ;;  %786 = vmatprep.subr.mxu0 %v333_v2  ;;  %v328_v9 = vld [vmem:[#allocation2 + $0x840] sm:$0xff] }
  0x83   :  { %v457_v8 = vld [vmem:[#allocation2 + $0xc48] sm:$0xff]  ;;  %857 = vmatprep.subr.mxu1 %v461_v4  ;;  %v456_v11 = vld [vmem:[#allocation2 + $0xc40] sm:$0xff]  ;;  %787 = vmatpush1.msra.mxu0 %v332_v5 }
  0x84   :  { %858 = vmatpush1.msra.mxu1 %v460_v6  ;;  %v325_v13 = vld [vmem:[#allocation2 + $0x828] sm:$0xff]  ;;  %788 = vmatprep.subr.mxu0 %v329_v7  ;;  %v324_v15 = vld [vmem:[#allocation2 + $0x820] sm:$0xff]  ;;  %v63_v7 = vsel %vm59_vm1, %v2514_v60, %v61_v59  ;;  %v234_v59 = vld [vmem:[#allocation2 + $0x550] sm:$0xff] }
  0x85   :  { %v453_v14 = vld [vmem:[#allocation2 + $0xc28] sm:$0xff]  ;;  %859 = vmatprep.subr.mxu1 %v457_v8  ;;  %v452_v16 = vld [vmem:[#allocation2 + $0xc20] sm:$0xff]  ;;  %789 = vmatpush1.msra.mxu0 %v328_v9 }
  0x86   :  { %860 = vmatpush1.msra.mxu1 %v456_v11  ;;  %v321_v17 = vld [vmem:[#allocation2 + $0x808] sm:$0xff]  ;;  %790 = vmatprep.subr.mxu0 %v325_v13  ;;  %v320_v19 = vld [vmem:[#allocation2 + $0x800] sm:$0xff] }
  0x87   :  { %v449_v18 = vld [vmem:[#allocation2 + $0xc08] sm:$0xff]  ;;  %861 = vmatprep.subr.mxu1 %v453_v14  ;;  %v448_v20 = vld [vmem:[#allocation2 + $0xc00] sm:$0xff]  ;;  %791 = vmatpush1.msra.mxu0 %v324_v15 }
  0x88   :  { %862 = vmatpush1.msra.mxu1 %v452_v16  ;;  %v445_v21 = vld [vmem:[#allocation2 + $0xbe8] sm:$0xff]  ;;  %792 = vmatprep.subr.mxu0 %v321_v17  ;;  %v444_v23 = vld [vmem:[#allocation2 + $0xbe0] sm:$0xff]  ;;  %v595_v16 = vcombine.high %v63_v7, %v63_v7 }
  0x89   :  { %v573_v22 = vld [vmem:[#allocation2 + $0xfe8] sm:$0xff]  ;;  %863 = vmatprep.subr.mxu1 %v449_v18  ;;  %v572_v24 = vld [vmem:[#allocation2 + $0xfe0] sm:$0xff]  ;;  %793 = vmatpush1.msra.mxu0 %v320_v19 }
  0x8a   :  { %864 = vmatpush1.msra.mxu1 %v448_v20  ;;  %v441_v25 = vld [vmem:[#allocation2 + $0xbc8] sm:$0xff]  ;;  %794 = vmatprep.subr.mxu0 %v445_v21  ;;  %v440_v27 = vld [vmem:[#allocation2 + $0xbc0] sm:$0xff]  ;;  %v2524_v20 = vrot.slane %v63_v7, %v2491_v54  ;;  %v95_v7 = vld [vmem:[#allocation2 + $0xf8] sm:$0xff] }
  0x8b   :  { %v569_v26 = vld [vmem:[#allocation2 + $0xfc8] sm:$0xff]  ;;  %865 = vmatprep.subr.mxu1 %v573_v22  ;;  %v568_v28 = vld [vmem:[#allocation2 + $0xfc0] sm:$0xff]  ;;  %795 = vmatpush2.msra.mxu0 %v444_v23 }
  0x8c   :  { %866 = vmatpush2.msra.mxu1 %v572_v24  ;;  %v437_v29 = vld [vmem:[#allocation2 + $0xba8] sm:$0xff]  ;;  %796 = vmatprep.subr.mxu0 %v441_v25  ;;  %v436_v31 = vld [vmem:[#allocation2 + $0xba0] sm:$0xff]  ;;  %v2527_v25 = vrot.slane %v595_v16, %v2491_v54  ;;  %v218_v16 = vld [vmem:[#allocation2 + $0x4d0] sm:$0xff] }
  0x8d   :  { %v565_v30 = vld [vmem:[#allocation2 + $0xfa8] sm:$0xff]  ;;  %867 = vmatprep.subr.mxu1 %v569_v26  ;;  %v564_v32 = vld [vmem:[#allocation2 + $0xfa0] sm:$0xff]  ;;  %797 = vmatpush2.msra.mxu0 %v440_v27 }
  0x8e   :  { %868 = vmatpush2.msra.mxu1 %v568_v28  ;;  %v433_v33 = vld [vmem:[#allocation2 + $0xb88] sm:$0xff]  ;;  %798 = vmatprep.subr.mxu0 %v437_v29  ;;  %v432_v35 = vld [vmem:[#allocation2 + $0xb80] sm:$0xff] }
  0x8f   :  { %v561_v34 = vld [vmem:[#allocation2 + $0xf88] sm:$0xff]  ;;  %869 = vmatprep.subr.mxu1 %v565_v30  ;;  %v560_v36 = vld [vmem:[#allocation2 + $0xf80] sm:$0xff]  ;;  %799 = vmatpush2.msra.mxu0 %v436_v31  ;;  %v2531_v30 = vcombine.high %v2524_v20, %v2524_v20 }
  0x90   :  { %870 = vmatpush2.msra.mxu1 %v564_v32  ;;  %v429_v37 = vld [vmem:[#allocation2 + $0xb68] sm:$0xff]  ;;  %800 = vmatprep.subr.mxu0 %v433_v33  ;;  %v428_v39 = vld [vmem:[#allocation2 + $0xb60] sm:$0xff]  ;;  %v2535_v33 = vcombine.high %v2527_v25, %v2527_v25 }
  0x91   :  { %v557_v38 = vld [vmem:[#allocation2 + $0xf68] sm:$0xff]  ;;  %871 = vmatprep.subr.mxu1 %v561_v34  ;;  %v556_v40 = vld [vmem:[#allocation2 + $0xf60] sm:$0xff]  ;;  %801 = vmatpush2.msra.mxu0 %v432_v35  ;;  %v127_v34 = vld [vmem:[#allocation2 + $0x1f8] sm:$0xff] }
  0x92   :  { %872 = vmatpush2.msra.mxu1 %v560_v36  ;;  %v425_v41 = vld [vmem:[#allocation2 + $0xb48] sm:$0xff]  ;;  %802 = vmatprep.subr.mxu0 %v429_v37  ;;  %v424_v43 = vld [vmem:[#allocation2 + $0xb40] sm:$0xff]  ;;  %v255_v35 = vld [vmem:[#allocation2 + $0x5f8] sm:$0xff] }
  0x93   :  { %v553_v42 = vld [vmem:[#allocation2 + $0xf48] sm:$0xff]  ;;  %873 = vmatprep.subr.mxu1 %v557_v38  ;;  %v552_v45 = vld [vmem:[#allocation2 + $0xf40] sm:$0xff]  ;;  %803 = vmatpush2.msra.mxu0 %v428_v39  ;;  %v126_v36 = vld [vmem:[#allocation2 + $0x1f0] sm:$0xff] }
  0x94   :  { %874 = vmatpush2.msra.mxu1 %v556_v40  ;;  %v421_v46 = vld [vmem:[#allocation2 + $0xb28] sm:$0xff]  ;;  %804 = vmatprep.subr.mxu0 %v425_v41  ;;  %v420_v48 = vld [vmem:[#allocation2 + $0xb20] sm:$0xff]  ;;  %v254_v37 = vld [vmem:[#allocation2 + $0x5f0] sm:$0xff] }
  0x95   :  { %v549_v47 = vld [vmem:[#allocation2 + $0xf28] sm:$0xff]  ;;  %875 = vmatprep.subr.mxu1 %v553_v42  ;;  %v548_v49 = vld [vmem:[#allocation2 + $0xf20] sm:$0xff]  ;;  %805 = vmatpush2.msra.mxu0 %v424_v43  ;;  %v123_v38 = vld [vmem:[#allocation2 + $0x1d8] sm:$0xff] }
  0x96   :  { %876 = vmatpush2.msra.mxu1 %v552_v45  ;;  %v417_v50 = vld [vmem:[#allocation2 + $0xb08] sm:$0xff]  ;;  %806 = vmatprep.subr.mxu0 %v421_v46  ;;  %v416_v52 = vld [vmem:[#allocation2 + $0xb00] sm:$0xff]  ;;  %v251_v39 = vld [vmem:[#allocation2 + $0x5d8] sm:$0xff] }
  0x97   :  { %v545_v51 = vld [vmem:[#allocation2 + $0xf08] sm:$0xff]  ;;  %877 = vmatprep.subr.mxu1 %v549_v47  ;;  %v544_v53 = vld [vmem:[#allocation2 + $0xf00] sm:$0xff]  ;;  %807 = vmatpush2.msra.mxu0 %v420_v48  ;;  %v122_v40 = vld [vmem:[#allocation2 + $0x1d0] sm:$0xff] }
  0x98   :  { %878 = vmatpush2.msra.mxu1 %v548_v49  ;;  %v413_v55 = vld [vmem:[#allocation2 + $0xae8] sm:$0xff]  ;;  %808 = vmatprep.subr.mxu0 %v417_v50  ;;  %v412_v57 = vld [vmem:[#allocation2 + $0xae0] sm:$0xff]  ;;  %v250_v41 = vld [vmem:[#allocation2 + $0x5d0] sm:$0xff] }
  0x99   :  { %v541_v56 = vld [vmem:[#allocation2 + $0xee8] sm:$0xff]  ;;  %879 = vmatprep.subr.mxu1 %v545_v51  ;;  %v540_v58 = vld [vmem:[#allocation2 + $0xee0] sm:$0xff]  ;;  %809 = vmatpush2.msra.mxu0 %v416_v52  ;;  %v119_v42 = vld [vmem:[#allocation2 + $0x1b8] sm:$0xff] }
  0x9a   :  { %880 = vmatpush2.msra.mxu1 %v544_v53  ;;  %v409_v61 = vld [vmem:[#allocation2 + $0xac8] sm:$0xff]  ;;  %810 = vmatprep.subr.mxu0 %v413_v55  ;;  %v408_v63 = vld [vmem:[#allocation2 + $0xac0] sm:$0xff]  ;;  %v247_v43 = vld [vmem:[#allocation2 + $0x5b8] sm:$0xff] }
  0x9b   :  { %v537_v62 = vld [vmem:[#allocation2 + $0xec8] sm:$0xff]  ;;  %881 = vmatprep.subr.mxu1 %v541_v56  ;;  %v536_v1 = vld [vmem:[#allocation2 + $0xec0] sm:$0xff]  ;;  %811 = vmatpush2.msra.mxu0 %v412_v57  ;;  %v118_v45 = vld [vmem:[#allocation2 + $0x1b0] sm:$0xff] }
  0x9c   :  { %882 = vmatpush2.msra.mxu1 %v540_v58  ;;  %v405_v2 = vld [vmem:[#allocation2 + $0xaa8] sm:$0xff]  ;;  %812 = vmatprep.subr.mxu0 %v409_v61  ;;  %v404_v5 = vld [vmem:[#allocation2 + $0xaa0] sm:$0xff]  ;;  %v246_v46 = vld [vmem:[#allocation2 + $0x5b0] sm:$0xff] }
  0x9d   :  { %v533_v4 = vld [vmem:[#allocation2 + $0xea8] sm:$0xff]  ;;  %883 = vmatprep.subr.mxu1 %v537_v62  ;;  %v532_v6 = vld [vmem:[#allocation2 + $0xea0] sm:$0xff]  ;;  %813 = vmatpush2.msra.mxu0 %v408_v63  ;;  %v115_v47 = vld [vmem:[#allocation2 + $0x198] sm:$0xff] }
  0x9e   :  { %884 = vmatpush2.msra.mxu1 %v536_v1  ;;  %v401_v8 = vld [vmem:[#allocation2 + $0xa88] sm:$0xff]  ;;  %814 = vmatprep.subr.mxu0 %v405_v2  ;;  %v400_v11 = vld [vmem:[#allocation2 + $0xa80] sm:$0xff]  ;;  %v243_v48 = vld [vmem:[#allocation2 + $0x598] sm:$0xff] }
  0x9f   :  { %v529_v9 = vld [vmem:[#allocation2 + $0xe88] sm:$0xff]  ;;  %885 = vmatprep.subr.mxu1 %v533_v4  ;;  %v528_v13 = vld [vmem:[#allocation2 + $0xe80] sm:$0xff]  ;;  %815 = vmatpush2.msra.mxu0 %v404_v5  ;;  %v114_v49 = vld [vmem:[#allocation2 + $0x190] sm:$0xff] }
  0xa0   :  { %886 = vmatpush2.msra.mxu1 %v532_v6  ;;  %v397_v14 = vld [vmem:[#allocation2 + $0xa68] sm:$0xff]  ;;  %816 = vmatprep.subr.mxu0 %v401_v8  ;;  %v396_v17 = vld [vmem:[#allocation2 + $0xa60] sm:$0xff]  ;;  %v242_v50 = vld [vmem:[#allocation2 + $0x590] sm:$0xff] }
  0xa1   :  { %v525_v15 = vld [vmem:[#allocation2 + $0xe68] sm:$0xff]  ;;  %887 = vmatprep.subr.mxu1 %v529_v9  ;;  %v524_v18 = vld [vmem:[#allocation2 + $0xe60] sm:$0xff]  ;;  %817 = vmatpush2.msra.mxu0 %v400_v11  ;;  %v111_v51 = vld [vmem:[#allocation2 + $0x178] sm:$0xff] }
  0xa2   :  { %888 = vmatpush2.msra.mxu1 %v528_v13  ;;  %v393_v60 = vld [vmem:[#allocation2 + $0xa48] sm:$0xff]  ;;  %818 = vmatprep.subr.mxu0 %v397_v14  ;;  %v392_v21 = vld [vmem:[#allocation2 + $0xa40] sm:$0xff]  ;;  %v239_v52 = vld [vmem:[#allocation2 + $0x578] sm:$0xff] }
  0xa3   :  { %v521_v19 = vld [vmem:[#allocation2 + $0xe48] sm:$0xff]  ;;  %889 = vmatprep.subr.mxu1 %v525_v15  ;;  %v520_v22 = vld [vmem:[#allocation2 + $0xe40] sm:$0xff]  ;;  %819 = vmatpush2.msra.mxu0 %v396_v17  ;;  %v110_v53 = vld [vmem:[#allocation2 + $0x170] sm:$0xff] }
  0xa4   :  { %890 = vmatpush2.msra.mxu1 %v524_v18  ;;  %v389_v23 = vld [vmem:[#allocation2 + $0xa28] sm:$0xff]  ;;  %820 = vmatprep.subr.mxu0 %v393_v60  ;;  %v388_v26 = vld [vmem:[#allocation2 + $0xa20] sm:$0xff]  ;;  %v238_v55 = vld [vmem:[#allocation2 + $0x570] sm:$0xff] }
  0xa5   :  { %v517_v24 = vld [vmem:[#allocation2 + $0xe28] sm:$0xff]  ;;  %891 = vmatprep.subr.mxu1 %v521_v19  ;;  %v516_v27 = vld [vmem:[#allocation2 + $0xe20] sm:$0xff]  ;;  %821 = vmatpush2.msra.mxu0 %v392_v21  ;;  %v107_v56 = vld [vmem:[#allocation2 + $0x158] sm:$0xff] }
  0xa6   :  { %892 = vmatpush2.msra.mxu1 %v520_v22  ;;  %v385_v28 = vld [vmem:[#allocation2 + $0xa08] sm:$0xff]  ;;  %822 = vmatprep.subr.mxu0 %v389_v23  ;;  %v384_v31 = vld [vmem:[#allocation2 + $0xa00] sm:$0xff]  ;;  %v235_v57 = vld [vmem:[#allocation2 + $0x558] sm:$0xff] }
  0xa7   :  { %v513_v29 = vld [vmem:[#allocation2 + $0xe08] sm:$0xff]  ;;  %893 = vmatprep.subr.mxu1 %v517_v24  ;;  %823 = vmatpush2.msra.mxu0 %v388_v26  ;;  %v512_v32 = vld [vmem:[#allocation2 + $0xe00] sm:$0xff]  ;;  %v106_v58 = vld [vmem:[#allocation2 + $0x150] sm:$0xff] }
  0xa8   :  { %894 = vmatpush2.msra.mxu1 %v516_v27  ;;  %824 = vmatprep.subr.mxu0 %v385_v28  ;;  %v103_v61 = vld [vmem:[#allocation2 + $0x138] sm:$0xff]  ;;  %v102_v63 = vld [vmem:[#allocation2 + $0x130] sm:$0xff] }
  0xa9   :  { %895 = vmatprep.subr.mxu1 %v513_v29  ;;  %825 = vmatpush2.msra.mxu0 %v384_v31  ;;  %v231_v62 = vld [vmem:[#allocation2 + $0x538] sm:$0xff]  ;;  %v230_v1 = vld [vmem:[#allocation2 + $0x530] sm:$0xff] }
  0xaa   :  { %826 = vmatprep.mubr.f32.mxu0 %v2531_v30  ;;  %896 = vmatpush2.msra.mxu1 %v512_v32  ;;  %v99_v2 = vld [vmem:[#allocation2 + $0x118] sm:$0xff]  ;;  %v98_v5 = vld [vmem:[#allocation2 + $0x110] sm:$0xff] }
  0xab   :  { %827 = vmatmul.mubr.f32.vlgmr.msra.gmra.mxu0 %v2524_v20  ;;  %897 = vmatprep.mubr.f32.mxu1 %v2535_v33  ;;  %v227_v4 = vld [vmem:[#allocation2 + $0x518] sm:$0xff]  ;;  %v226_v6 = vld [vmem:[#allocation2 + $0x510] sm:$0xff] }
  0xac   :  { %904 = vmatprep.subr.mxu0 %v127_v34  ;;  %975 = vmatprep.subr.mxu1 %v255_v35  ;;  %v223_v8 = vld [vmem:[#allocation2 + $0x4f8] sm:$0xff]  ;;  %v94_v9 = vld [vmem:[#allocation2 + $0xf0] sm:$0xff] }
  0xad   :  { %898 = vmatmul.mubr.f32.vlgmr.msra.gmra.mxu1 %v2527_v25  ;;  %905 = vmatpush1.msra.mxu0 %v126_v36  ;;  %v222_v11 = vld [vmem:[#allocation2 + $0x4f0] sm:$0xff]  ;;  %v91_v13 = vld [vmem:[#allocation2 + $0xd8] sm:$0xff] }
  0xae   :  { %976 = vmatpush1.msra.mxu1 %v254_v37  ;;  %906 = vmatprep.subr.mxu0 %v123_v38  ;;  %v219_v14 = vld [vmem:[#allocation2 + $0x4d8] sm:$0xff]  ;;  %v90_v15 = vld [vmem:[#allocation2 + $0xd0] sm:$0xff] }
  0xaf   :  { %977 = vmatprep.subr.mxu1 %v251_v39  ;;  %907 = vmatpush1.msra.mxu0 %v122_v40  ;;  %v87_v17 = vld [vmem:[#allocation2 + $0xb8] sm:$0xff]  ;;  %v86_v60 = vld [vmem:[#allocation2 + $0xb0] sm:$0xff] }
  0xb0   :  { %978 = vmatpush1.msra.mxu1 %v250_v41  ;;  %908 = vmatprep.subr.mxu0 %v119_v42  ;;  %v215_v18 = vld [vmem:[#allocation2 + $0x4b8] sm:$0xff]  ;;  %v214_v19 = vld [vmem:[#allocation2 + $0x4b0] sm:$0xff] }
  0xb1   :  { %979 = vmatprep.subr.mxu1 %v247_v43  ;;  %909 = vmatpush1.msra.mxu0 %v118_v45  ;;  %v83_v21 = vld [vmem:[#allocation2 + $0x98] sm:$0xff]  ;;  %v82_v23 = vld [vmem:[#allocation2 + $0x90] sm:$0xff] }
  0xb2   :  { %980 = vmatpush1.msra.mxu1 %v246_v46  ;;  %910 = vmatprep.subr.mxu0 %v115_v47  ;;  %v211_v22 = vld [vmem:[#allocation2 + $0x498] sm:$0xff]  ;;  %v210_v24 = vld [vmem:[#allocation2 + $0x490] sm:$0xff] }
  0xb3   :  { %981 = vmatprep.subr.mxu1 %v243_v48  ;;  %911 = vmatpush1.msra.mxu0 %v114_v49  ;;  %v79_v26 = vld [vmem:[#allocation2 + $0x78] sm:$0xff]  ;;  %v78_v28 = vld [vmem:[#allocation2 + $0x70] sm:$0xff] }
  0xb4   :  { %982 = vmatpush1.msra.mxu1 %v242_v50  ;;  %912 = vmatprep.subr.mxu0 %v111_v51  ;;  %v207_v27 = vld [vmem:[#allocation2 + $0x478] sm:$0xff]  ;;  %v206_v29 = vld [vmem:[#allocation2 + $0x470] sm:$0xff] }
  0xb5   :  { %983 = vmatprep.subr.mxu1 %v239_v52  ;;  %913 = vmatpush1.msra.mxu0 %v110_v53  ;;  %v75_v31 = vld [vmem:[#allocation2 + $0x58] sm:$0xff]  ;;  %v74_v34 = vld [vmem:[#allocation2 + $0x50] sm:$0xff] }
  0xb6   :  { %984 = vmatpush1.msra.mxu1 %v238_v55  ;;  %914 = vmatprep.subr.mxu0 %v107_v56  ;;  %v203_v32 = vld [vmem:[#allocation2 + $0x458] sm:$0xff]  ;;  %v202_v35 = vld [vmem:[#allocation2 + $0x450] sm:$0xff] }
  0xb7   :  { %985 = vmatprep.subr.mxu1 %v235_v57  ;;  %915 = vmatpush1.msra.mxu0 %v106_v58  ;;  %v71_v36 = vld [vmem:[#allocation2 + $0x38] sm:$0xff]  ;;  %v70_v38 = vld [vmem:[#allocation2 + $0x30] sm:$0xff] }
  0xb8   :  { %986 = vmatpush1.msra.mxu1 %v234_v59  ;;  %916 = vmatprep.subr.mxu0 %v103_v61  ;;  %v199_v37 = vld [vmem:[#allocation2 + $0x438] sm:$0xff]  ;;  %v198_v39 = vld [vmem:[#allocation2 + $0x430] sm:$0xff] }
  0xb9   :  { %987 = vmatprep.subr.mxu1 %v231_v62  ;;  %917 = vmatpush1.msra.mxu0 %v102_v63  ;;  %v67_v40 = vld [vmem:[#allocation2 + $0x18] sm:$0xff]  ;;  %v66_v42 = vld [vmem:[#allocation2 + $0x10] sm:$0xff] }
  0xba   :  { %988 = vmatpush1.msra.mxu1 %v230_v1  ;;  %918 = vmatprep.subr.mxu0 %v99_v2  ;;  %v195_v41 = vld [vmem:[#allocation2 + $0x418] sm:$0xff]  ;;  %v194_v43 = vld [vmem:[#allocation2 + $0x410] sm:$0xff] }
  0xbb   :  { %989 = vmatprep.subr.mxu1 %v227_v4  ;;  %919 = vmatpush1.msra.mxu0 %v98_v5  ;;  %v191_v45 = vld [vmem:[#allocation2 + $0x3f8] sm:$0xff]  ;;  %v190_v47 = vld [vmem:[#allocation2 + $0x3f0] sm:$0xff] }
  0xbc   :  { %990 = vmatpush1.msra.mxu1 %v226_v6  ;;  %920 = vmatprep.subr.mxu0 %v95_v7  ;;  %v319_v46 = vld [vmem:[#allocation2 + $0x7f8] sm:$0xff]  ;;  %v318_v48 = vld [vmem:[#allocation2 + $0x7f0] sm:$0xff] }
  0xbd   :  { %991 = vmatprep.subr.mxu1 %v223_v8  ;;  %921 = vmatpush1.msra.mxu0 %v94_v9  ;;  %v187_v49 = vld [vmem:[#allocation2 + $0x3d8] sm:$0xff]  ;;  %v186_v51 = vld [vmem:[#allocation2 + $0x3d0] sm:$0xff] }
  0xbe   :  { %992 = vmatpush1.msra.mxu1 %v222_v11  ;;  %922 = vmatprep.subr.mxu0 %v91_v13  ;;  %v315_v50 = vld [vmem:[#allocation2 + $0x7d8] sm:$0xff]  ;;  %v314_v52 = vld [vmem:[#allocation2 + $0x7d0] sm:$0xff] }
  0xbf   :  { %993 = vmatprep.subr.mxu1 %v219_v14  ;;  %923 = vmatpush1.msra.mxu0 %v90_v15  ;;  %v183_v53 = vld [vmem:[#allocation2 + $0x3b8] sm:$0xff]  ;;  %v182_v56 = vld [vmem:[#allocation2 + $0x3b0] sm:$0xff] }
  0xc0   :  { %994 = vmatpush1.msra.mxu1 %v218_v16  ;;  %924 = vmatprep.subr.mxu0 %v87_v17  ;;  %v311_v55 = vld [vmem:[#allocation2 + $0x7b8] sm:$0xff]  ;;  %v310_v57 = vld [vmem:[#allocation2 + $0x7b0] sm:$0xff] }
  0xc1   :  { %995 = vmatprep.subr.mxu1 %v215_v18  ;;  %925 = vmatpush1.msra.mxu0 %v86_v60  ;;  %v179_v58 = vld [vmem:[#allocation2 + $0x398] sm:$0xff]  ;;  %v178_v61 = vld [vmem:[#allocation2 + $0x390] sm:$0xff] }
  0xc2   :  { %996 = vmatpush1.msra.mxu1 %v214_v19  ;;  %926 = vmatprep.subr.mxu0 %v83_v21  ;;  %v307_v59 = vld [vmem:[#allocation2 + $0x798] sm:$0xff]  ;;  %v306_v62 = vld [vmem:[#allocation2 + $0x790] sm:$0xff] }
  0xc3   :  { %997 = vmatprep.subr.mxu1 %v211_v22  ;;  %927 = vmatpush1.msra.mxu0 %v82_v23  ;;  %v175_v63 = vld [vmem:[#allocation2 + $0x378] sm:$0xff]  ;;  %v174_v2 = vld [vmem:[#allocation2 + $0x370] sm:$0xff] }
  0xc4   :  { %998 = vmatpush1.msra.mxu1 %v210_v24  ;;  %928 = vmatprep.subr.mxu0 %v79_v26  ;;  %v303_v1 = vld [vmem:[#allocation2 + $0x778] sm:$0xff]  ;;  %v302_v4 = vld [vmem:[#allocation2 + $0x770] sm:$0xff] }
  0xc5   :  { %999 = vmatprep.subr.mxu1 %v207_v27  ;;  %929 = vmatpush1.msra.mxu0 %v78_v28  ;;  %v171_v5 = vld [vmem:[#allocation2 + $0x358] sm:$0xff]  ;;  %v170_v7 = vld [vmem:[#allocation2 + $0x350] sm:$0xff] }
  0xc6   :  { %1000 = vmatpush1.msra.mxu1 %v206_v29  ;;  %930 = vmatprep.subr.mxu0 %v75_v31  ;;  %v299_v6 = vld [vmem:[#allocation2 + $0x758] sm:$0xff]  ;;  %v298_v8 = vld [vmem:[#allocation2 + $0x750] sm:$0xff] }
  0xc7   :  { %1001 = vmatprep.subr.mxu1 %v203_v32  ;;  %931 = vmatpush1.msra.mxu0 %v74_v34  ;;  %v167_v9 = vld [vmem:[#allocation2 + $0x338] sm:$0xff]  ;;  %v166_v13 = vld [vmem:[#allocation2 + $0x330] sm:$0xff] }
  0xc8   :  { %1002 = vmatpush1.msra.mxu1 %v202_v35  ;;  %932 = vmatprep.subr.mxu0 %v71_v36  ;;  %v295_v11 = vld [vmem:[#allocation2 + $0x738] sm:$0xff]  ;;  %v294_v14 = vld [vmem:[#allocation2 + $0x730] sm:$0xff] }
  0xc9   :  { %1003 = vmatprep.subr.mxu1 %v199_v37  ;;  %933 = vmatpush1.msra.mxu0 %v70_v38  ;;  %v163_v15 = vld [vmem:[#allocation2 + $0x318] sm:$0xff]  ;;  %v162_v17 = vld [vmem:[#allocation2 + $0x310] sm:$0xff] }
  0xca   :  { %1004 = vmatpush1.msra.mxu1 %v198_v39  ;;  %934 = vmatprep.subr.mxu0 %v67_v40  ;;  %v291_v16 = vld [vmem:[#allocation2 + $0x718] sm:$0xff]  ;;  %v290_v18 = vld [vmem:[#allocation2 + $0x710] sm:$0xff] }
  0xcb   :  { %1005 = vmatprep.subr.mxu1 %v195_v41  ;;  %935 = vmatpush1.msra.mxu0 %v66_v42  ;;  %v159_v60 = vld [vmem:[#allocation2 + $0x2f8] sm:$0xff]  ;;  %v158_v21 = vld [vmem:[#allocation2 + $0x2f0] sm:$0xff] }
  0xcc   :  { %1006 = vmatpush1.msra.mxu1 %v194_v43  ;;  %936 = vmatprep.subr.mxu0 %v191_v45  ;;  %v287_v19 = vld [vmem:[#allocation2 + $0x6f8] sm:$0xff]  ;;  %v286_v22 = vld [vmem:[#allocation2 + $0x6f0] sm:$0xff] }
  0xcd   :  { %1007 = vmatprep.subr.mxu1 %v319_v46  ;;  %937 = vmatpush2.msra.mxu0 %v190_v47  ;;  %v155_v23 = vld [vmem:[#allocation2 + $0x2d8] sm:$0xff]  ;;  %v154_v26 = vld [vmem:[#allocation2 + $0x2d0] sm:$0xff] }
  0xce   :  { %1008 = vmatpush2.msra.mxu1 %v318_v48  ;;  %938 = vmatprep.subr.mxu0 %v187_v49  ;;  %v283_v24 = vld [vmem:[#allocation2 + $0x6d8] sm:$0xff]  ;;  %v282_v27 = vld [vmem:[#allocation2 + $0x6d0] sm:$0xff] }
  0xcf   :  { %1009 = vmatprep.subr.mxu1 %v315_v50  ;;  %939 = vmatpush2.msra.mxu0 %v186_v51  ;;  %v151_v28 = vld [vmem:[#allocation2 + $0x2b8] sm:$0xff]  ;;  %v150_v31 = vld [vmem:[#allocation2 + $0x2b0] sm:$0xff] }
  0xd0   :  { %1010 = vmatpush2.msra.mxu1 %v314_v52  ;;  %940 = vmatprep.subr.mxu0 %v183_v53  ;;  %v279_v29 = vld [vmem:[#allocation2 + $0x6b8] sm:$0xff]  ;;  %v278_v32 = vld [vmem:[#allocation2 + $0x6b0] sm:$0xff] }
  0xd1   :  { %1011 = vmatprep.subr.mxu1 %v311_v55  ;;  %941 = vmatpush2.msra.mxu0 %v182_v56  ;;  %v147_v34 = vld [vmem:[#allocation2 + $0x298] sm:$0xff]  ;;  %v146_v36 = vld [vmem:[#allocation2 + $0x290] sm:$0xff] }
  0xd2   :  { %1012 = vmatpush2.msra.mxu1 %v310_v57  ;;  %942 = vmatprep.subr.mxu0 %v179_v58  ;;  %v275_v35 = vld [vmem:[#allocation2 + $0x698] sm:$0xff]  ;;  %v274_v37 = vld [vmem:[#allocation2 + $0x690] sm:$0xff] }
  0xd3   :  { %1013 = vmatprep.subr.mxu1 %v307_v59  ;;  %943 = vmatpush2.msra.mxu0 %v178_v61  ;;  %v143_v38 = vld [vmem:[#allocation2 + $0x278] sm:$0xff]  ;;  %v142_v40 = vld [vmem:[#allocation2 + $0x270] sm:$0xff] }
  0xd4   :  { %1014 = vmatpush2.msra.mxu1 %v306_v62  ;;  %944 = vmatprep.subr.mxu0 %v175_v63  ;;  %v271_v39 = vld [vmem:[#allocation2 + $0x678] sm:$0xff]  ;;  %v270_v41 = vld [vmem:[#allocation2 + $0x670] sm:$0xff] }
  0xd5   :  { %1015 = vmatprep.subr.mxu1 %v303_v1  ;;  %945 = vmatpush2.msra.mxu0 %v174_v2  ;;  %v139_v42 = vld [vmem:[#allocation2 + $0x258] sm:$0xff]  ;;  %v138_v45 = vld [vmem:[#allocation2 + $0x250] sm:$0xff] }
  0xd6   :  { %1016 = vmatpush2.msra.mxu1 %v302_v4  ;;  %946 = vmatprep.subr.mxu0 %v171_v5  ;;  %v267_v43 = vld [vmem:[#allocation2 + $0x658] sm:$0xff]  ;;  %v266_v46 = vld [vmem:[#allocation2 + $0x650] sm:$0xff] }
  0xd7   :  { %1017 = vmatprep.subr.mxu1 %v299_v6  ;;  %947 = vmatpush2.msra.mxu0 %v170_v7  ;;  %v135_v47 = vld [vmem:[#allocation2 + $0x238] sm:$0xff]  ;;  %v134_v49 = vld [vmem:[#allocation2 + $0x230] sm:$0xff] }
  0xd8   :  { %1018 = vmatpush2.msra.mxu1 %v298_v8  ;;  %948 = vmatprep.subr.mxu0 %v167_v9  ;;  %v263_v48 = vld [vmem:[#allocation2 + $0x638] sm:$0xff]  ;;  %v262_v50 = vld [vmem:[#allocation2 + $0x630] sm:$0xff] }
  0xd9   :  { %1019 = vmatprep.subr.mxu1 %v295_v11  ;;  %949 = vmatpush2.msra.mxu0 %v166_v13  ;;  %v131_v51 = vld [vmem:[#allocation2 + $0x218] sm:$0xff]  ;;  %v130_v53 = vld [vmem:[#allocation2 + $0x210] sm:$0xff] }
  0xda   :  { %1020 = vmatpush2.msra.mxu1 %v294_v14  ;;  %950 = vmatprep.subr.mxu0 %v163_v15  ;;  %v259_v52 = vld [vmem:[#allocation2 + $0x618] sm:$0xff]  ;;  %v258_v55 = vld [vmem:[#allocation2 + $0x610] sm:$0xff] }
  0xdb   :  { %1021 = vmatprep.subr.mxu1 %v291_v16  ;;  %951 = vmatpush2.msra.mxu0 %v162_v17  ;;  %v383_v56 = vld [vmem:[#allocation2 + $0x9f8] sm:$0xff]  ;;  %v382_v58 = vld [vmem:[#allocation2 + $0x9f0] sm:$0xff] }
  0xdc   :  { %1022 = vmatpush2.msra.mxu1 %v290_v18  ;;  %952 = vmatprep.subr.mxu0 %v159_v60  ;;  %v511_v57 = vld [vmem:[#allocation2 + $0xdf8] sm:$0xff]  ;;  %v510_v59 = vld [vmem:[#allocation2 + $0xdf0] sm:$0xff] }
  0xdd   :  { %1023 = vmatprep.subr.mxu1 %v287_v19  ;;  %953 = vmatpush2.msra.mxu0 %v158_v21  ;;  %v379_v61 = vld [vmem:[#allocation2 + $0x9d8] sm:$0xff]  ;;  %v378_v63 = vld [vmem:[#allocation2 + $0x9d0] sm:$0xff] }
  0xde   :  { %1024 = vmatpush2.msra.mxu1 %v286_v22  ;;  %954 = vmatprep.subr.mxu0 %v155_v23  ;;  %v507_v62 = vld [vmem:[#allocation2 + $0xdd8] sm:$0xff]  ;;  %v506_v1 = vld [vmem:[#allocation2 + $0xdd0] sm:$0xff] }
  0xdf   :  { %1025 = vmatprep.subr.mxu1 %v283_v24  ;;  %955 = vmatpush2.msra.mxu0 %v154_v26  ;;  %v503_v2 = vld [vmem:[#allocation2 + $0xdb8] sm:$0xff]  ;;  %v374_v4 = vld [vmem:[#allocation2 + $0x9b0] sm:$0xff] }
  0xe0   :  { %1026 = vmatpush2.msra.mxu1 %v282_v27  ;;  %956 = vmatprep.subr.mxu0 %v151_v28  ;;  %v371_v5 = vld [vmem:[#allocation2 + $0x998] sm:$0xff]  ;;  %v498_v6 = vld [vmem:[#allocation2 + $0xd90] sm:$0xff] }
  0xe1   :  { %1027 = vmatprep.subr.mxu1 %v279_v29  ;;  %957 = vmatpush2.msra.mxu0 %v150_v31  ;;  %v367_v7 = vld [vmem:[#allocation2 + $0x978] sm:$0xff]  ;;  %v366_v9 = vld [vmem:[#allocation2 + $0x970] sm:$0xff] }
  0xe2   :  { %1028 = vmatpush2.msra.mxu1 %v278_v32  ;;  %958 = vmatprep.subr.mxu0 %v147_v34  ;;  %v495_v8 = vld [vmem:[#allocation2 + $0xd78] sm:$0xff]  ;;  %v494_v11 = vld [vmem:[#allocation2 + $0xd70] sm:$0xff] }
  0xe3   :  { %1029 = vmatprep.subr.mxu1 %v275_v35  ;;  %959 = vmatpush2.msra.mxu0 %v146_v36  ;;  %v363_v13 = vld [vmem:[#allocation2 + $0x958] sm:$0xff]  ;;  %v362_v15 = vld [vmem:[#allocation2 + $0x950] sm:$0xff] }
  0xe4   :  { %1030 = vmatpush2.msra.mxu1 %v274_v37  ;;  %960 = vmatprep.subr.mxu0 %v143_v38  ;;  %v491_v14 = vld [vmem:[#allocation2 + $0xd58] sm:$0xff]  ;;  %v490_v16 = vld [vmem:[#allocation2 + $0xd50] sm:$0xff] }
  0xe5   :  { %1031 = vmatprep.subr.mxu1 %v271_v39  ;;  %961 = vmatpush2.msra.mxu0 %v142_v40  ;;  %v359_v17 = vld [vmem:[#allocation2 + $0x938] sm:$0xff]  ;;  %v358_v60 = vld [vmem:[#allocation2 + $0x930] sm:$0xff] }
  0xe6   :  { %1032 = vmatpush2.msra.mxu1 %v270_v41  ;;  %962 = vmatprep.subr.mxu0 %v139_v42  ;;  %v487_v18 = vld [vmem:[#allocation2 + $0xd38] sm:$0xff]  ;;  %v486_v19 = vld [vmem:[#allocation2 + $0xd30] sm:$0xff] }
  0xe7   :  { %1033 = vmatprep.subr.mxu1 %v267_v43  ;;  %963 = vmatpush2.msra.mxu0 %v138_v45  ;;  %v355_v21 = vld [vmem:[#allocation2 + $0x918] sm:$0xff]  ;;  %v354_v23 = vld [vmem:[#allocation2 + $0x910] sm:$0xff] }
  0xe8   :  { %1034 = vmatpush2.msra.mxu1 %v266_v46  ;;  %964 = vmatprep.subr.mxu0 %v135_v47  ;;  %v483_v22 = vld [vmem:[#allocation2 + $0xd18] sm:$0xff]  ;;  %v482_v24 = vld [vmem:[#allocation2 + $0xd10] sm:$0xff] }
  0xe9   :  { %1035 = vmatprep.subr.mxu1 %v263_v48  ;;  %965 = vmatpush2.msra.mxu0 %v134_v49  ;;  %v351_v26 = vld [vmem:[#allocation2 + $0x8f8] sm:$0xff]  ;;  %v350_v28 = vld [vmem:[#allocation2 + $0x8f0] sm:$0xff] }
  0xea   :  { %1036 = vmatpush2.msra.mxu1 %v262_v50  ;;  %966 = vmatprep.subr.mxu0 %v131_v51  ;;  %v479_v27 = vld [vmem:[#allocation2 + $0xcf8] sm:$0xff]  ;;  %v478_v29 = vld [vmem:[#allocation2 + $0xcf0] sm:$0xff] }
  0xeb   :  { %1037 = vmatprep.subr.mxu1 %v259_v52  ;;  %967 = vmatpush2.msra.mxu0 %v130_v53  ;;  %v347_v31 = vld [vmem:[#allocation2 + $0x8d8] sm:$0xff]  ;;  %v346_v34 = vld [vmem:[#allocation2 + $0x8d0] sm:$0xff] }
  0xec   :  { %968 = vmatprep.mubr.f32.mxu0 %v2501_v10  ;;  %1038 = vmatpush2.msra.mxu1 %v258_v55  ;;  %v375_v10 = vld [vmem:[#allocation2 + $0x9b8] sm:$0xff]  ;;  %v474_v35 = vld [vmem:[#allocation2 + $0xcd0] sm:$0xff] }
  0xed   :  { %1039 = vmatprep.mubr.f32.mxu1 %v2505_v12  ;;  %969 = vmatmul.mubr.f32.vlgmr.msra.gmra.mxu0 %v2494_v0  ;;  %v502_v12 = vld [vmem:[#allocation2 + $0xdb0] sm:$0xff]  ;;  %v499_v0 = vld [vmem:[#allocation2 + $0xd98] sm:$0xff] }
  0xee   :  { %1040 = vmatmul.mubr.f32.vlgmr.msra.gmra.mxu1 %v2497_v3  ;;  %1046 = vmatprep.subr.mxu0 %v383_v56  ;;  %v370_v3 = vld [vmem:[#allocation2 + $0x990] sm:$0xff]  ;;  %v475_v32 = vld [vmem:[#allocation2 + $0xcd8] sm:$0xff] }
  0xef   :  { %1117 = vmatprep.subr.mxu1 %v511_v57  ;;  %1047 = vmatpush1.msra.mxu0 %v382_v58  ;;  %v343_v36 = vld [vmem:[#allocation2 + $0x8b8] sm:$0xff]  ;;  %v342_v38 = vld [vmem:[#allocation2 + $0x8b0] sm:$0xff] }
  0xf0   :  { %1118 = vmatpush1.msra.mxu1 %v510_v59  ;;  %1048 = vmatprep.subr.mxu0 %v379_v61  ;;  %v471_v37 = vld [vmem:[#allocation2 + $0xcb8] sm:$0xff]  ;;  %v470_v39 = vld [vmem:[#allocation2 + $0xcb0] sm:$0xff] }
  0xf1   :  { %1119 = vmatprep.subr.mxu1 %v507_v62  ;;  %1049 = vmatpush1.msra.mxu0 %v378_v63  ;;  %v339_v40 = vld [vmem:[#allocation2 + $0x898] sm:$0xff]  ;;  %v338_v42 = vld [vmem:[#allocation2 + $0x890] sm:$0xff] }
  0xf2   :  { %1120 = vmatpush1.msra.mxu1 %v506_v1  ;;  %1050 = vmatprep.subr.mxu0 %v375_v10  ;;  %v467_v41 = vld [vmem:[#allocation2 + $0xc98] sm:$0xff]  ;;  %v466_v43 = vld [vmem:[#allocation2 + $0xc90] sm:$0xff] }
  0xf3   :  { %1121 = vmatprep.subr.mxu1 %v503_v2  ;;  %1051 = vmatpush1.msra.mxu0 %v374_v4  ;;  %v335_v45 = vld [vmem:[#allocation2 + $0x878] sm:$0xff]  ;;  %v334_v47 = vld [vmem:[#allocation2 + $0x870] sm:$0xff] }
  0xf4   :  { %1122 = vmatpush1.msra.mxu1 %v502_v12  ;;  %1052 = vmatprep.subr.mxu0 %v371_v5  ;;  %v463_v46 = vld [vmem:[#allocation2 + $0xc78] sm:$0xff]  ;;  %v462_v48 = vld [vmem:[#allocation2 + $0xc70] sm:$0xff] }
  0xf5   :  { %1123 = vmatprep.subr.mxu1 %v499_v0  ;;  %1053 = vmatpush1.msra.mxu0 %v370_v3  ;;  %v331_v49 = vld [vmem:[#allocation2 + $0x858] sm:$0xff]  ;;  %v330_v51 = vld [vmem:[#allocation2 + $0x850] sm:$0xff] }
  0xf6   :  { %1124 = vmatpush1.msra.mxu1 %v498_v6  ;;  %1054 = vmatprep.subr.mxu0 %v367_v7  ;;  %v459_v50 = vld [vmem:[#allocation2 + $0xc58] sm:$0xff]  ;;  %v458_v52 = vld [vmem:[#allocation2 + $0xc50] sm:$0xff] }
  0xf7   :  { %1125 = vmatprep.subr.mxu1 %v495_v8  ;;  %1055 = vmatpush1.msra.mxu0 %v366_v9  ;;  %v327_v53 = vld [vmem:[#allocation2 + $0x838] sm:$0xff]  ;;  %v326_v56 = vld [vmem:[#allocation2 + $0x830] sm:$0xff] }
  0xf8   :  { %1126 = vmatpush1.msra.mxu1 %v494_v11  ;;  %1056 = vmatprep.subr.mxu0 %v363_v13  ;;  %v455_v55 = vld [vmem:[#allocation2 + $0xc38] sm:$0xff]  ;;  %v454_v57 = vld [vmem:[#allocation2 + $0xc30] sm:$0xff] }
  0xf9   :  { %1127 = vmatprep.subr.mxu1 %v491_v14  ;;  %1057 = vmatpush1.msra.mxu0 %v362_v15  ;;  %v323_v58 = vld [vmem:[#allocation2 + $0x818] sm:$0xff]  ;;  %v322_v61 = vld [vmem:[#allocation2 + $0x810] sm:$0xff] }
  0xfa   :  { %1128 = vmatpush1.msra.mxu1 %v490_v16  ;;  %1058 = vmatprep.subr.mxu0 %v359_v17  ;;  %v451_v59 = vld [vmem:[#allocation2 + $0xc18] sm:$0xff]  ;;  %v450_v62 = vld [vmem:[#allocation2 + $0xc10] sm:$0xff] }
  0xfb   :  { %1129 = vmatprep.subr.mxu1 %v487_v18  ;;  %1059 = vmatpush1.msra.mxu0 %v358_v60  ;;  %v447_v63 = vld [vmem:[#allocation2 + $0xbf8] sm:$0xff]  ;;  %v446_v10 = vld [vmem:[#allocation2 + $0xbf0] sm:$0xff] }
  0xfc   :  { %1130 = vmatpush1.msra.mxu1 %v486_v19  ;;  %1060 = vmatprep.subr.mxu0 %v355_v21  ;;  %v575_v1 = vld [vmem:[#allocation2 + $0xff8] sm:$0xff]  ;;  %v574_v2 = vld [vmem:[#allocation2 + $0xff0] sm:$0xff] }
  0xfd   :  { %1131 = vmatprep.subr.mxu1 %v483_v22  ;;  %1061 = vmatpush1.msra.mxu0 %v354_v23  ;;  %v443_v4 = vld [vmem:[#allocation2 + $0xbd8] sm:$0xff]  ;;  %v442_v5 = vld [vmem:[#allocation2 + $0xbd0] sm:$0xff] }
  0xfe   :  { %1132 = vmatpush1.msra.mxu1 %v482_v24  ;;  %1062 = vmatprep.subr.mxu0 %v351_v26  ;;  %v571_v12 = vld [vmem:[#allocation2 + $0xfd8] sm:$0xff]  ;;  %v570_v0 = vld [vmem:[#allocation2 + $0xfd0] sm:$0xff] }
  0xff   :  { %1133 = vmatprep.subr.mxu1 %v479_v27  ;;  %1063 = vmatpush1.msra.mxu0 %v350_v28  ;;  %v439_v3 = vld [vmem:[#allocation2 + $0xbb8] sm:$0xff]  ;;  %v438_v7 = vld [vmem:[#allocation2 + $0xbb0] sm:$0xff] }
 0x100   :  { %1134 = vmatpush1.msra.mxu1 %v478_v29  ;;  %1064 = vmatprep.subr.mxu0 %v347_v31  ;;  %v567_v6 = vld [vmem:[#allocation2 + $0xfb8] sm:$0xff]  ;;  %v566_v8 = vld [vmem:[#allocation2 + $0xfb0] sm:$0xff] }
 0x101   :  { %1135 = vmatprep.subr.mxu1 %v475_v32  ;;  %1065 = vmatpush1.msra.mxu0 %v346_v34  ;;  %v435_v9 = vld [vmem:[#allocation2 + $0xb98] sm:$0xff]  ;;  %v434_v13 = vld [vmem:[#allocation2 + $0xb90] sm:$0xff] }
 0x102   :  { %1136 = vmatpush1.msra.mxu1 %v474_v35  ;;  %1066 = vmatprep.subr.mxu0 %v343_v36  ;;  %v563_v11 = vld [vmem:[#allocation2 + $0xf98] sm:$0xff]  ;;  %v562_v14 = vld [vmem:[#allocation2 + $0xf90] sm:$0xff] }
 0x103   :  { %1137 = vmatprep.subr.mxu1 %v471_v37  ;;  %1067 = vmatpush1.msra.mxu0 %v342_v38  ;;  %v431_v15 = vld [vmem:[#allocation2 + $0xb78] sm:$0xff]  ;;  %v430_v17 = vld [vmem:[#allocation2 + $0xb70] sm:$0xff] }
 0x104   :  { %1138 = vmatpush1.msra.mxu1 %v470_v39  ;;  %1068 = vmatprep.subr.mxu0 %v339_v40  ;;  %v559_v16 = vld [vmem:[#allocation2 + $0xf78] sm:$0xff]  ;;  %v558_v18 = vld [vmem:[#allocation2 + $0xf70] sm:$0xff] }
 0x105   :  { %1139 = vmatprep.subr.mxu1 %v467_v41  ;;  %1069 = vmatpush1.msra.mxu0 %v338_v42  ;;  %v427_v60 = vld [vmem:[#allocation2 + $0xb58] sm:$0xff]  ;;  %v426_v21 = vld [vmem:[#allocation2 + $0xb50] sm:$0xff] }
 0x106   :  { %1140 = vmatpush1.msra.mxu1 %v466_v43  ;;  %1070 = vmatprep.subr.mxu0 %v335_v45  ;;  %v555_v19 = vld [vmem:[#allocation2 + $0xf58] sm:$0xff]  ;;  %v554_v22 = vld [vmem:[#allocation2 + $0xf50] sm:$0xff] }
 0x107   :  { %1141 = vmatprep.subr.mxu1 %v463_v46  ;;  %1071 = vmatpush1.msra.mxu0 %v334_v47  ;;  %v423_v23 = vld [vmem:[#allocation2 + $0xb38] sm:$0xff]  ;;  %v422_v26 = vld [vmem:[#allocation2 + $0xb30] sm:$0xff] }
 0x108   :  { %1142 = vmatpush1.msra.mxu1 %v462_v48  ;;  %1072 = vmatprep.subr.mxu0 %v331_v49  ;;  %v551_v24 = vld [vmem:[#allocation2 + $0xf38] sm:$0xff]  ;;  %v550_v27 = vld [vmem:[#allocation2 + $0xf30] sm:$0xff] }
 0x109   :  { %1143 = vmatprep.subr.mxu1 %v459_v50  ;;  %1073 = vmatpush1.msra.mxu0 %v330_v51  ;;  %v419_v28 = vld [vmem:[#allocation2 + $0xb18] sm:$0xff]  ;;  %v418_v31 = vld [vmem:[#allocation2 + $0xb10] sm:$0xff] }
 0x10a   :  { %1144 = vmatpush1.msra.mxu1 %v458_v52  ;;  %1074 = vmatprep.subr.mxu0 %v327_v53  ;;  %v547_v29 = vld [vmem:[#allocation2 + $0xf18] sm:$0xff]  ;;  %v546_v32 = vld [vmem:[#allocation2 + $0xf10] sm:$0xff] }
 0x10b   :  { %1145 = vmatprep.subr.mxu1 %v455_v55  ;;  %1075 = vmatpush1.msra.mxu0 %v326_v56  ;;  %v415_v34 = vld [vmem:[#allocation2 + $0xaf8] sm:$0xff]  ;;  %v414_v36 = vld [vmem:[#allocation2 + $0xaf0] sm:$0xff] }
 0x10c   :  { %1146 = vmatpush1.msra.mxu1 %v454_v57  ;;  %1076 = vmatprep.subr.mxu0 %v323_v58  ;;  %v543_v35 = vld [vmem:[#allocation2 + $0xef8] sm:$0xff]  ;;  %v542_v37 = vld [vmem:[#allocation2 + $0xef0] sm:$0xff] }
 0x10d   :  { %1147 = vmatprep.subr.mxu1 %v451_v59  ;;  %1077 = vmatpush1.msra.mxu0 %v322_v61  ;;  %v411_v38 = vld [vmem:[#allocation2 + $0xad8] sm:$0xff]  ;;  %v410_v40 = vld [vmem:[#allocation2 + $0xad0] sm:$0xff] }
 0x10e   :  { %1148 = vmatpush1.msra.mxu1 %v450_v62  ;;  %1078 = vmatprep.subr.mxu0 %v447_v63  ;;  %v539_v39 = vld [vmem:[#allocation2 + $0xed8] sm:$0xff]  ;;  %v538_v41 = vld [vmem:[#allocation2 + $0xed0] sm:$0xff] }
 0x10f   :  { %1149 = vmatprep.subr.mxu1 %v575_v1  ;;  %1079 = vmatpush2.msra.mxu0 %v446_v10  ;;  %v407_v42 = vld [vmem:[#allocation2 + $0xab8] sm:$0xff]  ;;  %v406_v45 = vld [vmem:[#allocation2 + $0xab0] sm:$0xff] }
 0x110   :  { %1150 = vmatpush2.msra.mxu1 %v574_v2  ;;  %1080 = vmatprep.subr.mxu0 %v443_v4  ;;  %v535_v43 = vld [vmem:[#allocation2 + $0xeb8] sm:$0xff]  ;;  %v534_v46 = vld [vmem:[#allocation2 + $0xeb0] sm:$0xff] }
 0x111   :  { %1151 = vmatprep.subr.mxu1 %v571_v12  ;;  %1081 = vmatpush2.msra.mxu0 %v442_v5  ;;  %v403_v47 = vld [vmem:[#allocation2 + $0xa98] sm:$0xff]  ;;  %v402_v49 = vld [vmem:[#allocation2 + $0xa90] sm:$0xff]  ;;  %v1313_v5 = vld [vmem:[#allocation4 + $0x3c8] sm:$0xff] }
 0x112   :  { %1152 = vmatpush2.msra.mxu1 %v570_v0  ;;  %1082 = vmatprep.subr.mxu0 %v439_v3  ;;  %v531_v48 = vld [vmem:[#allocation2 + $0xe98] sm:$0xff]  ;;  %v530_v50 = vld [vmem:[#allocation2 + $0xe90] sm:$0xff]  ;;  %v1312_v0 = vld [vmem:[#allocation4 + $0x3c0] sm:$0xff] }
 0x113   :  { %1153 = vmatprep.subr.mxu1 %v567_v6  ;;  %1083 = vmatpush2.msra.mxu0 %v438_v7  ;;  %v399_v51 = vld [vmem:[#allocation2 + $0xa78] sm:$0xff]  ;;  %v398_v53 = vld [vmem:[#allocation2 + $0xa70] sm:$0xff]  ;;  %v1305_v3 = vld [vmem:[#allocation4 + $0x388] sm:$0xff] }
 0x114   :  { %1154 = vmatpush2.msra.mxu1 %v566_v8  ;;  %1084 = vmatprep.subr.mxu0 %v435_v9  ;;  %v527_v52 = vld [vmem:[#allocation2 + $0xe78] sm:$0xff]  ;;  %v526_v55 = vld [vmem:[#allocation2 + $0xe70] sm:$0xff]  ;;  %v1304_v6 = vld [vmem:[#allocation4 + $0x380] sm:$0xff] }
 0x115   :  { %1155 = vmatprep.subr.mxu1 %v563_v11  ;;  %1085 = vmatpush2.msra.mxu0 %v434_v13  ;;  %v395_v56 = vld [vmem:[#allocation2 + $0xa58] sm:$0xff]  ;;  %v394_v58 = vld [vmem:[#allocation2 + $0xa50] sm:$0xff]  ;;  %v1297_v7 = vld [vmem:[#allocation4 + $0x348] sm:$0xff] }
 0x116   :  { %1156 = vmatpush2.msra.mxu1 %v562_v14  ;;  %1086 = vmatprep.subr.mxu0 %v431_v15  ;;  %v523_v57 = vld [vmem:[#allocation2 + $0xe58] sm:$0xff]  ;;  %v522_v59 = vld [vmem:[#allocation2 + $0xe50] sm:$0xff]  ;;  %v1296_v8 = vld [vmem:[#allocation4 + $0x340] sm:$0xff] }
 0x117   :  { %1157 = vmatprep.subr.mxu1 %v559_v16  ;;  %1087 = vmatpush2.msra.mxu0 %v430_v17  ;;  %v391_v61 = vld [vmem:[#allocation2 + $0xa38] sm:$0xff]  ;;  %v390_v63 = vld [vmem:[#allocation2 + $0xa30] sm:$0xff]  ;;  %v1289_v9 = vld [vmem:[#allocation4 + $0x308] sm:$0xff] }
 0x118   :  { %1158 = vmatpush2.msra.mxu1 %v558_v18  ;;  %1088 = vmatprep.subr.mxu0 %v427_v60  ;;  %v519_v62 = vld [vmem:[#allocation2 + $0xe38] sm:$0xff]  ;;  %v518_v1 = vld [vmem:[#allocation2 + $0xe30] sm:$0xff]  ;;  %v1569_v11 = vld [vmem:[#allocation4 + $0xbc8] sm:$0xff] }
 0x119   :  { %1159 = vmatprep.subr.mxu1 %v555_v19  ;;  %1089 = vmatpush2.msra.mxu0 %v426_v21  ;;  %v387_v10 = vld [vmem:[#allocation2 + $0xa18] sm:$0xff]  ;;  %v386_v4 = vld [vmem:[#allocation2 + $0xa10] sm:$0xff]  ;;  %v1568_v13 = vld [vmem:[#allocation4 + $0xbc0] sm:$0xff] }
 0x11a   :  { %1160 = vmatpush2.msra.mxu1 %v554_v22  ;;  %1090 = vmatprep.subr.mxu0 %v423_v23  ;;  %v515_v2 = vld [vmem:[#allocation2 + $0xe18] sm:$0xff]  ;;  %v514_v12 = vld [vmem:[#allocation2 + $0xe10] sm:$0xff]  ;;  %v1560_v14 = vld [vmem:[#allocation4 + $0xb80] sm:$0xff] }
 0x11b   :  { %1161 = vmatprep.subr.mxu1 %v551_v24  ;;  %1091 = vmatpush2.msra.mxu0 %v422_v26  ;;  %v1273_v15 = vld [vmem:[#allocation4 + $0x288] sm:$0xff]  ;;  %v1272_v17 = vld [vmem:[#allocation4 + $0x280] sm:$0xff] }
 0x11c   :  { %1162 = vmatpush2.msra.mxu1 %v550_v27  ;;  %1092 = vmatprep.subr.mxu0 %v419_v28  ;;  %v1553_v16 = vld [vmem:[#allocation4 + $0xb48] sm:$0xff]  ;;  %v1552_v18 = vld [vmem:[#allocation4 + $0xb40] sm:$0xff] }
 0x11d   :  { %1163 = vmatprep.subr.mxu1 %v547_v29  ;;  %1093 = vmatpush2.msra.mxu0 %v418_v31  ;;  %v1265_v60 = vld [vmem:[#allocation4 + $0x248] sm:$0xff]  ;;  %v1264_v21 = vld [vmem:[#allocation4 + $0x240] sm:$0xff] }
 0x11e   :  { %1164 = vmatpush2.msra.mxu1 %v546_v32  ;;  %1094 = vmatprep.subr.mxu0 %v415_v34  ;;  %v1545_v19 = vld [vmem:[#allocation4 + $0xb08] sm:$0xff]  ;;  %v1544_v22 = vld [vmem:[#allocation4 + $0xb00] sm:$0xff] }
 0x11f   :  { %1165 = vmatprep.subr.mxu1 %v543_v35  ;;  %1095 = vmatpush2.msra.mxu0 %v414_v36  ;;  %v1257_v23 = vld [vmem:[#allocation4 + $0x208] sm:$0xff]  ;;  %v1256_v26 = vld [vmem:[#allocation4 + $0x200] sm:$0xff] }
 0x120   :  { %1166 = vmatpush2.msra.mxu1 %v542_v37  ;;  %1096 = vmatprep.subr.mxu0 %v411_v38  ;;  %v1537_v24 = vld [vmem:[#allocation4 + $0xac8] sm:$0xff]  ;;  %v1536_v27 = vld [vmem:[#allocation4 + $0xac0] sm:$0xff] }
 0x121   :  { %1167 = vmatprep.subr.mxu1 %v539_v39  ;;  %1097 = vmatpush2.msra.mxu0 %v410_v40  ;;  %v1249_v28 = vld [vmem:[#allocation4 + $0x1c8] sm:$0xff]  ;;  %v1248_v31 = vld [vmem:[#allocation4 + $0x1c0] sm:$0xff] }
 0x122   :  { %1168 = vmatpush2.msra.mxu1 %v538_v41  ;;  %1098 = vmatprep.subr.mxu0 %v407_v42  ;;  %v1529_v29 = vld [vmem:[#allocation4 + $0xa88] sm:$0xff]  ;;  %v1528_v32 = vld [vmem:[#allocation4 + $0xa80] sm:$0xff] }
 0x123   :  { %1169 = vmatprep.subr.mxu1 %v535_v43  ;;  %1099 = vmatpush2.msra.mxu0 %v406_v45  ;;  %v1241_v34 = vld [vmem:[#allocation4 + $0x188] sm:$0xff]  ;;  %v1240_v36 = vld [vmem:[#allocation4 + $0x180] sm:$0xff] }
 0x124   :  { %1170 = vmatpush2.msra.mxu1 %v534_v46  ;;  %1100 = vmatprep.subr.mxu0 %v403_v47  ;;  %v1521_v35 = vld [vmem:[#allocation4 + $0xa48] sm:$0xff]  ;;  %v1520_v37 = vld [vmem:[#allocation4 + $0xa40] sm:$0xff] }
 0x125   :  { %1171 = vmatprep.subr.mxu1 %v531_v48  ;;  %1101 = vmatpush2.msra.mxu0 %v402_v49  ;;  %v1233_v38 = vld [vmem:[#allocation4 + $0x148] sm:$0xff]  ;;  %v1232_v40 = vld [vmem:[#allocation4 + $0x140] sm:$0xff] }
 0x126   :  { %1172 = vmatpush2.msra.mxu1 %v530_v50  ;;  %1102 = vmatprep.subr.mxu0 %v399_v51  ;;  %v1513_v39 = vld [vmem:[#allocation4 + $0xa08] sm:$0xff]  ;;  %v1512_v41 = vld [vmem:[#allocation4 + $0xa00] sm:$0xff] }
 0x127   :  { %1173 = vmatprep.subr.mxu1 %v527_v52  ;;  %1103 = vmatpush2.msra.mxu0 %v398_v53  ;;  %v1225_v42 = vld [vmem:[#allocation4 + $0x108] sm:$0xff]  ;;  %v1224_v45 = vld [vmem:[#allocation4 + $0x100] sm:$0xff] }
 0x128   :  { %1174 = vmatpush2.msra.mxu1 %v526_v55  ;;  %1104 = vmatprep.subr.mxu0 %v395_v56  ;;  %v1505_v43 = vld [vmem:[#allocation4 + $0x9c8] sm:$0xff]  ;;  %v1504_v46 = vld [vmem:[#allocation4 + $0x9c0] sm:$0xff] }
 0x129   :  { %1175 = vmatprep.subr.mxu1 %v523_v57  ;;  %1105 = vmatpush2.msra.mxu0 %v394_v58  ;;  %v1217_v47 = vld [vmem:[#allocation4 + $0xc8] sm:$0xff]  ;;  %v1216_v49 = vld [vmem:[#allocation4 + $0xc0] sm:$0xff] }
 0x12a   :  { %1176 = vmatpush2.msra.mxu1 %v522_v59  ;;  %1106 = vmatprep.subr.mxu0 %v391_v61  ;;  %v1497_v48 = vld [vmem:[#allocation4 + $0x988] sm:$0xff]  ;;  %v1496_v50 = vld [vmem:[#allocation4 + $0x980] sm:$0xff] }
 0x12b   :  { %1177 = vmatprep.subr.mxu1 %v519_v62  ;;  %1107 = vmatpush2.msra.mxu0 %v390_v63  ;;  %v1209_v51 = vld [vmem:[#allocation4 + $0x88] sm:$0xff]  ;;  %v1208_v53 = vld [vmem:[#allocation4 + $0x80] sm:$0xff] }
 0x12c   :  { %1178 = vmatpush2.msra.mxu1 %v518_v1  ;;  %1108 = vmatprep.subr.mxu0 %v387_v10  ;;  %v1489_v52 = vld [vmem:[#allocation4 + $0x948] sm:$0xff]  ;;  %v1488_v55 = vld [vmem:[#allocation4 + $0x940] sm:$0xff] }
 0x12d   :  { %1179 = vmatprep.subr.mxu1 %v515_v2  ;;  %1109 = vmatpush2.msra.mxu0 %v386_v4  ;;  %v1201_v56 = vld [vmem:[#allocation4 + $0x48] sm:$0xff]  ;;  %v1200_v58 = vld [vmem:[#allocation4 + $0x40] sm:$0xff] }
 0x12e   :  { %1110 = vmatprep.mubr.f32.mxu0 %v2531_v30  ;;  %1180 = vmatpush2.msra.mxu1 %v514_v12  ;;  %v1288_v30 = vld [vmem:[#allocation4 + $0x300] sm:$0xff]  ;;  %v1481_v57 = vld [vmem:[#allocation4 + $0x908] sm:$0xff] }
 0x12f   :  { %1181 = vmatprep.mubr.f32.mxu1 %v2535_v33  ;;  %1111 = vmatmul.mubr.f32.vlgmr.msra.gmra.mxu0 %v2524_v20  ;;  %v1281_v33 = vld [vmem:[#allocation4 + $0x2c8] sm:$0xff]  ;;  %v1480_v59 = vld [vmem:[#allocation4 + $0x900] sm:$0xff] }
 0x130   :  { %1182 = vmatmul.mubr.f32.vlgmr.msra.gmra.mxu1 %v2527_v25  ;;  %1746 = vmatprep.subr.mxu0 %v1313_v5  ;;  %v1561_v20 = vld [vmem:[#allocation4 + $0xb88] sm:$0xff]  ;;  %v1280_v25 = vld [vmem:[#allocation4 + $0x2c0] sm:$0xff] }
 0x131   :  { %1747 = vmatpush1.msra.mxu0 %v1312_v0  ;;  %1817 = vmatprep.subr.mxu1 %v1569_v11  ;;  %v1193_v61 = vld [vmem:[#allocation4 + $0x8] sm:$0xff]  ;;  %v1192_v63 = vld [vmem:[#allocation4] sm:$0xff] }
 0x132   :  { %1748 = vmatprep.subr.mxu0 %v1305_v3  ;;  %1818 = vmatpush1.msra.mxu1 %v1568_v13  ;;  %v1473_v62 = vld [vmem:[#allocation4 + $0x8c8] sm:$0xff]  ;;  %v1472_v1 = vld [vmem:[#allocation4 + $0x8c0] sm:$0xff] }
 0x133   :  { %1749 = vmatpush1.msra.mxu0 %v1304_v6  ;;  %1819 = vmatprep.subr.mxu1 %v1561_v20  ;;  %v1441_v10 = vld [vmem:[#allocation4 + $0x7c8] sm:$0xff]  ;;  %v1440_v4 = vld [vmem:[#allocation4 + $0x7c0] sm:$0xff] }
 0x134   :  { %1750 = vmatprep.subr.mxu0 %v1297_v7  ;;  %1820 = vmatpush1.msra.mxu1 %v1560_v14  ;;  %v1465_v2 = vld [vmem:[#allocation4 + $0x888] sm:$0xff]  ;;  %v1464_v12 = vld [vmem:[#allocation4 + $0x880] sm:$0xff] }
 0x135   :  { %1751 = vmatpush1.msra.mxu0 %v1296_v8  ;;  %1821 = vmatprep.subr.mxu1 %v1553_v16  ;;  %v1433_v5 = vld [vmem:[#allocation4 + $0x788] sm:$0xff]  ;;  %v1432_v3 = vld [vmem:[#allocation4 + $0x780] sm:$0xff] }
 0x136   :  { %1752 = vmatprep.subr.mxu0 %v1289_v9  ;;  %1822 = vmatpush1.msra.mxu1 %v1552_v18  ;;  %v1457_v0 = vld [vmem:[#allocation4 + $0x848] sm:$0xff]  ;;  %v1456_v6 = vld [vmem:[#allocation4 + $0x840] sm:$0xff] }
 0x137   :  { %1753 = vmatpush1.msra.mxu0 %v1288_v30  ;;  %1823 = vmatprep.subr.mxu1 %v1545_v19  ;;  %v1425_v7 = vld [vmem:[#allocation4 + $0x748] sm:$0xff]  ;;  %v1424_v9 = vld [vmem:[#allocation4 + $0x740] sm:$0xff] }
 0x138   :  { %1754 = vmatprep.subr.mxu0 %v1281_v33  ;;  %1824 = vmatpush1.msra.mxu1 %v1544_v22  ;;  %v1449_v8 = vld [vmem:[#allocation4 + $0x808] sm:$0xff]  ;;  %v1448_v11 = vld [vmem:[#allocation4 + $0x800] sm:$0xff] }
 0x139   :  { %1755 = vmatpush1.msra.mxu0 %v1280_v25  ;;  %1825 = vmatprep.subr.mxu1 %v1537_v24  ;;  %v1417_v30 = vld [vmem:[#allocation4 + $0x708] sm:$0xff]  ;;  %v1416_v33 = vld [vmem:[#allocation4 + $0x700] sm:$0xff] }
 0x13a   :  { %1756 = vmatprep.subr.mxu0 %v1273_v15  ;;  %1826 = vmatpush1.msra.mxu1 %v1536_v27  ;;  %v1697_v13 = vld [vmem:[#allocation4 + $0xfc8] sm:$0xff]  ;;  %v1696_v20 = vld [vmem:[#allocation4 + $0xfc0] sm:$0xff] }
 0x13b   :  { %1757 = vmatpush1.msra.mxu0 %v1272_v17  ;;  %1827 = vmatprep.subr.mxu1 %v1529_v29  ;;  %v1409_v25 = vld [vmem:[#allocation4 + $0x6c8] sm:$0xff]  ;;  %v1408_v15 = vld [vmem:[#allocation4 + $0x6c0] sm:$0xff] }
 0x13c   :  { %1758 = vmatprep.subr.mxu0 %v1265_v60  ;;  %1828 = vmatpush1.msra.mxu1 %v1528_v32  ;;  %v1689_v14 = vld [vmem:[#allocation4 + $0xf88] sm:$0xff]  ;;  %v1688_v16 = vld [vmem:[#allocation4 + $0xf80] sm:$0xff] }
 0x13d   :  { %1759 = vmatpush1.msra.mxu0 %v1264_v21  ;;  %1829 = vmatprep.subr.mxu1 %v1521_v35  ;;  %v1401_v17 = vld [vmem:[#allocation4 + $0x688] sm:$0xff]  ;;  %v1400_v60 = vld [vmem:[#allocation4 + $0x680] sm:$0xff] }
 0x13e   :  { %1760 = vmatprep.subr.mxu0 %v1257_v23  ;;  %1830 = vmatpush1.msra.mxu1 %v1520_v37  ;;  %v1681_v18 = vld [vmem:[#allocation4 + $0xf48] sm:$0xff]  ;;  %v1680_v19 = vld [vmem:[#allocation4 + $0xf40] sm:$0xff] }
 0x13f   :  { %1761 = vmatpush1.msra.mxu0 %v1256_v26  ;;  %1831 = vmatprep.subr.mxu1 %v1513_v39  ;;  %v1393_v21 = vld [vmem:[#allocation4 + $0x648] sm:$0xff]  ;;  %v1392_v23 = vld [vmem:[#allocation4 + $0x640] sm:$0xff] }
 0x140   :  { %1762 = vmatprep.subr.mxu0 %v1249_v28  ;;  %1832 = vmatpush1.msra.mxu1 %v1512_v41  ;;  %v1673_v22 = vld [vmem:[#allocation4 + $0xf08] sm:$0xff]  ;;  %v1672_v24 = vld [vmem:[#allocation4 + $0xf00] sm:$0xff] }
 0x141   :  { %1763 = vmatpush1.msra.mxu0 %v1248_v31  ;;  %1833 = vmatprep.subr.mxu1 %v1505_v43  ;;  %v1385_v26 = vld [vmem:[#allocation4 + $0x608] sm:$0xff]  ;;  %v1384_v28 = vld [vmem:[#allocation4 + $0x600] sm:$0xff] }
 0x142   :  { %1764 = vmatprep.subr.mxu0 %v1241_v34  ;;  %1834 = vmatpush1.msra.mxu1 %v1504_v46  ;;  %v1665_v27 = vld [vmem:[#allocation4 + $0xec8] sm:$0xff]  ;;  %v1664_v29 = vld [vmem:[#allocation4 + $0xec0] sm:$0xff] }
 0x143   :  { %1765 = vmatpush1.msra.mxu0 %v1240_v36  ;;  %1835 = vmatprep.subr.mxu1 %v1497_v48  ;;  %v1377_v31 = vld [vmem:[#allocation4 + $0x5c8] sm:$0xff]  ;;  %v1376_v34 = vld [vmem:[#allocation4 + $0x5c0] sm:$0xff]  ;;  %v757_v48 = vpop.f32.mrf.mxu1 }
 0x144   :  { %1766 = vmatprep.subr.mxu0 %v1233_v38  ;;  %1836 = vmatpush1.msra.mxu1 %v1496_v50  ;;  %v1657_v32 = vld [vmem:[#allocation4 + $0xe88] sm:$0xff]  ;;  %v1656_v35 = vld [vmem:[#allocation4 + $0xe80] sm:$0xff] }
 0x145   :  { %1767 = vmatpush1.msra.mxu0 %v1232_v40  ;;  %1837 = vmatprep.subr.mxu1 %v1489_v52  ;;  %v1369_v36 = vld [vmem:[#allocation4 + $0x588] sm:$0xff]  ;;  %v1368_v38 = vld [vmem:[#allocation4 + $0x580] sm:$0xff] }
 0x146   :  { %1768 = vmatprep.subr.mxu0 %v1225_v42  ;;  %1838 = vmatpush1.msra.mxu1 %v1488_v55  ;;  %v1649_v37 = vld [vmem:[#allocation4 + $0xe48] sm:$0xff]  ;;  %v1648_v39 = vld [vmem:[#allocation4 + $0xe40] sm:$0xff] }
 0x147   :  { %1769 = vmatpush1.msra.mxu0 %v1224_v45  ;;  %1839 = vmatprep.subr.mxu1 %v1481_v57  ;;  %v1361_v40 = vld [vmem:[#allocation4 + $0x548] sm:$0xff]  ;;  %v1360_v42 = vld [vmem:[#allocation4 + $0x540] sm:$0xff] }
 0x148   :  { %1770 = vmatprep.subr.mxu0 %v1217_v47  ;;  %1840 = vmatpush1.msra.mxu1 %v1480_v59  ;;  %v1641_v41 = vld [vmem:[#allocation4 + $0xe08] sm:$0xff]  ;;  %v1640_v43 = vld [vmem:[#allocation4 + $0xe00] sm:$0xff]  ;;  %v686_v47 = vpop.f32.mrf.mxu0  ;;  %v759_v59 = vpop.f32.mrf.mxu1 }
 0x149   :  { %1771 = vmatpush1.msra.mxu0 %v1216_v49  ;;  %1841 = vmatprep.subr.mxu1 %v1473_v62  ;;  %v1353_v45 = vld [vmem:[#allocation4 + $0x508] sm:$0xff]  ;;  %v1352_v49 = vld [vmem:[#allocation4 + $0x500] sm:$0xff] }
 0x14a   :  { %1772 = vmatprep.subr.mxu0 %v1209_v51  ;;  %1842 = vmatpush1.msra.mxu1 %v1472_v1  ;;  %v1633_v46 = vld [vmem:[#allocation4 + $0xdc8] sm:$0xff]  ;;  %v1632_v50 = vld [vmem:[#allocation4 + $0xdc0] sm:$0xff] }
 0x14b   :  { %1773 = vmatpush1.msra.mxu0 %v1208_v53  ;;  %1843 = vmatprep.subr.mxu1 %v1465_v2  ;;  %v1345_v51 = vld [vmem:[#allocation4 + $0x4c8] sm:$0xff]  ;;  %v1344_v53 = vld [vmem:[#allocation4 + $0x4c0] sm:$0xff] }
 0x14c   :  { %1774 = vmatprep.subr.mxu0 %v1201_v56  ;;  %1844 = vmatpush1.msra.mxu1 %v1464_v12  ;;  %v1625_v52 = vld [vmem:[#allocation4 + $0xd88] sm:$0xff]  ;;  %v1624_v55 = vld [vmem:[#allocation4 + $0xd80] sm:$0xff] }
 0x14d   :  { %1775 = vmatpush1.msra.mxu0 %v1200_v58  ;;  %1845 = vmatprep.subr.mxu1 %v1457_v0  ;;  %v1337_v56 = vld [vmem:[#allocation4 + $0x488] sm:$0xff]  ;;  %v688_v58 = vpop.f32.mrf.mxu0  ;;  %v1616_v62 = vld [vmem:[#allocation4 + $0xd40] sm:$0xff] }
 0x14e   :  { %1776 = vmatprep.subr.mxu0 %v1193_v61  ;;  %1846 = vmatpush1.msra.mxu1 %v1456_v6  ;;  %v1617_v57 = vld [vmem:[#allocation4 + $0xd48] sm:$0xff]  ;;  %v1336_v61 = vld [vmem:[#allocation4 + $0x480] sm:$0xff]  ;;  %v760_v12 = vadd.f32 %v759_v59, %v688_v58  ;;  %v1194_v58 = vld [vmem:[#allocation4 + $0x10] sm:$0xff] }
 0x14f   :  { %1777 = vmatpush1.msra.mxu0 %v1192_v63  ;;  %1847 = vmatprep.subr.mxu1 %v1449_v8  ;;  %v758_v63 = vadd.f32 %v757_v48, %v686_v47  ;;  %v1329_v1 = vld [vmem:[#allocation4 + $0x448] sm:$0xff]  ;;  %v1234_v47 = vld [vmem:[#allocation4 + $0x150] sm:$0xff]  ;;  %v1227_v48 = vld [vmem:[#allocation4 + $0x118] sm:$0xff] }
 0x150   :  { %1778 = vmatprep.subr.mxu0 %v1441_v10  ;;  %1848 = vmatpush1.msra.mxu1 %v1448_v11  ;;  %v1609_v10 = vld [vmem:[#allocation4 + $0xd08] sm:$0xff]  ;;  %v1443_v59 = vld [vmem:[#allocation4 + $0x7d8] sm:$0xff] }
 0x151   :  { %1779 = vmatpush2.msra.mxu0 %v1440_v4  ;;  %1849 = vmatprep.subr.mxu1 %v1697_v13  ;;  %v1328_v4 = vld [vmem:[#allocation4 + $0x440] sm:$0xff]  ;;  %v1321_v0 = vld [vmem:[#allocation4 + $0x408] sm:$0xff] }
 0x152   :  { %1780 = vmatprep.subr.mxu0 %v1433_v5  ;;  %1850 = vmatpush2.msra.mxu1 %v1696_v20  ;;  %v1608_v13 = vld [vmem:[#allocation4 + $0xd00] sm:$0xff]  ;;  %v1601_v20 = vld [vmem:[#allocation4 + $0xcc8] sm:$0xff] }
 0x153   :  { %1781 = vmatpush2.msra.mxu0 %v1432_v3  ;;  %1851 = vmatprep.subr.mxu1 %v1689_v14 }
 0x154   :  { %1782 = vmatprep.subr.mxu0 %v1425_v7  ;;  %1852 = vmatpush2.msra.mxu1 %v1688_v16  ;;  %v1320_v7 = vld [vmem:[#allocation4 + $0x400] sm:$0xff] }
 0x155   :  { %1783 = vmatpush2.msra.mxu0 %v1424_v9  ;;  %1853 = vmatprep.subr.mxu1 %v1681_v18  ;;  %v1315_v9 = vld [vmem:[#allocation4 + $0x3d8] sm:$0xff]  ;;  %v1592_v18 = vld [vmem:[#allocation4 + $0xc80] sm:$0xff] }
 0x156   :  { %1784 = vmatprep.subr.mxu0 %v1417_v30  ;;  %1854 = vmatpush2.msra.mxu1 %v1680_v19  ;;  %v1585_v19 = vld [vmem:[#allocation4 + $0xc48] sm:$0xff] }
 0x157   :  { %1785 = vmatpush2.msra.mxu0 %v1416_v33  ;;  %1855 = vmatprep.subr.mxu1 %v1673_v22  ;;  %v1584_v22 = vld [vmem:[#allocation4 + $0xc40] sm:$0xff] }
 0x158   :  { %1786 = vmatprep.subr.mxu0 %v1409_v25  ;;  %1856 = vmatpush2.msra.mxu1 %v1672_v24  ;;  %v1600_v25 = vld [vmem:[#allocation4 + $0xcc0] sm:$0xff]  ;;  %v1577_v24 = vld [vmem:[#allocation4 + $0xc08] sm:$0xff] }
 0x159   :  { %1787 = vmatpush2.msra.mxu0 %v1408_v15  ;;  %1857 = vmatprep.subr.mxu1 %v1665_v27  ;;  %v1593_v15 = vld [vmem:[#allocation4 + $0xc88] sm:$0xff]  ;;  %v1576_v27 = vld [vmem:[#allocation4 + $0xc00] sm:$0xff] }
 0x15a   :  { %1788 = vmatprep.subr.mxu0 %v1401_v17  ;;  %1858 = vmatpush2.msra.mxu1 %v1664_v29  ;;  %v1314_v17 = vld [vmem:[#allocation4 + $0x3d0] sm:$0xff]  ;;  %v1571_v29 = vld [vmem:[#allocation4 + $0xbd8] sm:$0xff] }
 0x15b   :  { %1789 = vmatpush2.msra.mxu0 %v1400_v60  ;;  %1859 = vmatprep.subr.mxu1 %v1657_v32  ;;  %v1307_v60 = vld [vmem:[#allocation4 + $0x398] sm:$0xff] }
 0x15c   :  { %1790 = vmatprep.subr.mxu0 %v1393_v21  ;;  %1860 = vmatpush2.msra.mxu1 %v1656_v35  ;;  %v1306_v21 = vld [vmem:[#allocation4 + $0x390] sm:$0xff]  ;;  %v1283_v32 = vld [vmem:[#allocation4 + $0x2d8] sm:$0xff] }
 0x15d   :  { %1791 = vmatpush2.msra.mxu0 %v1392_v23  ;;  %1861 = vmatprep.subr.mxu1 %v1649_v37  ;;  %v1299_v23 = vld [vmem:[#allocation4 + $0x358] sm:$0xff] }
 0x15e   :  { %1792 = vmatprep.subr.mxu0 %v1385_v26  ;;  %1862 = vmatpush2.msra.mxu1 %v1648_v39  ;;  %v1298_v26 = vld [vmem:[#allocation4 + $0x350] sm:$0xff]  ;;  %v1275_v35 = vld [vmem:[#allocation4 + $0x298] sm:$0xff] }
 0x15f   :  { %1793 = vmatpush2.msra.mxu0 %v1384_v28  ;;  %1863 = vmatprep.subr.mxu1 %v1641_v41  ;;  %v1291_v28 = vld [vmem:[#allocation4 + $0x318] sm:$0xff] }
 0x160   :  { %1794 = vmatprep.subr.mxu0 %v1377_v31  ;;  %1864 = vmatpush2.msra.mxu1 %v1640_v43  ;;  %v1290_v31 = vld [vmem:[#allocation4 + $0x310] sm:$0xff]  ;;  %v1267_v37 = vld [vmem:[#allocation4 + $0x258] sm:$0xff] }
 0x161   :  { %1795 = vmatpush2.msra.mxu0 %v1376_v34  ;;  %1865 = vmatprep.subr.mxu1 %v1633_v46  ;;  %v1282_v34 = vld [vmem:[#allocation4 + $0x2d0] sm:$0xff]  ;;  %v1259_v39 = vld [vmem:[#allocation4 + $0x218] sm:$0xff] }
 0x162   :  { %1796 = vmatprep.subr.mxu0 %v1369_v36  ;;  %1866 = vmatpush2.msra.mxu1 %v1632_v50  ;;  %v1274_v36 = vld [vmem:[#allocation4 + $0x290] sm:$0xff]  ;;  %v1251_v41 = vld [vmem:[#allocation4 + $0x1d8] sm:$0xff] }
 0x163   :  { %1797 = vmatpush2.msra.mxu0 %v1368_v38  ;;  %1867 = vmatprep.subr.mxu1 %v1625_v52  ;;  %v1266_v38 = vld [vmem:[#allocation4 + $0x250] sm:$0xff]  ;;  %v1243_v43 = vld [vmem:[#allocation4 + $0x198] sm:$0xff] }
 0x164   :  { %1798 = vmatprep.subr.mxu0 %v1361_v40  ;;  %1868 = vmatpush2.msra.mxu1 %v1624_v55  ;;  %v1258_v40 = vld [vmem:[#allocation4 + $0x210] sm:$0xff]  ;;  %v1235_v46 = vld [vmem:[#allocation4 + $0x158] sm:$0xff] }
 0x165   :  { %1799 = vmatpush2.msra.mxu0 %v1360_v42  ;;  %1869 = vmatprep.subr.mxu1 %v1617_v57  ;;  %v1250_v42 = vld [vmem:[#allocation4 + $0x1d0] sm:$0xff]  ;;  %v1219_v50 = vld [vmem:[#allocation4 + $0xd8] sm:$0xff] }
 0x166   :  { %1800 = vmatprep.subr.mxu0 %v1353_v45  ;;  %1870 = vmatpush2.msra.mxu1 %v1616_v62  ;;  %v1242_v45 = vld [vmem:[#allocation4 + $0x190] sm:$0xff]  ;;  %v1211_v52 = vld [vmem:[#allocation4 + $0x98] sm:$0xff] }
 0x167   :  { %1801 = vmatpush2.msra.mxu0 %v1352_v49  ;;  %1871 = vmatprep.subr.mxu1 %v1609_v10  ;;  %v1226_v49 = vld [vmem:[#allocation4 + $0x110] sm:$0xff]  ;;  %v1203_v55 = vld [vmem:[#allocation4 + $0x58] sm:$0xff] }
 0x168   :  { %1802 = vmatprep.subr.mxu0 %v1345_v51  ;;  %1872 = vmatpush2.msra.mxu1 %v1608_v13  ;;  %v1218_v51 = vld [vmem:[#allocation4 + $0xd0] sm:$0xff]  ;;  %v1195_v57 = vld [vmem:[#allocation4 + $0x18] sm:$0xff] }
 0x169   :  { %1803 = vmatpush2.msra.mxu0 %v1344_v53  ;;  %1873 = vmatprep.subr.mxu1 %v1601_v20  ;;  %v1210_v53 = vld [vmem:[#allocation4 + $0x90] sm:$0xff]  ;;  %v1435_v62 = vld [vmem:[#allocation4 + $0x798] sm:$0xff] }
 0x16a   :  { %1804 = vmatprep.subr.mxu0 %v1337_v56  ;;  %1874 = vmatpush2.msra.mxu1 %v1600_v25  ;;  %v1202_v56 = vld [vmem:[#allocation4 + $0x50] sm:$0xff]  ;;  %v1371_v13 = vld [vmem:[#allocation4 + $0x598] sm:$0xff] }
 0x16b   :  { %v828_v2 = vpop.f32.mrf.mxu0  ;;  %1805 = vmatpush2.msra.mxu0 %v1336_v61  ;;  %1875 = vmatprep.subr.mxu1 %v1593_v15  ;;  %v1442_v61 = vld [vmem:[#allocation4 + $0x7d0] sm:$0xff]  ;;  %v1363_v20 = vld [vmem:[#allocation4 + $0x558] sm:$0xff] }
 0x16c   :  { %v829_v5 = vadd.f32 %v828_v2, %v758_v63  ;;  %1806 = vmatprep.subr.mxu0 %v1329_v1  ;;  %1876 = vmatpush2.msra.mxu1 %v1592_v18  ;;  %v1434_v63 = vld [vmem:[#allocation4 + $0x790] sm:$0xff]  ;;  %v1427_v1 = vld [vmem:[#allocation4 + $0x758] sm:$0xff] }
 0x16d   :  { %v899_v3 = vpop.f32.mrf.mxu1  ;;  %v830_v6 = vpop.f32.mrf.mxu0  ;;  %1807 = vmatpush2.msra.mxu0 %v1328_v4  ;;  %1877 = vmatprep.subr.mxu1 %v1585_v19  ;;  %v1426_v10 = vld [vmem:[#allocation4 + $0x750] sm:$0xff]  ;;  %v1419_v2 = vld [vmem:[#allocation4 + $0x718] sm:$0xff] }
 0x16e   :  { %v831_v8 = vadd.f32 %v830_v6, %v760_v12  ;;  %v900_v11 = vadd.f32 %v899_v3, %v829_v5  ;;  %1808 = vmatprep.subr.mxu0 %v1321_v0  ;;  %1878 = vmatpush2.msra.mxu1 %v1584_v22  ;;  %v1418_v4 = vld [vmem:[#allocation4 + $0x710] sm:$0xff]  ;;  %v1411_v12 = vld [vmem:[#allocation4 + $0x6d8] sm:$0xff] }
 0x16f   :  { %v901_v30 = vpop.f32.mrf.mxu1  ;;  %1809 = vmatpush2.msra.mxu0 %v1320_v7  ;;  %1879 = vmatprep.subr.mxu1 %v1577_v24  ;;  %v1410_v5 = vld [vmem:[#allocation4 + $0x6d0] sm:$0xff]  ;;  %v1403_v0 = vld [vmem:[#allocation4 + $0x698] sm:$0xff] }
 0x170   :  { %v902_v33 = vadd.f32 %v901_v30, %v831_v8  ;;  %1888 = vmatprep.subr.mxu0 %v1315_v9  ;;  %v2551_v16 = vmax.f32 %v900_v11, 0.0  ;;  %1880 = vmatpush2.msra.mxu1 %v1576_v27  ;;  %v1402_v3 = vld [vmem:[#allocation4 + $0x690] sm:$0xff]  ;;  %v1395_v6 = vld [vmem:[#allocation4 + $0x658] sm:$0xff]  ;;  %v1317_v27 = vld [vmem:[#allocation4 + $0x3e8] sm:$0xff] }
 0x171   :  { %1959 = vmatprep.subr.mxu1 %v1571_v29  ;;  %v1394_v7 = vld [vmem:[#allocation4 + $0x650] sm:$0xff]  ;;  %v1387_v8 = vld [vmem:[#allocation4 + $0x618] sm:$0xff]  ;;  %v1309_v29 = vld [vmem:[#allocation4 + $0x3a8] sm:$0xff] }
 0x172   :  { %v2549_v14 = vmax.f32 %v902_v33, 0.0  ;;  %v1386_v9 = vld [vmem:[#allocation4 + $0x610] sm:$0xff]  ;;  %v1379_v11 = vld [vmem:[#allocation4 + $0x5d8] sm:$0xff] }
 0x173   :  { %v1378_v30 = vld [vmem:[#allocation4 + $0x5d0] sm:$0xff]  ;;  %v1355_v15 = vld [vmem:[#allocation4 + $0x518] sm:$0xff] }
 0x174   :  { %1810 = vmatprep.mubr.f32.mxu0 %v2549_v14  ;;  %v1370_v33 = vld [vmem:[#allocation4 + $0x590] sm:$0xff]  ;;  %v1347_v18 = vld [vmem:[#allocation4 + $0x4d8] sm:$0xff] }
 0x175   :  { %1811 = vmatmul.mubr.f32.vlgmr.msra.gmra.mxu0 %v2551_v16  ;;  %v1362_v25 = vld [vmem:[#allocation4 + $0x550] sm:$0xff]  ;;  %v1339_v19 = vld [vmem:[#allocation4 + $0x498] sm:$0xff] }
 0x176   :  { %1889 = vmatpush1.msra.mxu0 %v1314_v17  ;;  %1952 = vmatprep.mubr.f32.mxu0 %v2549_v14  ;;  %v1354_v17 = vld [vmem:[#allocation4 + $0x510] sm:$0xff]  ;;  %v1331_v22 = vld [vmem:[#allocation4 + $0x458] sm:$0xff] }
 0x177   :  { %1890 = vmatprep.subr.mxu0 %v1307_v60  ;;  %v1346_v60 = vld [vmem:[#allocation4 + $0x4d0] sm:$0xff]  ;;  %v1323_v24 = vld [vmem:[#allocation4 + $0x418] sm:$0xff] }
 0x178   :  { %1891 = vmatpush1.msra.mxu0 %v1306_v21  ;;  %v1338_v21 = vld [vmem:[#allocation4 + $0x490] sm:$0xff] }
 0x179   :  { %1892 = vmatprep.subr.mxu0 %v1299_v23  ;;  %v1330_v23 = vld [vmem:[#allocation4 + $0x450] sm:$0xff] }
 0x17a   :  { %1893 = vmatpush1.msra.mxu0 %v1298_v26  ;;  %v1322_v26 = vld [vmem:[#allocation4 + $0x410] sm:$0xff] }
 0x17b   :  { %1894 = vmatprep.subr.mxu0 %v1291_v28  ;;  %v1316_v28 = vld [vmem:[#allocation4 + $0x3e0] sm:$0xff] }
 0x17c   :  { %1895 = vmatpush1.msra.mxu0 %v1290_v31  ;;  %v1308_v31 = vld [vmem:[#allocation4 + $0x3a0] sm:$0xff] }
 0x17d   :  { %1896 = vmatprep.subr.mxu0 %v1283_v32  ;;  %v1301_v32 = vld [vmem:[#allocation4 + $0x368] sm:$0xff] }
 0x17e   :  { %1897 = vmatpush1.msra.mxu0 %v1282_v34  ;;  %v1300_v34 = vld [vmem:[#allocation4 + $0x360] sm:$0xff] }
 0x17f   :  { %1898 = vmatprep.subr.mxu0 %v1275_v35  ;;  %v1293_v35 = vld [vmem:[#allocation4 + $0x328] sm:$0xff] }
 0x180   :  { %1899 = vmatpush1.msra.mxu0 %v1274_v36  ;;  %v1292_v36 = vld [vmem:[#allocation4 + $0x320] sm:$0xff] }
 0x181   :  { %1900 = vmatprep.subr.mxu0 %v1267_v37  ;;  %v1285_v37 = vld [vmem:[#allocation4 + $0x2e8] sm:$0xff] }
 0x182   :  { %1901 = vmatpush1.msra.mxu0 %v1266_v38  ;;  %v1284_v38 = vld [vmem:[#allocation4 + $0x2e0] sm:$0xff] }
 0x183   :  { %1902 = vmatprep.subr.mxu0 %v1259_v39  ;;  %v1277_v39 = vld [vmem:[#allocation4 + $0x2a8] sm:$0xff] }
 0x184   :  { %1903 = vmatpush1.msra.mxu0 %v1258_v40  ;;  %v1276_v40 = vld [vmem:[#allocation4 + $0x2a0] sm:$0xff] }
 0x185   :  { %1904 = vmatprep.subr.mxu0 %v1251_v41  ;;  %v1269_v41 = vld [vmem:[#allocation4 + $0x268] sm:$0xff] }
 0x186   :  { %1905 = vmatpush1.msra.mxu0 %v1250_v42  ;;  %v1268_v42 = vld [vmem:[#allocation4 + $0x260] sm:$0xff] }
 0x187   :  { %1906 = vmatprep.subr.mxu0 %v1243_v43  ;;  %v1261_v43 = vld [vmem:[#allocation4 + $0x228] sm:$0xff] }
 0x188   :  { %1907 = vmatpush1.msra.mxu0 %v1242_v45  ;;  %v1260_v45 = vld [vmem:[#allocation4 + $0x220] sm:$0xff] }
 0x189   :  { %1908 = vmatprep.subr.mxu0 %v1235_v46  ;;  %v1253_v46 = vld [vmem:[#allocation4 + $0x1e8] sm:$0xff] }
 0x18a   :  { %1909 = vmatpush1.msra.mxu0 %v1234_v47  ;;  %v1252_v47 = vld [vmem:[#allocation4 + $0x1e0] sm:$0xff] }
 0x18b   :  { %1910 = vmatprep.subr.mxu0 %v1227_v48  ;;  %v1245_v48 = vld [vmem:[#allocation4 + $0x1a8] sm:$0xff] }
 0x18c   :  { %1911 = vmatpush1.msra.mxu0 %v1226_v49  ;;  %v1244_v49 = vld [vmem:[#allocation4 + $0x1a0] sm:$0xff] }
 0x18d   :  { %1912 = vmatprep.subr.mxu0 %v1219_v50  ;;  %v1237_v50 = vld [vmem:[#allocation4 + $0x168] sm:$0xff] }
 0x18e   :  { %1913 = vmatpush1.msra.mxu0 %v1218_v51  ;;  %v1236_v51 = vld [vmem:[#allocation4 + $0x160] sm:$0xff] }
 0x18f   :  { %1914 = vmatprep.subr.mxu0 %v1211_v52  ;;  %v1229_v52 = vld [vmem:[#allocation4 + $0x128] sm:$0xff] }
 0x190   :  { %1915 = vmatpush1.msra.mxu0 %v1210_v53  ;;  %v1228_v53 = vld [vmem:[#allocation4 + $0x120] sm:$0xff] }
 0x191   :  { %1916 = vmatprep.subr.mxu0 %v1203_v55  ;;  %v1221_v55 = vld [vmem:[#allocation4 + $0xe8] sm:$0xff] }
 0x192   :  { %1917 = vmatpush1.msra.mxu0 %v1202_v56  ;;  %v1220_v56 = vld [vmem:[#allocation4 + $0xe0] sm:$0xff] }
 0x193   :  { %1918 = vmatprep.subr.mxu0 %v1195_v57  ;;  %v1213_v57 = vld [vmem:[#allocation4 + $0xa8] sm:$0xff] }
 0x194   :  { %1919 = vmatpush1.msra.mxu0 %v1194_v58  ;;  %v1212_v58 = vld [vmem:[#allocation4 + $0xa0] sm:$0xff] }
 0x195   :  { %1920 = vmatprep.subr.mxu0 %v1443_v59  ;;  %v1205_v59 = vld [vmem:[#allocation4 + $0x68] sm:$0xff] }
 0x196   :  { %1921 = vmatpush2.msra.mxu0 %v1442_v61  ;;  %v1204_v61 = vld [vmem:[#allocation4 + $0x60] sm:$0xff] }
 0x197   :  { %1922 = vmatprep.subr.mxu0 %v1435_v62  ;;  %v1197_v62 = vld [vmem:[#allocation4 + $0x28] sm:$0xff] }
 0x198   :  { %1923 = vmatpush2.msra.mxu0 %v1434_v63  ;;  %v1196_v63 = vld [vmem:[#allocation4 + $0x20] sm:$0xff] }
 0x199   :  { %1924 = vmatprep.subr.mxu0 %v1427_v1  ;;  %v1445_v1 = vld [vmem:[#allocation4 + $0x7e8] sm:$0xff] }
 0x19a   :  { %1925 = vmatpush2.msra.mxu0 %v1426_v10  ;;  %v1444_v10 = vld [vmem:[#allocation4 + $0x7e0] sm:$0xff] }
 0x19b   :  { %1926 = vmatprep.subr.mxu0 %v1419_v2  ;;  %v1437_v2 = vld [vmem:[#allocation4 + $0x7a8] sm:$0xff] }
 0x19c   :  { %1927 = vmatpush2.msra.mxu0 %v1418_v4  ;;  %v1436_v4 = vld [vmem:[#allocation4 + $0x7a0] sm:$0xff] }
 0x19d   :  { %1928 = vmatprep.subr.mxu0 %v1411_v12  ;;  %v1429_v12 = vld [vmem:[#allocation4 + $0x768] sm:$0xff] }
 0x19e   :  { %1929 = vmatpush2.msra.mxu0 %v1410_v5  ;;  %v1428_v5 = vld [vmem:[#allocation4 + $0x760] sm:$0xff] }
 0x19f   :  { %1930 = vmatprep.subr.mxu0 %v1403_v0  ;;  %v1421_v0 = vld [vmem:[#allocation4 + $0x728] sm:$0xff] }
 0x1a0   :  { %1931 = vmatpush2.msra.mxu0 %v1402_v3  ;;  %v1420_v3 = vld [vmem:[#allocation4 + $0x720] sm:$0xff] }
 0x1a1   :  { %1932 = vmatprep.subr.mxu0 %v1395_v6  ;;  %v1413_v6 = vld [vmem:[#allocation4 + $0x6e8] sm:$0xff] }
 0x1a2   :  { %1933 = vmatpush2.msra.mxu0 %v1394_v7  ;;  %v1412_v7 = vld [vmem:[#allocation4 + $0x6e0] sm:$0xff] }
 0x1a3   :  { %1934 = vmatprep.subr.mxu0 %v1387_v8  ;;  %v1405_v8 = vld [vmem:[#allocation4 + $0x6a8] sm:$0xff] }
 0x1a4   :  { %1935 = vmatpush2.msra.mxu0 %v1386_v9  ;;  %v1404_v9 = vld [vmem:[#allocation4 + $0x6a0] sm:$0xff] }
 0x1a5   :  { %1936 = vmatprep.subr.mxu0 %v1379_v11  ;;  %v1397_v11 = vld [vmem:[#allocation4 + $0x668] sm:$0xff] }
 0x1a6   :  { %1937 = vmatpush2.msra.mxu0 %v1378_v30  ;;  %v1396_v30 = vld [vmem:[#allocation4 + $0x660] sm:$0xff] }
 0x1a7   :  { %1938 = vmatprep.subr.mxu0 %v1371_v13  ;;  %v1389_v13 = vld [vmem:[#allocation4 + $0x628] sm:$0xff] }
 0x1a8   :  { %1939 = vmatpush2.msra.mxu0 %v1370_v33  ;;  %v1388_v33 = vld [vmem:[#allocation4 + $0x620] sm:$0xff] }
 0x1a9   :  { %1940 = vmatprep.subr.mxu0 %v1363_v20  ;;  %v1381_v20 = vld [vmem:[#allocation4 + $0x5e8] sm:$0xff] }
 0x1aa   :  { %1941 = vmatpush2.msra.mxu0 %v1362_v25  ;;  %v1380_v25 = vld [vmem:[#allocation4 + $0x5e0] sm:$0xff] }
 0x1ab   :  { %1942 = vmatprep.subr.mxu0 %v1355_v15  ;;  %v1373_v15 = vld [vmem:[#allocation4 + $0x5a8] sm:$0xff] }
 0x1ac   :  { %1943 = vmatpush2.msra.mxu0 %v1354_v17  ;;  %v1372_v17 = vld [vmem:[#allocation4 + $0x5a0] sm:$0xff] }
 0x1ad   :  { %1944 = vmatprep.subr.mxu0 %v1347_v18  ;;  %v1365_v18 = vld [vmem:[#allocation4 + $0x568] sm:$0xff] }
 0x1ae   :  { %1945 = vmatpush2.msra.mxu0 %v1346_v60  ;;  %v1364_v60 = vld [vmem:[#allocation4 + $0x560] sm:$0xff] }
 0x1af   :  { %1946 = vmatprep.subr.mxu0 %v1339_v19  ;;  %v1357_v19 = vld [vmem:[#allocation4 + $0x528] sm:$0xff] }
 0x1b0   :  { %1947 = vmatpush2.msra.mxu0 %v1338_v21  ;;  %v1356_v21 = vld [vmem:[#allocation4 + $0x520] sm:$0xff] }
 0x1b1   :  { %1948 = vmatprep.subr.mxu0 %v1331_v22  ;;  %v970_v22 = vpop.f32.mrf.mxu0 }
 0x1b2   :  { %1949 = vmatpush2.msra.mxu0 %v1330_v23  ;;  %v1041_v23 = vpop.f32.mrf.mxu1 }
 0x1b3   :  { %1950 = vmatprep.subr.mxu0 %v1323_v24  ;;  %v1349_v24 = vld [vmem:[#allocation4 + $0x4e8] sm:$0xff] }
 0x1b4   :  { %1951 = vmatpush2.msra.mxu0 %v1322_v26  ;;  %v1348_v26 = vld [vmem:[#allocation4 + $0x4e0] sm:$0xff] }
 0x1b5   :  { %1953 = vmatmul.mubr.f32.vlgmr.msra.gmra.mxu0 %v2551_v16  ;;  %2030 = vmatprep.subr.mxu0 %v1317_v27  ;;  %v1341_v27 = vld [vmem:[#allocation4 + $0x4a8] sm:$0xff] }
 0x1b6   :  { %2031 = vmatpush1.msra.mxu0 %v1316_v28  ;;  %2094 = vmatprep.mubr.f32.mxu0 %v2549_v14  ;;  %v1340_v28 = vld [vmem:[#allocation4 + $0x4a0] sm:$0xff] }
 0x1b7   :  { %2032 = vmatprep.subr.mxu0 %v1309_v29  ;;  %v972_v29 = vpop.f32.mrf.mxu0 }
 0x1b8   :  { %2033 = vmatpush1.msra.mxu0 %v1308_v31  ;;  %v1043_v31 = vpop.f32.mrf.mxu1 }
 0x1b9   :  { %2034 = vmatprep.subr.mxu0 %v1301_v32  ;;  %v1333_v32 = vld [vmem:[#allocation4 + $0x468] sm:$0xff] }
 0x1ba   :  { %2035 = vmatpush1.msra.mxu0 %v1300_v34  ;;  %v1042_v34 = vadd.f32 %v1041_v23, %v970_v22  ;;  %v1506_v22 = vld [vmem:[#allocation4 + $0x9d0] sm:$0xff] }
 0x1bb   :  { %2036 = vmatprep.subr.mxu0 %v1293_v35  ;;  %v1332_v35 = vld [vmem:[#allocation4 + $0x460] sm:$0xff]  ;;  %v1238_v23 = vld [vmem:[#allocation4 + $0x170] sm:$0xff] }
 0x1bc   :  { %2037 = vmatpush1.msra.mxu0 %v1292_v36 }
 0x1bd   :  { %2038 = vmatprep.subr.mxu0 %v1285_v37 }
 0x1be   :  { %2039 = vmatpush1.msra.mxu0 %v1284_v38  ;;  %v1325_v38 = vld [vmem:[#allocation4 + $0x428] sm:$0xff] }
 0x1bf   :  { %2040 = vmatprep.subr.mxu0 %v1277_v39  ;;  %v1044_v39 = vadd.f32 %v1043_v31, %v972_v29  ;;  %v1491_v29 = vld [vmem:[#allocation4 + $0x958] sm:$0xff] }
 0x1c0   :  { %2041 = vmatpush1.msra.mxu0 %v1276_v40  ;;  %v1223_v31 = vld [vmem:[#allocation4 + $0xf8] sm:$0xff] }
 0x1c1   :  { %2042 = vmatprep.subr.mxu0 %v1269_v41  ;;  %v1324_v41 = vld [vmem:[#allocation4 + $0x420] sm:$0xff] }
 0x1c2   :  { %2043 = vmatpush1.msra.mxu0 %v1268_v42 }
 0x1c3   :  { %2044 = vmatprep.subr.mxu0 %v1261_v43  ;;  %v1319_v43 = vld [vmem:[#allocation4 + $0x3f8] sm:$0xff] }
 0x1c4   :  { %2045 = vmatpush1.msra.mxu0 %v1260_v45 }
 0x1c5   :  { %2046 = vmatprep.subr.mxu0 %v1253_v46  ;;  %v1318_v46 = vld [vmem:[#allocation4 + $0x3f0] sm:$0xff] }
 0x1c6   :  { %2047 = vmatpush1.msra.mxu0 %v1252_v47 }
 0x1c7   :  { %2048 = vmatprep.subr.mxu0 %v1245_v48 }
 0x1c8   :  { %2049 = vmatpush1.msra.mxu0 %v1244_v49  ;;  %v1311_v49 = vld [vmem:[#allocation4 + $0x3b8] sm:$0xff] }
 0x1c9   :  { %2050 = vmatprep.subr.mxu0 %v1237_v50 }
 0x1ca   :  { %2051 = vmatpush1.msra.mxu0 %v1236_v51  ;;  %v1310_v51 = vld [vmem:[#allocation4 + $0x3b0] sm:$0xff] }
 0x1cb   :  { %2052 = vmatprep.subr.mxu0 %v1229_v52  ;;  %v1303_v52 = vld [vmem:[#allocation4 + $0x378] sm:$0xff] }
 0x1cc   :  { %2053 = vmatpush1.msra.mxu0 %v1228_v53 }
 0x1cd   :  { %2054 = vmatprep.subr.mxu0 %v1221_v55  ;;  %v1302_v55 = vld [vmem:[#allocation4 + $0x370] sm:$0xff] }
 0x1ce   :  { %2055 = vmatpush1.msra.mxu0 %v1220_v56 }
 0x1cf   :  { %2056 = vmatprep.subr.mxu0 %v1213_v57  ;;  %v1570_v57 = vld [vmem:[#allocation4 + $0xbd0] sm:$0xff] }
 0x1d0   :  { %2057 = vmatpush1.msra.mxu0 %v1212_v58  ;;  %v1563_v58 = vld [vmem:[#allocation4 + $0xb98] sm:$0xff] }
 0x1d1   :  { %2058 = vmatprep.subr.mxu0 %v1205_v59  ;;  %v1295_v59 = vld [vmem:[#allocation4 + $0x338] sm:$0xff] }
 0x1d2   :  { %2059 = vmatpush1.msra.mxu0 %v1204_v61  ;;  %v1562_v61 = vld [vmem:[#allocation4 + $0xb90] sm:$0xff] }
 0x1d3   :  { %2060 = vmatprep.subr.mxu0 %v1197_v62  ;;  %v1294_v62 = vld [vmem:[#allocation4 + $0x330] sm:$0xff] }
 0x1d4   :  { %2061 = vmatpush1.msra.mxu0 %v1196_v63  ;;  %v1287_v63 = vld [vmem:[#allocation4 + $0x2f8] sm:$0xff] }
 0x1d5   :  { %2062 = vmatprep.subr.mxu0 %v1445_v1  ;;  %v1554_v1 = vld [vmem:[#allocation4 + $0xb50] sm:$0xff] }
 0x1d6   :  { %2063 = vmatpush2.msra.mxu0 %v1444_v10  ;;  %v1286_v10 = vld [vmem:[#allocation4 + $0x2f0] sm:$0xff] }
 0x1d7   :  { %2064 = vmatprep.subr.mxu0 %v1437_v2  ;;  %v1547_v2 = vld [vmem:[#allocation4 + $0xb18] sm:$0xff] }
 0x1d8   :  { %2065 = vmatpush2.msra.mxu0 %v1436_v4  ;;  %v1279_v4 = vld [vmem:[#allocation4 + $0x2b8] sm:$0xff] }
 0x1d9   :  { %2066 = vmatprep.subr.mxu0 %v1429_v12  ;;  %v1546_v12 = vld [vmem:[#allocation4 + $0xb10] sm:$0xff] }
 0x1da   :  { %2067 = vmatpush2.msra.mxu0 %v1428_v5  ;;  %v1278_v5 = vld [vmem:[#allocation4 + $0x2b0] sm:$0xff] }
 0x1db   :  { %2068 = vmatprep.subr.mxu0 %v1421_v0  ;;  %v1539_v0 = vld [vmem:[#allocation4 + $0xad8] sm:$0xff] }
 0x1dc   :  { %2069 = vmatpush2.msra.mxu0 %v1420_v3  ;;  %v1271_v3 = vld [vmem:[#allocation4 + $0x278] sm:$0xff] }
 0x1dd   :  { %2070 = vmatprep.subr.mxu0 %v1413_v6  ;;  %v1538_v6 = vld [vmem:[#allocation4 + $0xad0] sm:$0xff] }
 0x1de   :  { %2071 = vmatpush2.msra.mxu0 %v1412_v7  ;;  %v1270_v7 = vld [vmem:[#allocation4 + $0x270] sm:$0xff] }
 0x1df   :  { %2072 = vmatprep.subr.mxu0 %v1405_v8  ;;  %v1531_v8 = vld [vmem:[#allocation4 + $0xa98] sm:$0xff] }
 0x1e0   :  { %2073 = vmatpush2.msra.mxu0 %v1404_v9  ;;  %v1263_v9 = vld [vmem:[#allocation4 + $0x238] sm:$0xff] }
 0x1e1   :  { %2074 = vmatprep.subr.mxu0 %v1397_v11  ;;  %v1530_v11 = vld [vmem:[#allocation4 + $0xa90] sm:$0xff] }
 0x1e2   :  { %2075 = vmatpush2.msra.mxu0 %v1396_v30  ;;  %v1262_v30 = vld [vmem:[#allocation4 + $0x230] sm:$0xff] }
 0x1e3   :  { %2076 = vmatprep.subr.mxu0 %v1389_v13  ;;  %v1523_v13 = vld [vmem:[#allocation4 + $0xa58] sm:$0xff] }
 0x1e4   :  { %2077 = vmatpush2.msra.mxu0 %v1388_v33  ;;  %v1255_v33 = vld [vmem:[#allocation4 + $0x1f8] sm:$0xff] }
 0x1e5   :  { %2078 = vmatprep.subr.mxu0 %v1381_v20  ;;  %v1522_v20 = vld [vmem:[#allocation4 + $0xa50] sm:$0xff] }
 0x1e6   :  { %2079 = vmatpush2.msra.mxu0 %v1380_v25  ;;  %v1254_v25 = vld [vmem:[#allocation4 + $0x1f0] sm:$0xff] }
 0x1e7   :  { %2080 = vmatprep.subr.mxu0 %v1373_v15  ;;  %v1515_v15 = vld [vmem:[#allocation4 + $0xa18] sm:$0xff] }
 0x1e8   :  { %2081 = vmatpush2.msra.mxu0 %v1372_v17  ;;  %v1247_v17 = vld [vmem:[#allocation4 + $0x1b8] sm:$0xff] }
 0x1e9   :  { %2082 = vmatprep.subr.mxu0 %v1365_v18  ;;  %v1514_v18 = vld [vmem:[#allocation4 + $0xa10] sm:$0xff] }
 0x1ea   :  { %2083 = vmatpush2.msra.mxu0 %v1364_v60  ;;  %v1246_v60 = vld [vmem:[#allocation4 + $0x1b0] sm:$0xff] }
 0x1eb   :  { %2084 = vmatprep.subr.mxu0 %v1357_v19  ;;  %v1507_v19 = vld [vmem:[#allocation4 + $0x9d8] sm:$0xff] }
 0x1ec   :  { %2085 = vmatpush2.msra.mxu0 %v1356_v21  ;;  %v1239_v21 = vld [vmem:[#allocation4 + $0x178] sm:$0xff] }
 0x1ed   :  { %2086 = vmatprep.subr.mxu0 %v1349_v24  ;;  %v1499_v24 = vld [vmem:[#allocation4 + $0x998] sm:$0xff] }
 0x1ee   :  { %2087 = vmatpush2.msra.mxu0 %v1348_v26  ;;  %v1231_v26 = vld [vmem:[#allocation4 + $0x138] sm:$0xff] }
 0x1ef   :  { %2088 = vmatprep.subr.mxu0 %v1341_v27  ;;  %v1112_v36 = vpop.f32.mrf.mxu0  ;;  %v1498_v27 = vld [vmem:[#allocation4 + $0x990] sm:$0xff] }
 0x1f0   :  { %v1183_v37 = vpop.f32.mrf.mxu1  ;;  %2089 = vmatpush2.msra.mxu0 %v1340_v28  ;;  %v1113_v40 = vadd.f32 %v1112_v36, %v1042_v34  ;;  %v1230_v28 = vld [vmem:[#allocation4 + $0x130] sm:$0xff]  ;;  %v1215_v36 = vld [vmem:[#allocation4 + $0xb8] sm:$0xff] }
 0x1f1   :  { %2090 = vmatprep.subr.mxu0 %v1333_v32  ;;  %v1114_v42 = vpop.f32.mrf.mxu0  ;;  %v1490_v32 = vld [vmem:[#allocation4 + $0x950] sm:$0xff] }
 0x1f2   :  { %2091 = vmatpush2.msra.mxu0 %v1332_v35  ;;  %v1115_v45 = vadd.f32 %v1114_v42, %v1044_v39  ;;  %v1184_v47 = vadd.f32 %v1183_v37, %v1113_v40  ;;  %v1185_v48 = vpop.f32.mrf.mxu1  ;;  %v1222_v34 = vld [vmem:[#allocation4 + $0xf0] sm:$0xff]  ;;  %v1483_v35 = vld [vmem:[#allocation4 + $0x918] sm:$0xff] }
 0x1f3   :  { %2092 = vmatprep.subr.mxu0 %v1325_v38  ;;  %v1482_v37 = vld [vmem:[#allocation4 + $0x910] sm:$0xff]  ;;  %v1475_v39 = vld [vmem:[#allocation4 + $0x8d8] sm:$0xff] }
 0x1f4   :  { %2093 = vmatpush2.msra.mxu0 %v1324_v41  ;;  %v1186_v50 = vadd.f32 %v1185_v48, %v1115_v45  ;;  %v2562_v56 = vmax.f32 %v1184_v47, 0.0  ;;  %v1214_v38 = vld [vmem:[#allocation4 + $0xb0] sm:$0xff]  ;;  %v1207_v40 = vld [vmem:[#allocation4 + $0x78] sm:$0xff] }
 0x1f5   :  { %2095 = vmatmul.mubr.f32.vlgmr.msra.gmra.mxu0 %v2551_v16  ;;  %2172 = vmatprep.subr.mxu0 %v1319_v43  ;;  %v1474_v41 = vld [vmem:[#allocation4 + $0x8d0] sm:$0xff]  ;;  %v1467_v43 = vld [vmem:[#allocation4 + $0x898] sm:$0xff] }
 0x1f6   :  { %2173 = vmatpush1.msra.mxu0 %v1318_v46  ;;  %2236 = vmatprep.mubr.f32.mxu0 %v2549_v14  ;;  %v2560_v53 = vmax.f32 %v1186_v50, 0.0  ;;  %v1555_v14 = vld [vmem:[#allocation4 + $0xb58] sm:$0xff]  ;;  %v1206_v42 = vld [vmem:[#allocation4 + $0x70] sm:$0xff] }
 0x1f7   :  { %2174 = vmatprep.subr.mxu0 %v1311_v49  ;;  %v1199_v45 = vld [vmem:[#allocation4 + $0x38] sm:$0xff]  ;;  %v1466_v46 = vld [vmem:[#allocation4 + $0x890] sm:$0xff] }
 0x1f8   :  { %2175 = vmatpush1.msra.mxu0 %v1310_v51  ;;  %1881 = vmatprep.mubr.f32.mxu1 %v2560_v53  ;;  %v1198_v47 = vld [vmem:[#allocation4 + $0x30] sm:$0xff]  ;;  %v1459_v48 = vld [vmem:[#allocation4 + $0x858] sm:$0xff] }
 0x1f9   :  { %2176 = vmatprep.subr.mxu0 %v1303_v52  ;;  %1882 = vmatmul.mubr.f32.vlgmr.msra.gmra.mxu1 %v2562_v56  ;;  %v1447_v49 = vld [vmem:[#allocation4 + $0x7f8] sm:$0xff]  ;;  %v1458_v50 = vld [vmem:[#allocation4 + $0x850] sm:$0xff] }
 0x1fa   :  { %2177 = vmatpush1.msra.mxu0 %v1302_v55  ;;  %1960 = vmatpush1.msra.mxu1 %v1570_v57  ;;  %v1446_v51 = vld [vmem:[#allocation4 + $0x7f0] sm:$0xff]  ;;  %v1451_v52 = vld [vmem:[#allocation4 + $0x818] sm:$0xff] }
 0x1fb   :  { %2023 = vmatprep.mubr.f32.mxu1 %v2560_v53  ;;  %1961 = vmatprep.subr.mxu1 %v1563_v58  ;;  %v1439_v55 = vld [vmem:[#allocation4 + $0x7b8] sm:$0xff]  ;;  %v1450_v57 = vld [vmem:[#allocation4 + $0x810] sm:$0xff] }
 0x1fc   :  { %2178 = vmatprep.subr.mxu0 %v1295_v59  ;;  %1962 = vmatpush1.msra.mxu1 %v1562_v61  ;;  %v1438_v58 = vld [vmem:[#allocation4 + $0x7b0] sm:$0xff]  ;;  %v1699_v59 = vld [vmem:[#allocation4 + $0xfd8] sm:$0xff] }
 0x1fd   :  { %2179 = vmatpush1.msra.mxu0 %v1294_v62  ;;  %1963 = vmatprep.subr.mxu1 %v1555_v14  ;;  %v1431_v61 = vld [vmem:[#allocation4 + $0x778] sm:$0xff]  ;;  %v1698_v62 = vld [vmem:[#allocation4 + $0xfd0] sm:$0xff] }
 0x1fe   :  { %2180 = vmatprep.subr.mxu0 %v1287_v63  ;;  %1964 = vmatpush1.msra.mxu1 %v1554_v1  ;;  %v1430_v14 = vld [vmem:[#allocation4 + $0x770] sm:$0xff]  ;;  %v1691_v63 = vld [vmem:[#allocation4 + $0xf98] sm:$0xff] }
 0x1ff   :  { %2181 = vmatpush1.msra.mxu0 %v1286_v10  ;;  %1965 = vmatprep.subr.mxu1 %v1547_v2  ;;  %v1423_v1 = vld [vmem:[#allocation4 + $0x738] sm:$0xff]  ;;  %v1690_v10 = vld [vmem:[#allocation4 + $0xf90] sm:$0xff] }
 0x200   :  { %2182 = vmatprep.subr.mxu0 %v1279_v4  ;;  %1966 = vmatpush1.msra.mxu1 %v1546_v12  ;;  %v1422_v2 = vld [vmem:[#allocation4 + $0x730] sm:$0xff]  ;;  %v1683_v4 = vld [vmem:[#allocation4 + $0xf58] sm:$0xff] }
 0x201   :  { %2183 = vmatpush1.msra.mxu0 %v1278_v5  ;;  %1967 = vmatprep.subr.mxu1 %v1539_v0  ;;  %v1415_v12 = vld [vmem:[#allocation4 + $0x6f8] sm:$0xff]  ;;  %v1682_v5 = vld [vmem:[#allocation4 + $0xf50] sm:$0xff] }
 0x202   :  { %2184 = vmatprep.subr.mxu0 %v1271_v3  ;;  %1968 = vmatpush1.msra.mxu1 %v1538_v6  ;;  %v1414_v0 = vld [vmem:[#allocation4 + $0x6f0] sm:$0xff]  ;;  %v1675_v3 = vld [vmem:[#allocation4 + $0xf18] sm:$0xff] }
 0x203   :  { %2185 = vmatpush1.msra.mxu0 %v1270_v7  ;;  %1969 = vmatprep.subr.mxu1 %v1531_v8  ;;  %v1407_v6 = vld [vmem:[#allocation4 + $0x6b8] sm:$0xff]  ;;  %v1674_v7 = vld [vmem:[#allocation4 + $0xf10] sm:$0xff] }
 0x204   :  { %2186 = vmatprep.subr.mxu0 %v1263_v9  ;;  %1970 = vmatpush1.msra.mxu1 %v1530_v11  ;;  %v1406_v8 = vld [vmem:[#allocation4 + $0x6b0] sm:$0xff]  ;;  %v1667_v9 = vld [vmem:[#allocation4 + $0xed8] sm:$0xff] }
 0x205   :  { %2187 = vmatpush1.msra.mxu0 %v1262_v30  ;;  %1971 = vmatprep.subr.mxu1 %v1523_v13  ;;  %v1399_v11 = vld [vmem:[#allocation4 + $0x678] sm:$0xff]  ;;  %v1666_v30 = vld [vmem:[#allocation4 + $0xed0] sm:$0xff] }
 0x206   :  { %2188 = vmatprep.subr.mxu0 %v1255_v33  ;;  %1972 = vmatpush1.msra.mxu1 %v1522_v20  ;;  %v1398_v13 = vld [vmem:[#allocation4 + $0x670] sm:$0xff]  ;;  %v1659_v33 = vld [vmem:[#allocation4 + $0xe98] sm:$0xff] }
 0x207   :  { %2189 = vmatpush1.msra.mxu0 %v1254_v25  ;;  %1973 = vmatprep.subr.mxu1 %v1515_v15  ;;  %v1391_v20 = vld [vmem:[#allocation4 + $0x638] sm:$0xff]  ;;  %v1658_v25 = vld [vmem:[#allocation4 + $0xe90] sm:$0xff] }
 0x208   :  { %2190 = vmatprep.subr.mxu0 %v1247_v17  ;;  %1974 = vmatpush1.msra.mxu1 %v1514_v18  ;;  %v1390_v15 = vld [vmem:[#allocation4 + $0x630] sm:$0xff]  ;;  %v1651_v17 = vld [vmem:[#allocation4 + $0xe58] sm:$0xff] }
 0x209   :  { %2191 = vmatpush1.msra.mxu0 %v1246_v60  ;;  %1975 = vmatprep.subr.mxu1 %v1507_v19  ;;  %v1383_v18 = vld [vmem:[#allocation4 + $0x5f8] sm:$0xff]  ;;  %v1650_v60 = vld [vmem:[#allocation4 + $0xe50] sm:$0xff] }
 0x20a   :  { %2192 = vmatprep.subr.mxu0 %v1239_v21  ;;  %1976 = vmatpush1.msra.mxu1 %v1506_v22  ;;  %v1382_v19 = vld [vmem:[#allocation4 + $0x5f0] sm:$0xff]  ;;  %v1643_v21 = vld [vmem:[#allocation4 + $0xe18] sm:$0xff] }
 0x20b   :  { %2193 = vmatpush1.msra.mxu0 %v1238_v23  ;;  %1977 = vmatprep.subr.mxu1 %v1499_v24  ;;  %v1375_v22 = vld [vmem:[#allocation4 + $0x5b8] sm:$0xff]  ;;  %v1642_v23 = vld [vmem:[#allocation4 + $0xe10] sm:$0xff] }
 0x20c   :  { %2194 = vmatprep.subr.mxu0 %v1231_v26  ;;  %1978 = vmatpush1.msra.mxu1 %v1498_v27  ;;  %v1374_v24 = vld [vmem:[#allocation4 + $0x5b0] sm:$0xff]  ;;  %v1635_v26 = vld [vmem:[#allocation4 + $0xdd8] sm:$0xff] }
 0x20d   :  { %2195 = vmatpush1.msra.mxu0 %v1230_v28  ;;  %1979 = vmatprep.subr.mxu1 %v1491_v29  ;;  %v1367_v27 = vld [vmem:[#allocation4 + $0x578] sm:$0xff]  ;;  %v1634_v28 = vld [vmem:[#allocation4 + $0xdd0] sm:$0xff] }
 0x20e   :  { %2196 = vmatprep.subr.mxu0 %v1223_v31  ;;  %1980 = vmatpush1.msra.mxu1 %v1490_v32  ;;  %v1366_v29 = vld [vmem:[#allocation4 + $0x570] sm:$0xff]  ;;  %v1627_v31 = vld [vmem:[#allocation4 + $0xd98] sm:$0xff] }
 0x20f   :  { %2197 = vmatpush1.msra.mxu0 %v1222_v34  ;;  %1981 = vmatprep.subr.mxu1 %v1483_v35  ;;  %v1359_v32 = vld [vmem:[#allocation4 + $0x538] sm:$0xff]  ;;  %v1626_v34 = vld [vmem:[#allocation4 + $0xd90] sm:$0xff] }
 0x210   :  { %2198 = vmatprep.subr.mxu0 %v1215_v36  ;;  %1982 = vmatpush1.msra.mxu1 %v1482_v37  ;;  %v1358_v35 = vld [vmem:[#allocation4 + $0x530] sm:$0xff]  ;;  %v1619_v36 = vld [vmem:[#allocation4 + $0xd58] sm:$0xff] }
 0x211   :  { %2199 = vmatpush1.msra.mxu0 %v1214_v38  ;;  %1983 = vmatprep.subr.mxu1 %v1475_v39  ;;  %v1351_v37 = vld [vmem:[#allocation4 + $0x4f8] sm:$0xff]  ;;  %v1618_v38 = vld [vmem:[#allocation4 + $0xd50] sm:$0xff] }
 0x212   :  { %2200 = vmatprep.subr.mxu0 %v1207_v40  ;;  %1984 = vmatpush1.msra.mxu1 %v1474_v41  ;;  %v1350_v39 = vld [vmem:[#allocation4 + $0x4f0] sm:$0xff]  ;;  %v1611_v40 = vld [vmem:[#allocation4 + $0xd18] sm:$0xff] }
 0x213   :  { %2201 = vmatpush1.msra.mxu0 %v1206_v42  ;;  %1985 = vmatprep.subr.mxu1 %v1467_v43  ;;  %v1343_v41 = vld [vmem:[#allocation4 + $0x4b8] sm:$0xff]  ;;  %v1610_v42 = vld [vmem:[#allocation4 + $0xd10] sm:$0xff] }
 0x214   :  { %2202 = vmatprep.subr.mxu0 %v1199_v45  ;;  %1986 = vmatpush1.msra.mxu1 %v1466_v46  ;;  %v1342_v43 = vld [vmem:[#allocation4 + $0x4b0] sm:$0xff]  ;;  %v1603_v45 = vld [vmem:[#allocation4 + $0xcd8] sm:$0xff] }
 0x215   :  { %2203 = vmatpush1.msra.mxu0 %v1198_v47  ;;  %1987 = vmatprep.subr.mxu1 %v1459_v48  ;;  %v1335_v46 = vld [vmem:[#allocation4 + $0x478] sm:$0xff]  ;;  %v1602_v47 = vld [vmem:[#allocation4 + $0xcd0] sm:$0xff] }
 0x216   :  { %2204 = vmatprep.subr.mxu0 %v1447_v49  ;;  %1988 = vmatpush1.msra.mxu1 %v1458_v50  ;;  %v1334_v48 = vld [vmem:[#allocation4 + $0x470] sm:$0xff]  ;;  %v1595_v49 = vld [vmem:[#allocation4 + $0xc98] sm:$0xff] }
 0x217   :  { %2205 = vmatpush2.msra.mxu0 %v1446_v51  ;;  %1989 = vmatprep.subr.mxu1 %v1451_v52  ;;  %v1327_v50 = vld [vmem:[#allocation4 + $0x438] sm:$0xff]  ;;  %v1594_v51 = vld [vmem:[#allocation4 + $0xc90] sm:$0xff] }
 0x218   :  { %2206 = vmatprep.subr.mxu0 %v1439_v55  ;;  %1990 = vmatpush1.msra.mxu1 %v1450_v57  ;;  %v1326_v52 = vld [vmem:[#allocation4 + $0x430] sm:$0xff]  ;;  %v1587_v55 = vld [vmem:[#allocation4 + $0xc58] sm:$0xff] }
 0x219   :  { %2207 = vmatpush2.msra.mxu0 %v1438_v58  ;;  %1991 = vmatprep.subr.mxu1 %v1699_v59  ;;  %v1586_v57 = vld [vmem:[#allocation4 + $0xc50] sm:$0xff]  ;;  %v1579_v58 = vld [vmem:[#allocation4 + $0xc18] sm:$0xff] }
 0x21a   :  { %2208 = vmatprep.subr.mxu0 %v1431_v61  ;;  %1992 = vmatpush2.msra.mxu1 %v1698_v62  ;;  %v1578_v59 = vld [vmem:[#allocation4 + $0xc10] sm:$0xff]  ;;  %v1573_v61 = vld [vmem:[#allocation4 + $0xbe8] sm:$0xff]  ;;  %v1572_v62 = vld [vmem:[#allocation4 + $0xbe0] sm:$0xff] }
 0x21b   :  { %2209 = vmatpush2.msra.mxu0 %v1430_v14  ;;  %1993 = vmatprep.subr.mxu1 %v1691_v63  ;;  %v1565_v14 = vld [vmem:[#allocation4 + $0xba8] sm:$0xff]  ;;  %v1564_v63 = vld [vmem:[#allocation4 + $0xba0] sm:$0xff] }
 0x21c   :  { %2210 = vmatprep.subr.mxu0 %v1423_v1  ;;  %1994 = vmatpush2.msra.mxu1 %v1690_v10  ;;  %v1557_v1 = vld [vmem:[#allocation4 + $0xb68] sm:$0xff]  ;;  %v1556_v10 = vld [vmem:[#allocation4 + $0xb60] sm:$0xff] }
 0x21d   :  { %2211 = vmatpush2.msra.mxu0 %v1422_v2  ;;  %1995 = vmatprep.subr.mxu1 %v1683_v4  ;;  %v1549_v2 = vld [vmem:[#allocation4 + $0xb28] sm:$0xff] }
 0x21e   :  { %2212 = vmatprep.subr.mxu0 %v1415_v12  ;;  %1996 = vmatpush2.msra.mxu1 %v1682_v5  ;;  %v1541_v4 = vld [vmem:[#allocation4 + $0xae8] sm:$0xff]  ;;  %v1540_v12 = vld [vmem:[#allocation4 + $0xae0] sm:$0xff] }
 0x21f   :  { %2213 = vmatpush2.msra.mxu0 %v1414_v0  ;;  %1997 = vmatprep.subr.mxu1 %v1675_v3  ;;  %v1533_v5 = vld [vmem:[#allocation4 + $0xaa8] sm:$0xff]  ;;  %v1532_v0 = vld [vmem:[#allocation4 + $0xaa0] sm:$0xff] }
 0x220   :  { %2214 = vmatprep.subr.mxu0 %v1407_v6  ;;  %1998 = vmatpush2.msra.mxu1 %v1674_v7  ;;  %v1525_v3 = vld [vmem:[#allocation4 + $0xa68] sm:$0xff]  ;;  %v1524_v6 = vld [vmem:[#allocation4 + $0xa60] sm:$0xff] }
 0x221   :  { %2215 = vmatpush2.msra.mxu0 %v1406_v8  ;;  %1999 = vmatprep.subr.mxu1 %v1667_v9  ;;  %v1517_v7 = vld [vmem:[#allocation4 + $0xa28] sm:$0xff]  ;;  %v1516_v8 = vld [vmem:[#allocation4 + $0xa20] sm:$0xff] }
 0x222   :  { %2216 = vmatprep.subr.mxu0 %v1399_v11  ;;  %2000 = vmatpush2.msra.mxu1 %v1666_v30  ;;  %v1509_v9 = vld [vmem:[#allocation4 + $0x9e8] sm:$0xff]  ;;  %v1508_v11 = vld [vmem:[#allocation4 + $0x9e0] sm:$0xff] }
 0x223   :  { %2217 = vmatpush2.msra.mxu0 %v1398_v13  ;;  %2001 = vmatprep.subr.mxu1 %v1659_v33  ;;  %v1501_v30 = vld [vmem:[#allocation4 + $0x9a8] sm:$0xff]  ;;  %v1500_v13 = vld [vmem:[#allocation4 + $0x9a0] sm:$0xff] }
 0x224   :  { %2218 = vmatprep.subr.mxu0 %v1391_v20  ;;  %2002 = vmatpush2.msra.mxu1 %v1658_v25  ;;  %v1493_v33 = vld [vmem:[#allocation4 + $0x968] sm:$0xff]  ;;  %v1492_v20 = vld [vmem:[#allocation4 + $0x960] sm:$0xff] }
 0x225   :  { %2219 = vmatpush2.msra.mxu0 %v1390_v15  ;;  %2003 = vmatprep.subr.mxu1 %v1651_v17  ;;  %v1485_v25 = vld [vmem:[#allocation4 + $0x928] sm:$0xff]  ;;  %v1484_v15 = vld [vmem:[#allocation4 + $0x920] sm:$0xff] }
 0x226   :  { %2220 = vmatprep.subr.mxu0 %v1383_v18  ;;  %2004 = vmatpush2.msra.mxu1 %v1650_v60  ;;  %v1477_v17 = vld [vmem:[#allocation4 + $0x8e8] sm:$0xff]  ;;  %v1476_v18 = vld [vmem:[#allocation4 + $0x8e0] sm:$0xff] }
 0x227   :  { %2221 = vmatpush2.msra.mxu0 %v1382_v19  ;;  %2005 = vmatprep.subr.mxu1 %v1643_v21  ;;  %v1469_v60 = vld [vmem:[#allocation4 + $0x8a8] sm:$0xff]  ;;  %v1468_v19 = vld [vmem:[#allocation4 + $0x8a0] sm:$0xff] }
 0x228   :  { %2222 = vmatprep.subr.mxu0 %v1375_v22  ;;  %2006 = vmatpush2.msra.mxu1 %v1642_v23  ;;  %v1461_v21 = vld [vmem:[#allocation4 + $0x868] sm:$0xff]  ;;  %v1460_v22 = vld [vmem:[#allocation4 + $0x860] sm:$0xff] }
 0x229   :  { %2223 = vmatpush2.msra.mxu0 %v1374_v24  ;;  %2007 = vmatprep.subr.mxu1 %v1635_v26  ;;  %v1453_v23 = vld [vmem:[#allocation4 + $0x828] sm:$0xff]  ;;  %v1452_v24 = vld [vmem:[#allocation4 + $0x820] sm:$0xff] }
 0x22a   :  { %2224 = vmatprep.subr.mxu0 %v1367_v27  ;;  %2008 = vmatpush2.msra.mxu1 %v1634_v28  ;;  %v1701_v26 = vld [vmem:[#allocation4 + $0xfe8] sm:$0xff]  ;;  %v1700_v27 = vld [vmem:[#allocation4 + $0xfe0] sm:$0xff] }
 0x22b   :  { %2225 = vmatpush2.msra.mxu0 %v1366_v29  ;;  %2009 = vmatprep.subr.mxu1 %v1627_v31  ;;  %v1693_v28 = vld [vmem:[#allocation4 + $0xfa8] sm:$0xff]  ;;  %v1692_v29 = vld [vmem:[#allocation4 + $0xfa0] sm:$0xff] }
 0x22c   :  { %2226 = vmatprep.subr.mxu0 %v1359_v32  ;;  %2010 = vmatpush2.msra.mxu1 %v1626_v34  ;;  %v1685_v31 = vld [vmem:[#allocation4 + $0xf68] sm:$0xff]  ;;  %v1684_v32 = vld [vmem:[#allocation4 + $0xf60] sm:$0xff] }
 0x22d   :  { %2227 = vmatpush2.msra.mxu0 %v1358_v35  ;;  %2011 = vmatprep.subr.mxu1 %v1619_v36  ;;  %v1677_v34 = vld [vmem:[#allocation4 + $0xf28] sm:$0xff]  ;;  %v1676_v35 = vld [vmem:[#allocation4 + $0xf20] sm:$0xff] }
 0x22e   :  { %2228 = vmatprep.subr.mxu0 %v1351_v37  ;;  %2012 = vmatpush2.msra.mxu1 %v1618_v38  ;;  %v1669_v36 = vld [vmem:[#allocation4 + $0xee8] sm:$0xff]  ;;  %v1668_v37 = vld [vmem:[#allocation4 + $0xee0] sm:$0xff] }
 0x22f   :  { %2229 = vmatpush2.msra.mxu0 %v1350_v39  ;;  %2013 = vmatprep.subr.mxu1 %v1611_v40  ;;  %v1661_v38 = vld [vmem:[#allocation4 + $0xea8] sm:$0xff]  ;;  %v1660_v39 = vld [vmem:[#allocation4 + $0xea0] sm:$0xff] }
 0x230   :  { %2230 = vmatprep.subr.mxu0 %v1343_v41  ;;  %2014 = vmatpush2.msra.mxu1 %v1610_v42  ;;  %v1653_v40 = vld [vmem:[#allocation4 + $0xe68] sm:$0xff]  ;;  %v1652_v41 = vld [vmem:[#allocation4 + $0xe60] sm:$0xff] }
 0x231   :  { %2231 = vmatpush2.msra.mxu0 %v1342_v43  ;;  %2015 = vmatprep.subr.mxu1 %v1603_v45  ;;  %v1645_v42 = vld [vmem:[#allocation4 + $0xe28] sm:$0xff]  ;;  %v1644_v43 = vld [vmem:[#allocation4 + $0xe20] sm:$0xff] }
 0x232   :  { %2232 = vmatprep.subr.mxu0 %v1335_v46  ;;  %2016 = vmatpush2.msra.mxu1 %v1602_v47  ;;  %v1637_v45 = vld [vmem:[#allocation4 + $0xde8] sm:$0xff]  ;;  %v1636_v46 = vld [vmem:[#allocation4 + $0xde0] sm:$0xff] }
 0x233   :  { %2233 = vmatpush2.msra.mxu0 %v1334_v48  ;;  %2017 = vmatprep.subr.mxu1 %v1595_v49  ;;  %v1629_v47 = vld [vmem:[#allocation4 + $0xda8] sm:$0xff]  ;;  %v1628_v48 = vld [vmem:[#allocation4 + $0xda0] sm:$0xff] }
 0x234   :  { %2234 = vmatprep.subr.mxu0 %v1327_v50  ;;  %2018 = vmatpush2.msra.mxu1 %v1594_v51  ;;  %v1621_v49 = vld [vmem:[#allocation4 + $0xd68] sm:$0xff]  ;;  %v1620_v50 = vld [vmem:[#allocation4 + $0xd60] sm:$0xff] }
 0x235   :  { %2235 = vmatpush2.msra.mxu0 %v1326_v52  ;;  %2019 = vmatprep.subr.mxu1 %v1587_v55  ;;  %v1613_v51 = vld [vmem:[#allocation4 + $0xd28] sm:$0xff]  ;;  %v1612_v52 = vld [vmem:[#allocation4 + $0xd20] sm:$0xff] }
 0x236   :  { %2237 = vmatmul.mubr.f32.vlgmr.msra.gmra.mxu0 %v2551_v16  ;;  %2020 = vmatpush2.msra.mxu1 %v1586_v57  ;;  %v1548_v16 = vld [vmem:[#allocation4 + $0xb20] sm:$0xff]  ;;  %v1605_v55 = vld [vmem:[#allocation4 + $0xce8] sm:$0xff] }
 0x237   :  { %2021 = vmatprep.subr.mxu1 %v1579_v58  ;;  %v1604_v57 = vld [vmem:[#allocation4 + $0xce0] sm:$0xff]  ;;  %v1597_v58 = vld [vmem:[#allocation4 + $0xca8] sm:$0xff] }
 0x238   :  { %2022 = vmatpush2.msra.mxu1 %v1578_v59  ;;  %v1596_v59 = vld [vmem:[#allocation4 + $0xca0] sm:$0xff] }
 0x239   :  { %2024 = vmatmul.mubr.f32.vlgmr.msra.gmra.mxu1 %v2562_v56  ;;  %2101 = vmatprep.subr.mxu1 %v1573_v61  ;;  %v1589_v61 = vld [vmem:[#allocation4 + $0xc68] sm:$0xff] }
 0x23a   :  { %2102 = vmatpush1.msra.mxu1 %v1572_v62  ;;  %2165 = vmatprep.mubr.f32.mxu1 %v2560_v53  ;;  %v1588_v62 = vld [vmem:[#allocation4 + $0xc60] sm:$0xff] }
 0x23b   :  { %2103 = vmatprep.subr.mxu1 %v1565_v14  ;;  %v1581_v14 = vld [vmem:[#allocation4 + $0xc28] sm:$0xff] }
 0x23c   :  { %2104 = vmatpush1.msra.mxu1 %v1564_v63  ;;  %v1580_v63 = vld [vmem:[#allocation4 + $0xc20] sm:$0xff] }
 0x23d   :  { %2105 = vmatprep.subr.mxu1 %v1557_v1  ;;  %v1575_v1 = vld [vmem:[#allocation4 + $0xbf8] sm:$0xff] }
 0x23e   :  { %2106 = vmatpush1.msra.mxu1 %v1556_v10  ;;  %v1574_v10 = vld [vmem:[#allocation4 + $0xbf0] sm:$0xff] }
 0x23f   :  { %2107 = vmatprep.subr.mxu1 %v1549_v2  ;;  %v1567_v2 = vld [vmem:[#allocation4 + $0xbb8] sm:$0xff] }
 0x240   :  { %2108 = vmatpush1.msra.mxu1 %v1548_v16  ;;  %v1566_v16 = vld [vmem:[#allocation4 + $0xbb0] sm:$0xff] }
 0x241   :  { %2109 = vmatprep.subr.mxu1 %v1541_v4  ;;  %v1559_v4 = vld [vmem:[#allocation4 + $0xb78] sm:$0xff] }
 0x242   :  { %2110 = vmatpush1.msra.mxu1 %v1540_v12  ;;  %v1558_v12 = vld [vmem:[#allocation4 + $0xb70] sm:$0xff] }
 0x243   :  { %2111 = vmatprep.subr.mxu1 %v1533_v5  ;;  %v1551_v5 = vld [vmem:[#allocation4 + $0xb38] sm:$0xff] }
 0x244   :  { %2112 = vmatpush1.msra.mxu1 %v1532_v0  ;;  %v1550_v0 = vld [vmem:[#allocation4 + $0xb30] sm:$0xff] }
 0x245   :  { %2113 = vmatprep.subr.mxu1 %v1525_v3  ;;  %v1543_v3 = vld [vmem:[#allocation4 + $0xaf8] sm:$0xff] }
 0x246   :  { %2114 = vmatpush1.msra.mxu1 %v1524_v6  ;;  %v1542_v6 = vld [vmem:[#allocation4 + $0xaf0] sm:$0xff] }
 0x247   :  { %2115 = vmatprep.subr.mxu1 %v1517_v7  ;;  %v1535_v7 = vld [vmem:[#allocation4 + $0xab8] sm:$0xff] }
 0x248   :  { %2116 = vmatpush1.msra.mxu1 %v1516_v8  ;;  %v1534_v8 = vld [vmem:[#allocation4 + $0xab0] sm:$0xff] }
 0x249   :  { %2117 = vmatprep.subr.mxu1 %v1509_v9  ;;  %v1527_v9 = vld [vmem:[#allocation4 + $0xa78] sm:$0xff] }
 0x24a   :  { %2118 = vmatpush1.msra.mxu1 %v1508_v11  ;;  %v1526_v11 = vld [vmem:[#allocation4 + $0xa70] sm:$0xff] }
 0x24b   :  { %2119 = vmatprep.subr.mxu1 %v1501_v30  ;;  %v1518_v30 = vld [vmem:[#allocation4 + $0xa30] sm:$0xff] }
 0x24c   :  { %2120 = vmatpush1.msra.mxu1 %v1500_v13  ;;  %v1511_v13 = vld [vmem:[#allocation4 + $0x9f8] sm:$0xff] }
 0x24d   :  { %2121 = vmatprep.subr.mxu1 %v1493_v33  ;;  %v1510_v33 = vld [vmem:[#allocation4 + $0x9f0] sm:$0xff] }
 0x24e   :  { %2122 = vmatpush1.msra.mxu1 %v1492_v20  ;;  %v1503_v20 = vld [vmem:[#allocation4 + $0x9b8] sm:$0xff] }
 0x24f   :  { %2123 = vmatprep.subr.mxu1 %v1485_v25  ;;  %v1502_v25 = vld [vmem:[#allocation4 + $0x9b0] sm:$0xff] }
 0x250   :  { %2124 = vmatpush1.msra.mxu1 %v1484_v15  ;;  %v1495_v15 = vld [vmem:[#allocation4 + $0x978] sm:$0xff] }
 0x251   :  { %2125 = vmatprep.subr.mxu1 %v1477_v17  ;;  %v1494_v17 = vld [vmem:[#allocation4 + $0x970] sm:$0xff] }
 0x252   :  { %2126 = vmatpush1.msra.mxu1 %v1476_v18  ;;  %v1487_v18 = vld [vmem:[#allocation4 + $0x938] sm:$0xff] }
 0x253   :  { %2127 = vmatprep.subr.mxu1 %v1469_v60  ;;  %v1486_v60 = vld [vmem:[#allocation4 + $0x930] sm:$0xff] }
 0x254   :  { %2128 = vmatpush1.msra.mxu1 %v1468_v19  ;;  %v1479_v19 = vld [vmem:[#allocation4 + $0x8f8] sm:$0xff] }
 0x255   :  { %2129 = vmatprep.subr.mxu1 %v1461_v21  ;;  %v1478_v21 = vld [vmem:[#allocation4 + $0x8f0] sm:$0xff] }
 0x256   :  { %2130 = vmatpush1.msra.mxu1 %v1460_v22  ;;  %v1471_v22 = vld [vmem:[#allocation4 + $0x8b8] sm:$0xff] }
 0x257   :  { %2131 = vmatprep.subr.mxu1 %v1453_v23  ;;  %v1470_v23 = vld [vmem:[#allocation4 + $0x8b0] sm:$0xff] }
 0x258   :  { %2132 = vmatpush1.msra.mxu1 %v1452_v24  ;;  %v1463_v24 = vld [vmem:[#allocation4 + $0x878] sm:$0xff] }
 0x259   :  { %2133 = vmatprep.subr.mxu1 %v1701_v26  ;;  %v1462_v26 = vld [vmem:[#allocation4 + $0x870] sm:$0xff] }
 0x25a   :  { %2134 = vmatpush2.msra.mxu1 %v1700_v27  ;;  %v1455_v27 = vld [vmem:[#allocation4 + $0x838] sm:$0xff] }
 0x25b   :  { %2135 = vmatprep.subr.mxu1 %v1693_v28  ;;  %v1454_v28 = vld [vmem:[#allocation4 + $0x830] sm:$0xff] }
 0x25c   :  { %2136 = vmatpush2.msra.mxu1 %v1692_v29  ;;  %v1703_v29 = vld [vmem:[#allocation4 + $0xff8] sm:$0xff] }
 0x25d   :  { %2137 = vmatprep.subr.mxu1 %v1685_v31  ;;  %v1702_v31 = vld [vmem:[#allocation4 + $0xff0] sm:$0xff] }
 0x25e   :  { %2138 = vmatpush2.msra.mxu1 %v1684_v32  ;;  %v1695_v32 = vld [vmem:[#allocation4 + $0xfb8] sm:$0xff] }
 0x25f   :  { %2139 = vmatprep.subr.mxu1 %v1677_v34  ;;  %v1694_v34 = vld [vmem:[#allocation4 + $0xfb0] sm:$0xff] }
 0x260   :  { %2140 = vmatpush2.msra.mxu1 %v1676_v35  ;;  %v1687_v35 = vld [vmem:[#allocation4 + $0xf78] sm:$0xff] }
 0x261   :  { %2141 = vmatprep.subr.mxu1 %v1669_v36  ;;  %v1686_v36 = vld [vmem:[#allocation4 + $0xf70] sm:$0xff] }
 0x262   :  { %2142 = vmatpush2.msra.mxu1 %v1668_v37  ;;  %v1679_v37 = vld [vmem:[#allocation4 + $0xf38] sm:$0xff] }
 0x263   :  { %2143 = vmatprep.subr.mxu1 %v1661_v38  ;;  %v1678_v38 = vld [vmem:[#allocation4 + $0xf30] sm:$0xff] }
 0x264   :  { %2144 = vmatpush2.msra.mxu1 %v1660_v39  ;;  %v1671_v39 = vld [vmem:[#allocation4 + $0xef8] sm:$0xff] }
 0x265   :  { %2145 = vmatprep.subr.mxu1 %v1653_v40  ;;  %v1670_v40 = vld [vmem:[#allocation4 + $0xef0] sm:$0xff] }
 0x266   :  { %2146 = vmatpush2.msra.mxu1 %v1652_v41  ;;  %v1663_v41 = vld [vmem:[#allocation4 + $0xeb8] sm:$0xff] }
 0x267   :  { %2147 = vmatprep.subr.mxu1 %v1645_v42  ;;  %v1662_v42 = vld [vmem:[#allocation4 + $0xeb0] sm:$0xff] }
 0x268   :  { %2148 = vmatpush2.msra.mxu1 %v1644_v43  ;;  %v1655_v43 = vld [vmem:[#allocation4 + $0xe78] sm:$0xff] }
 0x269   :  { %2149 = vmatprep.subr.mxu1 %v1637_v45  ;;  %v1654_v45 = vld [vmem:[#allocation4 + $0xe70] sm:$0xff] }
 0x26a   :  { %2150 = vmatpush2.msra.mxu1 %v1636_v46  ;;  %v1647_v46 = vld [vmem:[#allocation4 + $0xe38] sm:$0xff] }
 0x26b   :  { %2151 = vmatprep.subr.mxu1 %v1629_v47  ;;  %v1646_v47 = vld [vmem:[#allocation4 + $0xe30] sm:$0xff] }
 0x26c   :  { %2152 = vmatpush2.msra.mxu1 %v1628_v48  ;;  %v1639_v48 = vld [vmem:[#allocation4 + $0xdf8] sm:$0xff] }
 0x26d   :  { %2153 = vmatprep.subr.mxu1 %v1621_v49  ;;  %v1638_v49 = vld [vmem:[#allocation4 + $0xdf0] sm:$0xff] }
 0x26e   :  { %2154 = vmatpush2.msra.mxu1 %v1620_v50  ;;  %v1631_v50 = vld [vmem:[#allocation4 + $0xdb8] sm:$0xff] }
 0x26f   :  { %2155 = vmatprep.subr.mxu1 %v1613_v51  ;;  %v1630_v51 = vld [vmem:[#allocation4 + $0xdb0] sm:$0xff] }
 0x270   :  { %2156 = vmatpush2.msra.mxu1 %v1612_v52  ;;  %v1623_v52 = vld [vmem:[#allocation4 + $0xd78] sm:$0xff] }
 0x271   :  { %2157 = vmatprep.subr.mxu1 %v1605_v55  ;;  %v1622_v55 = vld [vmem:[#allocation4 + $0xd70] sm:$0xff] }
 0x272   :  { %2158 = vmatpush2.msra.mxu1 %v1604_v57  ;;  %v1615_v57 = vld [vmem:[#allocation4 + $0xd38] sm:$0xff] }
 0x273   :  { %2159 = vmatprep.subr.mxu1 %v1597_v58  ;;  %v1614_v58 = vld [vmem:[#allocation4 + $0xd30] sm:$0xff] }
 0x274   :  { %2160 = vmatpush2.msra.mxu1 %v1596_v59  ;;  %v1607_v59 = vld [vmem:[#allocation4 + $0xcf8] sm:$0xff] }
 0x275   :  { %2161 = vmatprep.subr.mxu1 %v1589_v61  ;;  %v1606_v61 = vld [vmem:[#allocation4 + $0xcf0] sm:$0xff] }
 0x276   :  { %2162 = vmatpush2.msra.mxu1 %v1588_v62  ;;  %v1599_v62 = vld [vmem:[#allocation4 + $0xcb8] sm:$0xff] }
 0x277   :  { %2163 = vmatprep.subr.mxu1 %v1581_v14  ;;  %v1598_v14 = vld [vmem:[#allocation4 + $0xcb0] sm:$0xff] }
 0x278   :  { %2164 = vmatpush2.msra.mxu1 %v1580_v63  ;;  %v1591_v63 = vld [vmem:[#allocation4 + $0xc78] sm:$0xff] }
 0x279   :  { %2166 = vmatmul.mubr.f32.vlgmr.msra.gmra.mxu1 %v2562_v56  ;;  %2243 = vmatprep.subr.mxu1 %v1575_v1  ;;  %v1590_v1 = vld [vmem:[#allocation4 + $0xc70] sm:$0xff] }
 0x27a   :  { %2244 = vmatpush1.msra.mxu1 %v1574_v10  ;;  %2307 = vmatprep.mubr.f32.mxu1 %v2560_v53  ;;  %v1519_v53 = vld [vmem:[#allocation4 + $0xa38] sm:$0xff] }
 0x27b   :  { %2245 = vmatprep.subr.mxu1 %v1567_v2  ;;  %v1583_v10 = vld [vmem:[#allocation4 + $0xc38] sm:$0xff]  ;;  %v1582_v2 = vld [vmem:[#allocation4 + $0xc30] sm:$0xff] }
 0x27c   :  { %2246 = vmatpush1.msra.mxu1 %v1566_v16  ;;  %v1812_v16 = vpop.f32.mrf.mxu0 }
 0x27d   :  { %2247 = vmatprep.subr.mxu1 %v1559_v4  ;;  %v1712_v4 = vsub.s32 1, %v2488_v44 }
 0x27e   :  { %2248 = vmatpush1.msra.mxu1 %v1558_v12  ;;  %v1708_v12 = vsub.s32 0, %v2488_v44 }
 0x27f   :  { %2249 = vmatprep.subr.mxu1 %v1551_v5  ;;  %v1704_v5 = vld [vmem:[#allocation6] sm:$0xff] }
 0x280   :  { %2250 = vmatpush1.msra.mxu1 %v1550_v0  ;;  %v1814_v0 = vpop.f32.mrf.mxu0 }
 0x281   :  { %2251 = vmatprep.subr.mxu1 %v1543_v3 }
 0x282   :  { %2252 = vmatpush1.msra.mxu1 %v1542_v6  ;;  %v1713_v6 = vrot.slane %v1704_v5, %v1712_v4 }
 0x283   :  { %2253 = vmatprep.subr.mxu1 %v1535_v7  ;;  %v1716_v7 = vsub.s32 2, %v2488_v44 }
 0x284   :  { %2254 = vmatpush1.msra.mxu1 %v1534_v8  ;;  %v1720_v8 = vsub.s32 3, %v2488_v44 }
 0x285   :  { %2255 = vmatprep.subr.mxu1 %v1527_v9  ;;  %v1954_v9 = vpop.f32.mrf.mxu0 }
 0x286   :  { %2256 = vmatpush1.msra.mxu1 %v1526_v11  ;;  %v1709_v11 = vrot.slane %v1704_v5, %v1708_v12 }
 0x287   :  { %2257 = vmatprep.subr.mxu1 %v1519_v53 }
 0x288   :  { %2258 = vmatpush1.msra.mxu1 %v1518_v30  ;;  %v1815_v30 = vadd.f32 %v1814_v0, %v1713_v6 }
 0x289   :  { %2259 = vmatprep.subr.mxu1 %v1511_v13  ;;  %v1717_v13 = vrot.slane %v1704_v5, %v1716_v7 }
 0x28a   :  { %2260 = vmatpush1.msra.mxu1 %v1510_v33  ;;  %v1721_v33 = vrot.slane %v1704_v5, %v1720_v8 }
 0x28b   :  { %2261 = vmatprep.subr.mxu1 %v1503_v20  ;;  %v1813_v20 = vadd.f32 %v1812_v16, %v1709_v11 }
 0x28c   :  { %2262 = vmatpush1.msra.mxu1 %v1502_v25 }
 0x28d   :  { %2263 = vmatprep.subr.mxu1 %v1495_v15 }
 0x28e   :  { %2264 = vmatpush1.msra.mxu1 %v1494_v17  ;;  %v1955_v17 = vadd.f32 %v1954_v9, %v1717_v13 }
 0x28f   :  { %2265 = vmatprep.subr.mxu1 %v1487_v18 }
 0x290   :  { %2266 = vmatpush1.msra.mxu1 %v1486_v60 }
 0x291   :  { %2267 = vmatprep.subr.mxu1 %v1479_v19 }
 0x292   :  { %2268 = vmatpush1.msra.mxu1 %v1478_v21 }
 0x293   :  { %2269 = vmatprep.subr.mxu1 %v1471_v22 }
 0x294   :  { %2270 = vmatpush1.msra.mxu1 %v1470_v23 }
 0x295   :  { %2271 = vmatprep.subr.mxu1 %v1463_v24 }
 0x296   :  { %2272 = vmatpush1.msra.mxu1 %v1462_v26 }
 0x297   :  { %2273 = vmatprep.subr.mxu1 %v1455_v27 }
 0x298   :  { %2274 = vmatpush1.msra.mxu1 %v1454_v28 }
 0x299   :  { %2275 = vmatprep.subr.mxu1 %v1703_v29 }
 0x29a   :  { %2276 = vmatpush2.msra.mxu1 %v1702_v31  ;;  %v1728_v31 = vsub.s32 5, %v2488_v44 }
 0x29b   :  { %2277 = vmatprep.subr.mxu1 %v1695_v32  ;;  %v1724_v32 = vsub.s32 4, %v2488_v44 }
 0x29c   :  { %2278 = vmatpush2.msra.mxu1 %v1694_v34 }
 0x29d   :  { %2279 = vmatprep.subr.mxu1 %v1687_v35 }
 0x29e   :  { %2280 = vmatpush2.msra.mxu1 %v1686_v36  ;;  %v1729_v36 = vrot.slane %v1704_v5, %v1728_v31 }
 0x29f   :  { %2281 = vmatprep.subr.mxu1 %v1679_v37  ;;  %v1732_v37 = vsub.s32 6, %v2488_v44 }
 0x2a0   :  { %2282 = vmatpush2.msra.mxu1 %v1678_v38  ;;  %v1736_v38 = vsub.s32 7, %v2488_v44 }
 0x2a1   :  { %2283 = vmatprep.subr.mxu1 %v1671_v39 }
 0x2a2   :  { %2284 = vmatpush2.msra.mxu1 %v1670_v40  ;;  %v1725_v40 = vrot.slane %v1704_v5, %v1724_v32 }
 0x2a3   :  { %2285 = vmatprep.subr.mxu1 %v1663_v41 }
 0x2a4   :  { %2286 = vmatpush2.msra.mxu1 %v1662_v42 }
 0x2a5   :  { %2287 = vmatprep.subr.mxu1 %v1655_v43  ;;  %v1733_v43 = vrot.slane %v1704_v5, %v1732_v37 }
 0x2a6   :  { %2288 = vmatpush2.msra.mxu1 %v1654_v45  ;;  %v1737_v45 = vrot.slane %v1704_v5, %v1736_v38 }
 0x2a7   :  { %2289 = vmatprep.subr.mxu1 %v1647_v46 }
 0x2a8   :  { %2290 = vmatpush2.msra.mxu1 %v1646_v47 }
 0x2a9   :  { %2291 = vmatprep.subr.mxu1 %v1639_v48 }
 0x2aa   :  { %2292 = vmatpush2.msra.mxu1 %v1638_v49 }
 0x2ab   :  { %2293 = vmatprep.subr.mxu1 %v1631_v50 }
 0x2ac   :  { %2294 = vmatpush2.msra.mxu1 %v1630_v51 }
 0x2ad   :  { %2295 = vmatprep.subr.mxu1 %v1623_v52 }
 0x2ae   :  { %2296 = vmatpush2.msra.mxu1 %v1622_v55 }
 0x2af   :  { %2297 = vmatprep.subr.mxu1 %v1615_v57 }
 0x2b0   :  { %2298 = vmatpush2.msra.mxu1 %v1614_v58 }
 0x2b1   :  { %2299 = vmatprep.subr.mxu1 %v1607_v59 }
 0x2b2   :  { %2300 = vmatpush2.msra.mxu1 %v1606_v61 }
 0x2b3   :  { %2301 = vmatprep.subr.mxu1 %v1599_v62 }
 0x2b4   :  { %2302 = vmatpush2.msra.mxu1 %v1598_v14 }
 0x2b5   :  { %2303 = vmatprep.subr.mxu1 %v1591_v63 }
 0x2b6   :  { %2304 = vmatpush2.msra.mxu1 %v1590_v1 }
 0x2b7   :  { %2305 = vmatprep.subr.mxu1 %v1583_v10 }
 0x2b8   :  { %2306 = vmatpush2.msra.mxu1 %v1582_v2 }
 0x2b9   :  { %2308 = vmatmul.mubr.f32.vlgmr.msra.gmra.mxu1 %v2562_v56  ;;  %v1883_v3 = vpop.f32.mrf.mxu1  ;;  %v1956_v56 = vpop.f32.mrf.mxu0 }
 0x2ba   :  { %v1957_v18 = vadd.f32 %v1956_v56, %v1721_v33  ;;  %v1884_v60 = vadd.f32 %v1883_v3, %v1813_v20 }
 0x2bb   :  { %v1885_v53 = vpop.f32.mrf.mxu1  ;;  %v2096_v29 = vpop.f32.mrf.mxu0 }
 0x2bc   :  { %v1886_v25 = vadd.f32 %v1885_v53, %v1815_v30  ;;  %v2097_v47 = vadd.f32 %v2096_v29, %v1725_v40 }
 0x2bd   :  { %v2098_v34 = vpop.f32.mrf.mxu0 }
 0x2be   :  { %v2324_v21 = vcombine.low %v1884_v60, %v1886_v25  ;;  %v2099_v42 = vadd.f32 %v2098_v34, %v1729_v36 }
 0x2c0   :  { %v2332_v26 = vrot.slane %v2324_v21, %v2491_v54 }
 0x2f6   :  { %v2238_v39 = vpop.f32.mrf.mxu0 }
 0x2f7   :  { %v2239_v50 = vadd.f32 %v2238_v39, %v1733_v43 }
 0x2f8   :  { %v2240_v46 = vpop.f32.mrf.mxu0 }
 0x2f9   :  { %v2025_v15 = vpop.f32.mrf.mxu1  ;;  %v2241_v51 = vadd.f32 %v2240_v46, %v1737_v45 }
 0x2fa   :  { %v2026_v22 = vadd.f32 %v2025_v15, %v1955_v17 }
 0x2fb   :  { %v2027_v19 = vpop.f32.mrf.mxu1 }
 0x2fc   :  { %v2028_v23 = vadd.f32 %v2027_v19, %v1957_v18 }
 0x2fe   :  { %v2325_v24 = vcombine.low %v2026_v22, %v2028_v23 }
 0x300   :  { %v2339_v27 = vrot.slane %v2325_v24, %v2491_v54 }
 0x302   :  { %v2340_v28 = vcombine.low %v2332_v26, %v2339_v27 }
 0x304   :  { %2360 = vst [vmem:[%s2595_s4 + $0x10] sm:$0xff] %v2340_v28 }
 0x339   :  { %v2167_v35 = vpop.f32.mrf.mxu1 }
 0x33a   :  { %v2168_v52 = vadd.f32 %v2167_v35, %v2097_v47 }
 0x33b   :  { %v2169_v41 = vpop.f32.mrf.mxu1 }
 0x33c   :  { %v2170_v48 = vadd.f32 %v2169_v41, %v2099_v42 }
 0x33e   :  { %v2341_v57 = vcombine.low %v2168_v52, %v2170_v48 }
 0x340   :  { %v2349_v44 = vrot.slane %v2341_v57, %v2491_v54 }
 0x379   :  { %v2309_v49 = vpop.f32.mrf.mxu1 }
 0x37a   :  { %v2310_v58 = vadd.f32 %v2309_v49, %v2239_v50 }
 0x37b   :  { %v2311_v55 = vpop.f32.mrf.mxu1 }
 0x37c   :  { %v2312_v59 = vadd.f32 %v2311_v55, %v2241_v51 }
 0x37e   :  { %v2342_v61 = vcombine.low %v2310_v58, %v2312_v59 }
 0x380   :  { %v2356_v62 = vrot.slane %v2342_v61, %v2491_v54 }
 0x382   :  { %v2357_v14 = vcombine.low %v2349_v44, %v2356_v62 }
 0x384   :  { %2361 = vst [vmem:[%s2595_s4 + $0x18] sm:$0xff] %v2357_v14 }
 0x385   :  { %2366 = vsyncpa [#allocation3], 1 }
 0x386   :  { %2367 = vsyncpa [#allocation5], 1 }

</bundles_post_ra>
